<compile_context>
chip_gen: v7x
topology: tpu7x:2x2x1
jax: 0.10.0
libtpu: 0.0.40
codegen_flags: <defaults>
</compile_context>

<pallas_src>
import functools

import jax
import jax.numpy as jnp
from jax.experimental import pallas as pl
from jax.experimental.pallas import tpu as pltpu

LANE = 128
K = 3
HC_DILATIONS = (1, 3, 9, 27, 1, 1)   # Hc1: 1,3,9,27   Hc2: 1,1


def _round_up(n, m):
    return ((n + m - 1) // m) * m


# --------------------------------------------------------------------------
# Fused kernel: one batch element per grid step, everything resident in VMEM.
# --------------------------------------------------------------------------
def _audiodec_kernel(x_ref, wc1_ref, bc1_ref, wh_ref, bh_ref, wt_ref, bt_ref,
                     wcl_ref, bcl_ref, o_ref, buf_ref, *, T, PADT):
    D = buf_ref.shape[-1]

    # Zero the causal left-halo rows (acts as the 'causal' zero padding for
    # every highway layer; activation rows live at [PADT, PADT+T)).
    buf_ref[0:PADT, :] = jnp.zeros((PADT, D), jnp.float32)

    # ---- Conv1st: 1x1 conv (2*dSize -> dSize), no activation --------------
    x = x_ref[0]                                              # (T, C0) bf16
    y = jnp.dot(x, wc1_ref[...], preferred_element_type=jnp.float32)
    buf_ref[PADT:PADT + T, :] = y + bc1_ref[...]

    # ---- Hc1 + Hc2: 6 highway convs, K=3 causal ---------------------------
    # Tap convention: tap k of the (K, Cin, Cout) weight multiplies
    # x[t - (K-1-k)*dil], i.e. the same ordering as PyTorch Conv1d weight
    # [:, :, k] under left-only ('causal') padding of (K-1)*dil.
    for l, dil in enumerate(HC_DILATIONS):
        s0 = buf_ref[PADT - 2 * dil:PADT - 2 * dil + T, :]    # x[t-2*dil]
        s1 = buf_ref[PADT - dil:PADT - dil + T, :]            # x[t-dil]
        s2 = buf_ref[PADT:PADT + T, :]                        # x[t] (residual)
        slab = jnp.concatenate([s0, s1, s2], axis=-1).astype(jnp.bfloat16)
        # single fused matmul: (T, 3D) x (3D, 2D) -> [gate | value]
        h = jnp.dot(slab, wh_ref[l], preferred_element_type=jnp.float32)
        h = h + bh_ref[l]
        gate = jax.nn.sigmoid(h[:, :D])                       # f32 gate math
        out = gate * h[:, D:] + (1.0 - gate) * s2
        buf_ref[PADT:PADT + T, :] = out

    # ---- ConvThrice: three 1x1 conv + ReLU --------------------------------
    y = buf_ref[PADT:PADT + T, :]
    for i in range(3):
        y = jnp.dot(y.astype(jnp.bfloat16), wt_ref[i],
                    preferred_element_type=jnp.float32) + bt_ref[i]
        y = jnp.maximum(y, 0.0)

    # ---- ConvLast: 1x1 conv dSize -> fbinSize, sigmoid ---------------------
    y = jnp.dot(y.astype(jnp.bfloat16), wcl_ref[...],
                preferred_element_type=jnp.float32) + bcl_ref[...]
    o_ref[0] = jax.nn.sigmoid(y).astype(o_ref.dtype)          # lane-dense store


# --------------------------------------------------------------------------
# Parameter construction (deterministic, synthetic) and lane-padding / packing
# --------------------------------------------------------------------------
def make_params(key, fbin, d):
    keys = iter(jax.random.split(key, 64))

    def w(shape, scale=0.1):
        return scale * jax.random.normal(next(keys), shape, jnp.float32)

    return {
        "conv1st": (w((2 * d, d)), w((d,), 0.01)),
        "hc": [(w((K, d, d)), w((d,), 0.01), w((K, d, d)), w((d,), 0.01))
               for _ in HC_DILATIONS],
        "convthrice": [(w((d, d)), w((d,), 0.01)) for _ in range(3)],
        "convlast": (w((d, fbin)), w((fbin,), 0.01)),
    }


def _pack_params(params, *, d, fbin, D, C0, Fp):
    """Zero-pad channels to lane multiples, stack layers, cast weights to bf16."""
    nH = len(HC_DILATIONS)

    def pad2(a, r, c):
        return jnp.pad(a, ((0, r - a.shape[0]), (0, c - a.shape[1])))

    wc, bc = params["conv1st"]
    wc1 = pad2(wc, C0, D).astype(jnp.bfloat16)
    bc1 = jnp.pad(bc, (0, D - d)).reshape(1, D).astype(jnp.float32)

    wh = jnp.zeros((nH, 3 * D, 2 * D), jnp.float32)
    bh = jnp.zeros((nH, 1, 2 * D), jnp.float32)
    for l, (w1, b1, w2, b2) in enumerate(params["hc"]):
        for k in range(K):
            wh = wh.at[l, k * D:k * D + d, 0:d].set(w1[k])        # gate taps
            wh = wh.at[l, k * D:k * D + d, D:D + d].set(w2[k])    # value taps
        bh = bh.at[l, 0, 0:d].set(b1)
        bh = bh.at[l, 0, D:D + d].set(b2)
    wh = wh.astype(jnp.bfloat16)

    wt = jnp.zeros((3, D, D), jnp.float32)
    bt = jnp.zeros((3, 1, D), jnp.float32)
    for i, (w_, b_) in enumerate(params["convthrice"]):
        wt = wt.at[i, 0:d, 0:d].set(w_)
        bt = bt.at[i, 0, 0:d].set(b_)
    wt = wt.astype(jnp.bfloat16)

    wl, bl = params["convlast"]
    wcl = pad2(wl, D, Fp).astype(jnp.bfloat16)
    bcl = jnp.pad(bl, (0, Fp - fbin)).reshape(1, Fp).astype(jnp.float32)

    return wc1, bc1, wh, bh, wt, bt, wcl, bcl


# --------------------------------------------------------------------------
# Forward: PyTorch NCW in, PyTorch NCW out.
# --------------------------------------------------------------------------
def audiodec_forward(params, x_ncw, *, fbin, d):
    """x_ncw: (B, 2*dSize, T).  Returns (B, fbinSize, T)."""
    B, c_in, T = x_ncw.shape
    D = max(LANE, _round_up(d, LANE))
    C0 = max(LANE, _round_up(c_in, LANE))
    Fp = max(LANE, _round_up(fbin, LANE))
    PADT = _round_up(2 * max(HC_DILATIONS), 8)
    nH = len(HC_DILATIONS)

    # channels-last, pad channels to a lane multiple, bf16 for the DMA/MXU.
    x = jnp.transpose(x_ncw, (0, 2, 1))
    if C0 > c_in:
        x = jnp.pad(x, ((0, 0), (0, 0), (0, C0 - c_in)))
    x = x.astype(jnp.bfloat16)

    packed = _pack_params(params, d=d, fbin=fbin, D=D, C0=C0, Fp=Fp)

    kern = functools.partial(_audiodec_kernel, T=T, PADT=PADT)
    out = pl.pallas_call(
        kern,
        out_shape=jax.ShapeDtypeStruct((B, T, Fp), jnp.float32),
        grid=(B,),
        in_specs=[
            pl.BlockSpec((1, T, C0), lambda b: (b, 0, 0)),          # x
            pl.BlockSpec((C0, D), lambda b: (0, 0)),                # Conv1st W
            pl.BlockSpec((1, D), lambda b: (0, 0)),                 # Conv1st b
            pl.BlockSpec((nH, 3 * D, 2 * D), lambda b: (0, 0, 0)),  # Hc W
            pl.BlockSpec((nH, 1, 2 * D), lambda b: (0, 0, 0)),      # Hc b
            pl.BlockSpec((3, D, D), lambda b: (0, 0, 0)),           # ConvThrice W
            pl.BlockSpec((3, 1, D), lambda b: (0, 0, 0)),           # ConvThrice b
            pl.BlockSpec((D, Fp), lambda b: (0, 0)),                # ConvLast W
            pl.BlockSpec((1, Fp), lambda b: (0, 0)),                # ConvLast b
        ],
        out_specs=pl.BlockSpec((1, T, Fp), lambda b: (b, 0, 0)),
        scratch_shapes=[pltpu.VMEM((PADT + T, D), jnp.float32)],
        compiler_params=pltpu.CompilerParams(
            dimension_semantics=("parallel",)),
    )(x, *packed)

    # drop channel padding, back to PyTorch NCW layout
    return jnp.transpose(out[:, :, :fbin], (0, 2, 1))


if __name__ == "__main__":
    # Small, consistent shapes: AudioDec(fbinSize, dSize); input is (B, 2*dSize, T).
    B, T = 2, 64
    dSize, fbinSize = 64, 80

    key = jax.random.PRNGKey(0)
    pkey, xkey = jax.random.split(key)
    params = make_params(pkey, fbinSize, dSize)
    x = jax.random.normal(xkey, (B, 2 * dSize, T), jnp.float32)

    out = audiodec_forward(params, x, fbin=fbinSize, d=dSize)
    out = jax.block_until_ready(out)
    assert out.shape == (B, fbinSize, T), out.shape
    assert bool(jnp.all(jnp.isfinite(out)))
    assert bool(jnp.all((out >= 0.0) & (out <= 1.0)))  # sigmoid output
    print("KERNEL_OK")
</pallas_src>

<mosaic_0001>
module attributes {stable_mosaic.version = 11 : i64} {
  func.func @_audiodec_kernel(%arg0: i32, %arg1: memref<1x64x128xbf16, #tpu.memory_space<vmem>>, %arg2: memref<128x128xbf16, #tpu.memory_space<vmem>>, %arg3: memref<1x128xf32, #tpu.memory_space<vmem>>, %arg4: memref<6x384x256xbf16, #tpu.memory_space<vmem>>, %arg5: memref<6x1x256xf32, #tpu.memory_space<vmem>>, %arg6: memref<3x128x128xbf16, #tpu.memory_space<vmem>>, %arg7: memref<3x1x128xf32, #tpu.memory_space<vmem>>, %arg8: memref<128x128xbf16, #tpu.memory_space<vmem>>, %arg9: memref<1x128xf32, #tpu.memory_space<vmem>>, %arg10: memref<1x64x128xf32, #tpu.memory_space<vmem>>, %arg11: memref<120x128xf32, #tpu.memory_space<vmem>>) attributes {dimension_semantics = [#tpu.dimension_semantics<parallel>], iteration_bounds = array<i64: 2>, scalar_prefetch = 0 : i64, scratch_operands = 1 : i64, tpu.core_type = #tpu.core_type<tc>, window_params = [{transform_indices = @transform_0, window_bounds = array<i64: 1, 64, 128>}, {pipeline_mode = #tpu.pipeline_mode<synchronous>, transform_indices = @transform_1, window_bounds = array<i64: 128, 128>}, {pipeline_mode = #tpu.pipeline_mode<synchronous>, transform_indices = @transform_2, window_bounds = array<i64: 1, 128>}, {pipeline_mode = #tpu.pipeline_mode<synchronous>, transform_indices = @transform_3, window_bounds = array<i64: 6, 384, 256>}, {pipeline_mode = #tpu.pipeline_mode<synchronous>, transform_indices = @transform_4, window_bounds = array<i64: 6, 1, 256>}, {pipeline_mode = #tpu.pipeline_mode<synchronous>, transform_indices = @transform_5, window_bounds = array<i64: 3, 128, 128>}, {pipeline_mode = #tpu.pipeline_mode<synchronous>, transform_indices = @transform_6, window_bounds = array<i64: 3, 1, 128>}, {pipeline_mode = #tpu.pipeline_mode<synchronous>, transform_indices = @transform_7, window_bounds = array<i64: 128, 128>}, {pipeline_mode = #tpu.pipeline_mode<synchronous>, transform_indices = @transform_8, window_bounds = array<i64: 1, 128>}, {transform_indices = @transform_9, window_bounds = array<i64: 1, 64, 128>}]} {
    %cst = arith.constant 0.000000e+00 : f32
    %0 = vector.broadcast %cst : f32 to vector<56x128xf32>
    %c0 = arith.constant 0 : index
    %c0_0 = arith.constant 0 : index
    %1 = vector.load %arg11[%c0, %c0_0] : memref<120x128xf32, #tpu.memory_space<vmem>>, vector<56x128xf32>
    tpu.vector_store %arg11[%c0, %c0_0], %0 {strides = array<i32>} : memref<120x128xf32, #tpu.memory_space<vmem>>, vector<56x128xf32>,
    %c0_1 = arith.constant 0 : index
    %c0_2 = arith.constant 0 : index
    %c0_3 = arith.constant 0 : index
    %2 = vector.load %arg1[%c0_1, %c0_2, %c0_3] : memref<1x64x128xbf16, #tpu.memory_space<vmem>>, vector<1x64x128xbf16>
    %3 = vector.shape_cast %2 : vector<1x64x128xbf16> to vector<64x128xbf16>
    %c0_4 = arith.constant 0 : index
    %c0_5 = arith.constant 0 : index
    %4 = vector.load %arg2[%c0_4, %c0_5] : memref<128x128xbf16, #tpu.memory_space<vmem>>, vector<128x128xbf16>
    %cst_6 = arith.constant dense<0.000000e+00> : vector<64x128xf32>
    %5 = tpu.matmul %3, %4, %cst_6 {dimension_numbers = #tpu.dot_dimension_numbers<[1], [0], [0], [1], [0, 0, 1, 1], [], []>} : vector<64x128xbf16>, vector<128x128xbf16>, vector<64x128xf32> -> vector<64x128xf32>
    %c0_7 = arith.constant 0 : index
    %c0_8 = arith.constant 0 : index
    %6 = vector.load %arg3[%c0_7, %c0_8] : memref<1x128xf32, #tpu.memory_space<vmem>>, vector<1x128xf32>
    %7 = vector.broadcast %6 : vector<1x128xf32> to vector<64x128xf32>
    %8 = arith.addf %5, %7 : vector<64x128xf32>
    %c56 = arith.constant 56 : index
    %c0_9 = arith.constant 0 : index
    %9 = vector.load %arg11[%c56, %c0_9] : memref<120x128xf32, #tpu.memory_space<vmem>>, vector<64x128xf32>
    tpu.vector_store %arg11[%c56, %c0_9], %8 {strides = array<i32>} : memref<120x128xf32, #tpu.memory_space<vmem>>, vector<64x128xf32>,
    %c54 = arith.constant 54 : index
    %c0_10 = arith.constant 0 : index
    %10 = vector.load %arg11[%c54, %c0_10] : memref<120x128xf32, #tpu.memory_space<vmem>>, vector<64x128xf32>
    %c55 = arith.constant 55 : index
    %c0_11 = arith.constant 0 : index
    %11 = vector.load %arg11[%c55, %c0_11] : memref<120x128xf32, #tpu.memory_space<vmem>>, vector<64x128xf32>
    %c56_12 = arith.constant 56 : index
    %c0_13 = arith.constant 0 : index
    %12 = vector.load %arg11[%c56_12, %c0_13] : memref<120x128xf32, #tpu.memory_space<vmem>>, vector<64x128xf32>
    %13 = tpu.concatenate %10, %11, %12 in 1 : vector<64x128xf32>, vector<64x128xf32>, vector<64x128xf32> -> vector<64x384xf32>
    %14 = arith.truncf %13 : vector<64x384xf32> to vector<64x384xbf16>
    %c0_14 = arith.constant 0 : index
    %c0_15 = arith.constant 0 : index
    %c0_16 = arith.constant 0 : index
    %15 = vector.load %arg4[%c0_14, %c0_15, %c0_16] : memref<6x384x256xbf16, #tpu.memory_space<vmem>>, vector<1x384x256xbf16>
    %16 = vector.shape_cast %15 : vector<1x384x256xbf16> to vector<384x256xbf16>
    %cst_17 = arith.constant dense<0.000000e+00> : vector<64x256xf32>
    %17 = tpu.matmul %14, %16, %cst_17 {dimension_numbers = #tpu.dot_dimension_numbers<[1], [0], [0], [1], [0, 0, 1, 1], [], []>} : vector<64x384xbf16>, vector<384x256xbf16>, vector<64x256xf32> -> vector<64x256xf32>
    %c0_18 = arith.constant 0 : index
    %c0_19 = arith.constant 0 : index
    %c0_20 = arith.constant 0 : index
    %18 = vector.load %arg5[%c0_18, %c0_19, %c0_20] : memref<6x1x256xf32, #tpu.memory_space<vmem>>, vector<1x1x256xf32>
    %19 = vector.shape_cast %18 : vector<1x1x256xf32> to vector<1x256xf32>
    %20 = vector.broadcast %19 : vector<1x256xf32> to vector<64x256xf32>
    %21 = arith.addf %17, %20 : vector<64x256xf32>
    %22 = vector.extract_strided_slice %21 {offsets = [0, 0], sizes = [64, 128], strides = [1, 1]} : vector<64x256xf32> to vector<64x128xf32>
    %23 = arith.negf %22 : vector<64x128xf32>
    %24 = math.exp %23 : vector<64x128xf32>
    %cst_21 = arith.constant 1.000000e+00 : f32
    %25 = vector.broadcast %cst_21 : f32 to vector<64x128xf32>
    %26 = arith.addf %25, %24 : vector<64x128xf32>
    %27 = arith.divf %25, %26 : vector<64x128xf32>
    %28 = vector.extract_strided_slice %21 {offsets = [0, 128], sizes = [64, 128], strides = [1, 1]} : vector<64x256xf32> to vector<64x128xf32>
    %29 = arith.mulf %27, %28 : vector<64x128xf32>
    %cst_22 = arith.constant 1.000000e+00 : f32
    %30 = vector.broadcast %cst_22 : f32 to vector<64x128xf32>
    %31 = arith.subf %30, %27 : vector<64x128xf32>
    %32 = arith.mulf %31, %12 : vector<64x128xf32>
    %33 = arith.addf %29, %32 : vector<64x128xf32>
    %c56_23 = arith.constant 56 : index
    %c0_24 = arith.constant 0 : index
    %34 = vector.load %arg11[%c56_23, %c0_24] : memref<120x128xf32, #tpu.memory_space<vmem>>, vector<64x128xf32>
    tpu.vector_store %arg11[%c56_23, %c0_24], %33 {strides = array<i32>} : memref<120x128xf32, #tpu.memory_space<vmem>>, vector<64x128xf32>,
    %c50 = arith.constant 50 : index
    %c0_25 = arith.constant 0 : index
    %35 = vector.load %arg11[%c50, %c0_25] : memref<120x128xf32, #tpu.memory_space<vmem>>, vector<64x128xf32>
    %c53 = arith.constant 53 : index
    %c0_26 = arith.constant 0 : index
    %36 = vector.load %arg11[%c53, %c0_26] : memref<120x128xf32, #tpu.memory_space<vmem>>, vector<64x128xf32>
    %c56_27 = arith.constant 56 : index
    %c0_28 = arith.constant 0 : index
    %37 = vector.load %arg11[%c56_27, %c0_28] : memref<120x128xf32, #tpu.memory_space<vmem>>, vector<64x128xf32>
    %38 = tpu.concatenate %35, %36, %37 in 1 : vector<64x128xf32>, vector<64x128xf32>, vector<64x128xf32> -> vector<64x384xf32>
    %39 = arith.truncf %38 : vector<64x384xf32> to vector<64x384xbf16>
    %c1 = arith.constant 1 : index
    %c0_29 = arith.constant 0 : index
    %c0_30 = arith.constant 0 : index
    %40 = vector.load %arg4[%c1, %c0_29, %c0_30] : memref<6x384x256xbf16, #tpu.memory_space<vmem>>, vector<1x384x256xbf16>
    %41 = vector.shape_cast %40 : vector<1x384x256xbf16> to vector<384x256xbf16>
    %cst_31 = arith.constant dense<0.000000e+00> : vector<64x256xf32>
    %42 = tpu.matmul %39, %41, %cst_31 {dimension_numbers = #tpu.dot_dimension_numbers<[1], [0], [0], [1], [0, 0, 1, 1], [], []>} : vector<64x384xbf16>, vector<384x256xbf16>, vector<64x256xf32> -> vector<64x256xf32>
    %c1_32 = arith.constant 1 : index
    %c0_33 = arith.constant 0 : index
    %c0_34 = arith.constant 0 : index
    %43 = vector.load %arg5[%c1_32, %c0_33, %c0_34] : memref<6x1x256xf32, #tpu.memory_space<vmem>>, vector<1x1x256xf32>
    %44 = vector.shape_cast %43 : vector<1x1x256xf32> to vector<1x256xf32>
    %45 = vector.broadcast %44 : vector<1x256xf32> to vector<64x256xf32>
    %46 = arith.addf %42, %45 : vector<64x256xf32>
    %47 = vector.extract_strided_slice %46 {offsets = [0, 0], sizes = [64, 128], strides = [1, 1]} : vector<64x256xf32> to vector<64x128xf32>
    %48 = arith.negf %47 : vector<64x128xf32>
    %49 = math.exp %48 : vector<64x128xf32>
    %cst_35 = arith.constant 1.000000e+00 : f32
    %50 = vector.broadcast %cst_35 : f32 to vector<64x128xf32>
    %51 = arith.addf %50, %49 : vector<64x128xf32>
    %52 = arith.divf %50, %51 : vector<64x128xf32>
    %53 = vector.extract_strided_slice %46 {offsets = [0, 128], sizes = [64, 128], strides = [1, 1]} : vector<64x256xf32> to vector<64x128xf32>
    %54 = arith.mulf %52, %53 : vector<64x128xf32>
    %cst_36 = arith.constant 1.000000e+00 : f32
    %55 = vector.broadcast %cst_36 : f32 to vector<64x128xf32>
    %56 = arith.subf %55, %52 : vector<64x128xf32>
    %57 = arith.mulf %56, %37 : vector<64x128xf32>
    %58 = arith.addf %54, %57 : vector<64x128xf32>
    %c56_37 = arith.constant 56 : index
    %c0_38 = arith.constant 0 : index
    %59 = vector.load %arg11[%c56_37, %c0_38] : memref<120x128xf32, #tpu.memory_space<vmem>>, vector<64x128xf32>
    tpu.vector_store %arg11[%c56_37, %c0_38], %58 {strides = array<i32>} : memref<120x128xf32, #tpu.memory_space<vmem>>, vector<64x128xf32>,
    %c38 = arith.constant 38 : index
    %c0_39 = arith.constant 0 : index
    %60 = vector.load %arg11[%c38, %c0_39] : memref<120x128xf32, #tpu.memory_space<vmem>>, vector<64x128xf32>
    %c47 = arith.constant 47 : index
    %c0_40 = arith.constant 0 : index
    %61 = vector.load %arg11[%c47, %c0_40] : memref<120x128xf32, #tpu.memory_space<vmem>>, vector<64x128xf32>
    %c56_41 = arith.constant 56 : index
    %c0_42 = arith.constant 0 : index
    %62 = vector.load %arg11[%c56_41, %c0_42] : memref<120x128xf32, #tpu.memory_space<vmem>>, vector<64x128xf32>
    %63 = tpu.concatenate %60, %61, %62 in 1 : vector<64x128xf32>, vector<64x128xf32>, vector<64x128xf32> -> vector<64x384xf32>
    %64 = arith.truncf %63 : vector<64x384xf32> to vector<64x384xbf16>
    %c2 = arith.constant 2 : index
    %c0_43 = arith.constant 0 : index
    %c0_44 = arith.constant 0 : index
    %65 = vector.load %arg4[%c2, %c0_43, %c0_44] : memref<6x384x256xbf16, #tpu.memory_space<vmem>>, vector<1x384x256xbf16>
    %66 = vector.shape_cast %65 : vector<1x384x256xbf16> to vector<384x256xbf16>
    %cst_45 = arith.constant dense<0.000000e+00> : vector<64x256xf32>
    %67 = tpu.matmul %64, %66, %cst_45 {dimension_numbers = #tpu.dot_dimension_numbers<[1], [0], [0], [1], [0, 0, 1, 1], [], []>} : vector<64x384xbf16>, vector<384x256xbf16>, vector<64x256xf32> -> vector<64x256xf32>
    %c2_46 = arith.constant 2 : index
    %c0_47 = arith.constant 0 : index
    %c0_48 = arith.constant 0 : index
    %68 = vector.load %arg5[%c2_46, %c0_47, %c0_48] : memref<6x1x256xf32, #tpu.memory_space<vmem>>, vector<1x1x256xf32>
    %69 = vector.shape_cast %68 : vector<1x1x256xf32> to vector<1x256xf32>
    %70 = vector.broadcast %69 : vector<1x256xf32> to vector<64x256xf32>
    %71 = arith.addf %67, %70 : vector<64x256xf32>
    %72 = vector.extract_strided_slice %71 {offsets = [0, 0], sizes = [64, 128], strides = [1, 1]} : vector<64x256xf32> to vector<64x128xf32>
    %73 = arith.negf %72 : vector<64x128xf32>
    %74 = math.exp %73 : vector<64x128xf32>
    %cst_49 = arith.constant 1.000000e+00 : f32
    %75 = vector.broadcast %cst_49 : f32 to vector<64x128xf32>
    %76 = arith.addf %75, %74 : vector<64x128xf32>
    %77 = arith.divf %75, %76 : vector<64x128xf32>
    %78 = vector.extract_strided_slice %71 {offsets = [0, 128], sizes = [64, 128], strides = [1, 1]} : vector<64x256xf32> to vector<64x128xf32>
    %79 = arith.mulf %77, %78 : vector<64x128xf32>
    %cst_50 = arith.constant 1.000000e+00 : f32
    %80 = vector.broadcast %cst_50 : f32 to vector<64x128xf32>
    %81 = arith.subf %80, %77 : vector<64x128xf32>
    %82 = arith.mulf %81, %62 : vector<64x128xf32>
    %83 = arith.addf %79, %82 : vector<64x128xf32>
    %c56_51 = arith.constant 56 : index
    %c0_52 = arith.constant 0 : index
    %84 = vector.load %arg11[%c56_51, %c0_52] : memref<120x128xf32, #tpu.memory_space<vmem>>, vector<64x128xf32>
    tpu.vector_store %arg11[%c56_51, %c0_52], %83 {strides = array<i32>} : memref<120x128xf32, #tpu.memory_space<vmem>>, vector<64x128xf32>,
    %c2_53 = arith.constant 2 : index
    %c0_54 = arith.constant 0 : index
    %85 = vector.load %arg11[%c2_53, %c0_54] : memref<120x128xf32, #tpu.memory_space<vmem>>, vector<64x128xf32>
    %c29 = arith.constant 29 : index
    %c0_55 = arith.constant 0 : index
    %86 = vector.load %arg11[%c29, %c0_55] : memref<120x128xf32, #tpu.memory_space<vmem>>, vector<64x128xf32>
    %c56_56 = arith.constant 56 : index
    %c0_57 = arith.constant 0 : index
    %87 = vector.load %arg11[%c56_56, %c0_57] : memref<120x128xf32, #tpu.memory_space<vmem>>, vector<64x128xf32>
    %88 = tpu.concatenate %85, %86, %87 in 1 : vector<64x128xf32>, vector<64x128xf32>, vector<64x128xf32> -> vector<64x384xf32>
    %89 = arith.truncf %88 : vector<64x384xf32> to vector<64x384xbf16>
    %c3 = arith.constant 3 : index
    %c0_58 = arith.constant 0 : index
    %c0_59 = arith.constant 0 : index
    %90 = vector.load %arg4[%c3, %c0_58, %c0_59] : memref<6x384x256xbf16, #tpu.memory_space<vmem>>, vector<1x384x256xbf16>
    %91 = vector.shape_cast %90 : vector<1x384x256xbf16> to vector<384x256xbf16>
    %cst_60 = arith.constant dense<0.000000e+00> : vector<64x256xf32>
    %92 = tpu.matmul %89, %91, %cst_60 {dimension_numbers = #tpu.dot_dimension_numbers<[1], [0], [0], [1], [0, 0, 1, 1], [], []>} : vector<64x384xbf16>, vector<384x256xbf16>, vector<64x256xf32> -> vector<64x256xf32>
    %c3_61 = arith.constant 3 : index
    %c0_62 = arith.constant 0 : index
    %c0_63 = arith.constant 0 : index
    %93 = vector.load %arg5[%c3_61, %c0_62, %c0_63] : memref<6x1x256xf32, #tpu.memory_space<vmem>>, vector<1x1x256xf32>
    %94 = vector.shape_cast %93 : vector<1x1x256xf32> to vector<1x256xf32>
    %95 = vector.broadcast %94 : vector<1x256xf32> to vector<64x256xf32>
    %96 = arith.addf %92, %95 : vector<64x256xf32>
    %97 = vector.extract_strided_slice %96 {offsets = [0, 0], sizes = [64, 128], strides = [1, 1]} : vector<64x256xf32> to vector<64x128xf32>
    %98 = arith.negf %97 : vector<64x128xf32>
    %99 = math.exp %98 : vector<64x128xf32>
    %cst_64 = arith.constant 1.000000e+00 : f32
    %100 = vector.broadcast %cst_64 : f32 to vector<64x128xf32>
    %101 = arith.addf %100, %99 : vector<64x128xf32>
    %102 = arith.divf %100, %101 : vector<64x128xf32>
    %103 = vector.extract_strided_slice %96 {offsets = [0, 128], sizes = [64, 128], strides = [1, 1]} : vector<64x256xf32> to vector<64x128xf32>
    %104 = arith.mulf %102, %103 : vector<64x128xf32>
    %cst_65 = arith.constant 1.000000e+00 : f32
    %105 = vector.broadcast %cst_65 : f32 to vector<64x128xf32>
    %106 = arith.subf %105, %102 : vector<64x128xf32>
    %107 = arith.mulf %106, %87 : vector<64x128xf32>
    %108 = arith.addf %104, %107 : vector<64x128xf32>
    %c56_66 = arith.constant 56 : index
    %c0_67 = arith.constant 0 : index
    %109 = vector.load %arg11[%c56_66, %c0_67] : memref<120x128xf32, #tpu.memory_space<vmem>>, vector<64x128xf32>
    tpu.vector_store %arg11[%c56_66, %c0_67], %108 {strides = array<i32>} : memref<120x128xf32, #tpu.memory_space<vmem>>, vector<64x128xf32>,
    %c54_68 = arith.constant 54 : index
    %c0_69 = arith.constant 0 : index
    %110 = vector.load %arg11[%c54_68, %c0_69] : memref<120x128xf32, #tpu.memory_space<vmem>>, vector<64x128xf32>
    %c55_70 = arith.constant 55 : index
    %c0_71 = arith.constant 0 : index
    %111 = vector.load %arg11[%c55_70, %c0_71] : memref<120x128xf32, #tpu.memory_space<vmem>>, vector<64x128xf32>
    %c56_72 = arith.constant 56 : index
    %c0_73 = arith.constant 0 : index
    %112 = vector.load %arg11[%c56_72, %c0_73] : memref<120x128xf32, #tpu.memory_space<vmem>>, vector<64x128xf32>
    %113 = tpu.concatenate %110, %111, %112 in 1 : vector<64x128xf32>, vector<64x128xf32>, vector<64x128xf32> -> vector<64x384xf32>
    %114 = arith.truncf %113 : vector<64x384xf32> to vector<64x384xbf16>
    %c4 = arith.constant 4 : index
    %c0_74 = arith.constant 0 : index
    %c0_75 = arith.constant 0 : index
    %115 = vector.load %arg4[%c4, %c0_74, %c0_75] : memref<6x384x256xbf16, #tpu.memory_space<vmem>>, vector<1x384x256xbf16>
    %116 = vector.shape_cast %115 : vector<1x384x256xbf16> to vector<384x256xbf16>
    %cst_76 = arith.constant dense<0.000000e+00> : vector<64x256xf32>
    %117 = tpu.matmul %114, %116, %cst_76 {dimension_numbers = #tpu.dot_dimension_numbers<[1], [0], [0], [1], [0, 0, 1, 1], [], []>} : vector<64x384xbf16>, vector<384x256xbf16>, vector<64x256xf32> -> vector<64x256xf32>
    %c4_77 = arith.constant 4 : index
    %c0_78 = arith.constant 0 : index
    %c0_79 = arith.constant 0 : index
    %118 = vector.load %arg5[%c4_77, %c0_78, %c0_79] : memref<6x1x256xf32, #tpu.memory_space<vmem>>, vector<1x1x256xf32>
    %119 = vector.shape_cast %118 : vector<1x1x256xf32> to vector<1x256xf32>
    %120 = vector.broadcast %119 : vector<1x256xf32> to vector<64x256xf32>
    %121 = arith.addf %117, %120 : vector<64x256xf32>
    %122 = vector.extract_strided_slice %121 {offsets = [0, 0], sizes = [64, 128], strides = [1, 1]} : vector<64x256xf32> to vector<64x128xf32>
    %123 = arith.negf %122 : vector<64x128xf32>
    %124 = math.exp %123 : vector<64x128xf32>
    %cst_80 = arith.constant 1.000000e+00 : f32
    %125 = vector.broadcast %cst_80 : f32 to vector<64x128xf32>
    %126 = arith.addf %125, %124 : vector<64x128xf32>
    %127 = arith.divf %125, %126 : vector<64x128xf32>
    %128 = vector.extract_strided_slice %121 {offsets = [0, 128], sizes = [64, 128], strides = [1, 1]} : vector<64x256xf32> to vector<64x128xf32>
    %129 = arith.mulf %127, %128 : vector<64x128xf32>
    %cst_81 = arith.constant 1.000000e+00 : f32
    %130 = vector.broadcast %cst_81 : f32 to vector<64x128xf32>
    %131 = arith.subf %130, %127 : vector<64x128xf32>
    %132 = arith.mulf %131, %112 : vector<64x128xf32>
    %133 = arith.addf %129, %132 : vector<64x128xf32>
    %c56_82 = arith.constant 56 : index
    %c0_83 = arith.constant 0 : index
    %134 = vector.load %arg11[%c56_82, %c0_83] : memref<120x128xf32, #tpu.memory_space<vmem>>, vector<64x128xf32>
    tpu.vector_store %arg11[%c56_82, %c0_83], %133 {strides = array<i32>} : memref<120x128xf32, #tpu.memory_space<vmem>>, vector<64x128xf32>,
    %c54_84 = arith.constant 54 : index
    %c0_85 = arith.constant 0 : index
    %135 = vector.load %arg11[%c54_84, %c0_85] : memref<120x128xf32, #tpu.memory_space<vmem>>, vector<64x128xf32>
    %c55_86 = arith.constant 55 : index
    %c0_87 = arith.constant 0 : index
    %136 = vector.load %arg11[%c55_86, %c0_87] : memref<120x128xf32, #tpu.memory_space<vmem>>, vector<64x128xf32>
    %c56_88 = arith.constant 56 : index
    %c0_89 = arith.constant 0 : index
    %137 = vector.load %arg11[%c56_88, %c0_89] : memref<120x128xf32, #tpu.memory_space<vmem>>, vector<64x128xf32>
    %138 = tpu.concatenate %135, %136, %137 in 1 : vector<64x128xf32>, vector<64x128xf32>, vector<64x128xf32> -> vector<64x384xf32>
    %139 = arith.truncf %138 : vector<64x384xf32> to vector<64x384xbf16>
    %c5 = arith.constant 5 : index
    %c0_90 = arith.constant 0 : index
    %c0_91 = arith.constant 0 : index
    %140 = vector.load %arg4[%c5, %c0_90, %c0_91] : memref<6x384x256xbf16, #tpu.memory_space<vmem>>, vector<1x384x256xbf16>
    %141 = vector.shape_cast %140 : vector<1x384x256xbf16> to vector<384x256xbf16>
    %cst_92 = arith.constant dense<0.000000e+00> : vector<64x256xf32>
    %142 = tpu.matmul %139, %141, %cst_92 {dimension_numbers = #tpu.dot_dimension_numbers<[1], [0], [0], [1], [0, 0, 1, 1], [], []>} : vector<64x384xbf16>, vector<384x256xbf16>, vector<64x256xf32> -> vector<64x256xf32>
    %c5_93 = arith.constant 5 : index
    %c0_94 = arith.constant 0 : index
    %c0_95 = arith.constant 0 : index
    %143 = vector.load %arg5[%c5_93, %c0_94, %c0_95] : memref<6x1x256xf32, #tpu.memory_space<vmem>>, vector<1x1x256xf32>
    %144 = vector.shape_cast %143 : vector<1x1x256xf32> to vector<1x256xf32>
    %145 = vector.broadcast %144 : vector<1x256xf32> to vector<64x256xf32>
    %146 = arith.addf %142, %145 : vector<64x256xf32>
    %147 = vector.extract_strided_slice %146 {offsets = [0, 0], sizes = [64, 128], strides = [1, 1]} : vector<64x256xf32> to vector<64x128xf32>
    %148 = arith.negf %147 : vector<64x128xf32>
    %149 = math.exp %148 : vector<64x128xf32>
    %cst_96 = arith.constant 1.000000e+00 : f32
    %150 = vector.broadcast %cst_96 : f32 to vector<64x128xf32>
    %151 = arith.addf %150, %149 : vector<64x128xf32>
    %152 = arith.divf %150, %151 : vector<64x128xf32>
    %153 = vector.extract_strided_slice %146 {offsets = [0, 128], sizes = [64, 128], strides = [1, 1]} : vector<64x256xf32> to vector<64x128xf32>
    %154 = arith.mulf %152, %153 : vector<64x128xf32>
    %cst_97 = arith.constant 1.000000e+00 : f32
    %155 = vector.broadcast %cst_97 : f32 to vector<64x128xf32>
    %156 = arith.subf %155, %152 : vector<64x128xf32>
    %157 = arith.mulf %156, %137 : vector<64x128xf32>
    %158 = arith.addf %154, %157 : vector<64x128xf32>
    %c56_98 = arith.constant 56 : index
    %c0_99 = arith.constant 0 : index
    %159 = vector.load %arg11[%c56_98, %c0_99] : memref<120x128xf32, #tpu.memory_space<vmem>>, vector<64x128xf32>
    tpu.vector_store %arg11[%c56_98, %c0_99], %158 {strides = array<i32>} : memref<120x128xf32, #tpu.memory_space<vmem>>, vector<64x128xf32>,
    %c56_100 = arith.constant 56 : index
    %c0_101 = arith.constant 0 : index
    %160 = vector.load %arg11[%c56_100, %c0_101] : memref<120x128xf32, #tpu.memory_space<vmem>>, vector<64x128xf32>
    %161 = arith.truncf %160 : vector<64x128xf32> to vector<64x128xbf16>
    %c0_102 = arith.constant 0 : index
    %c0_103 = arith.constant 0 : index
    %c0_104 = arith.constant 0 : index
    %162 = vector.load %arg6[%c0_102, %c0_103, %c0_104] : memref<3x128x128xbf16, #tpu.memory_space<vmem>>, vector<1x128x128xbf16>
    %163 = vector.shape_cast %162 : vector<1x128x128xbf16> to vector<128x128xbf16>
    %cst_105 = arith.constant dense<0.000000e+00> : vector<64x128xf32>
    %164 = tpu.matmul %161, %163, %cst_105 {dimension_numbers = #tpu.dot_dimension_numbers<[1], [0], [0], [1], [0, 0, 1, 1], [], []>} : vector<64x128xbf16>, vector<128x128xbf16>, vector<64x128xf32> -> vector<64x128xf32>
    %c0_106 = arith.constant 0 : index
    %c0_107 = arith.constant 0 : index
    %c0_108 = arith.constant 0 : index
    %165 = vector.load %arg7[%c0_106, %c0_107, %c0_108] : memref<3x1x128xf32, #tpu.memory_space<vmem>>, vector<1x1x128xf32>
    %166 = vector.shape_cast %165 : vector<1x1x128xf32> to vector<1x128xf32>
    %167 = vector.broadcast %166 : vector<1x128xf32> to vector<64x128xf32>
    %168 = arith.addf %164, %167 : vector<64x128xf32>
    %cst_109 = arith.constant 0.000000e+00 : f32
    %169 = vector.broadcast %cst_109 : f32 to vector<64x128xf32>
    %170 = arith.maximumf %168, %169 : vector<64x128xf32>
    %171 = arith.truncf %170 : vector<64x128xf32> to vector<64x128xbf16>
    %c1_110 = arith.constant 1 : index
    %c0_111 = arith.constant 0 : index
    %c0_112 = arith.constant 0 : index
    %172 = vector.load %arg6[%c1_110, %c0_111, %c0_112] : memref<3x128x128xbf16, #tpu.memory_space<vmem>>, vector<1x128x128xbf16>
    %173 = vector.shape_cast %172 : vector<1x128x128xbf16> to vector<128x128xbf16>
    %cst_113 = arith.constant dense<0.000000e+00> : vector<64x128xf32>
    %174 = tpu.matmul %171, %173, %cst_113 {dimension_numbers = #tpu.dot_dimension_numbers<[1], [0], [0], [1], [0, 0, 1, 1], [], []>} : vector<64x128xbf16>, vector<128x128xbf16>, vector<64x128xf32> -> vector<64x128xf32>
    %c1_114 = arith.constant 1 : index
    %c0_115 = arith.constant 0 : index
    %c0_116 = arith.constant 0 : index
    %175 = vector.load %arg7[%c1_114, %c0_115, %c0_116] : memref<3x1x128xf32, #tpu.memory_space<vmem>>, vector<1x1x128xf32>
    %176 = vector.shape_cast %175 : vector<1x1x128xf32> to vector<1x128xf32>
    %177 = vector.broadcast %176 : vector<1x128xf32> to vector<64x128xf32>
    %178 = arith.addf %174, %177 : vector<64x128xf32>
    %cst_117 = arith.constant 0.000000e+00 : f32
    %179 = vector.broadcast %cst_117 : f32 to vector<64x128xf32>
    %180 = arith.maximumf %178, %179 : vector<64x128xf32>
    %181 = arith.truncf %180 : vector<64x128xf32> to vector<64x128xbf16>
    %c2_118 = arith.constant 2 : index
    %c0_119 = arith.constant 0 : index
    %c0_120 = arith.constant 0 : index
    %182 = vector.load %arg6[%c2_118, %c0_119, %c0_120] : memref<3x128x128xbf16, #tpu.memory_space<vmem>>, vector<1x128x128xbf16>
    %183 = vector.shape_cast %182 : vector<1x128x128xbf16> to vector<128x128xbf16>
    %cst_121 = arith.constant dense<0.000000e+00> : vector<64x128xf32>
    %184 = tpu.matmul %181, %183, %cst_121 {dimension_numbers = #tpu.dot_dimension_numbers<[1], [0], [0], [1], [0, 0, 1, 1], [], []>} : vector<64x128xbf16>, vector<128x128xbf16>, vector<64x128xf32> -> vector<64x128xf32>
    %c2_122 = arith.constant 2 : index
    %c0_123 = arith.constant 0 : index
    %c0_124 = arith.constant 0 : index
    %185 = vector.load %arg7[%c2_122, %c0_123, %c0_124] : memref<3x1x128xf32, #tpu.memory_space<vmem>>, vector<1x1x128xf32>
    %186 = vector.shape_cast %185 : vector<1x1x128xf32> to vector<1x128xf32>
    %187 = vector.broadcast %186 : vector<1x128xf32> to vector<64x128xf32>
    %188 = arith.addf %184, %187 : vector<64x128xf32>
    %cst_125 = arith.constant 0.000000e+00 : f32
    %189 = vector.broadcast %cst_125 : f32 to vector<64x128xf32>
    %190 = arith.maximumf %188, %189 : vector<64x128xf32>
    %191 = arith.truncf %190 : vector<64x128xf32> to vector<64x128xbf16>
    %c0_126 = arith.constant 0 : index
    %c0_127 = arith.constant 0 : index
    %192 = vector.load %arg8[%c0_126, %c0_127] : memref<128x128xbf16, #tpu.memory_space<vmem>>, vector<128x128xbf16>
    %cst_128 = arith.constant dense<0.000000e+00> : vector<64x128xf32>
    %193 = tpu.matmul %191, %192, %cst_128 {dimension_numbers = #tpu.dot_dimension_numbers<[1], [0], [0], [1], [0, 0, 1, 1], [], []>} : vector<64x128xbf16>, vector<128x128xbf16>, vector<64x128xf32> -> vector<64x128xf32>
    %c0_129 = arith.constant 0 : index
    %c0_130 = arith.constant 0 : index
    %194 = vector.load %arg9[%c0_129, %c0_130] : memref<1x128xf32, #tpu.memory_space<vmem>>, vector<1x128xf32>
    %195 = vector.broadcast %194 : vector<1x128xf32> to vector<64x128xf32>
    %196 = arith.addf %193, %195 : vector<64x128xf32>
    %197 = arith.negf %196 : vector<64x128xf32>
    %198 = math.exp %197 : vector<64x128xf32>
    %cst_131 = arith.constant 1.000000e+00 : f32
    %199 = vector.broadcast %cst_131 : f32 to vector<64x128xf32>
    %200 = arith.addf %199, %198 : vector<64x128xf32>
    %201 = arith.divf %199, %200 : vector<64x128xf32>
    %c0_132 = arith.constant 0 : index
    %c0_133 = arith.constant 0 : index
    %c0_134 = arith.constant 0 : index
    %202 = vector.load %arg10[%c0_132, %c0_133, %c0_134] : memref<1x64x128xf32, #tpu.memory_space<vmem>>, vector<1x64x128xf32>
    %203 = vector.shape_cast %202 : vector<1x64x128xf32> to vector<64x128xf32>
    %204 = vector.shape_cast %201 : vector<64x128xf32> to vector<1x64x128xf32>
    tpu.vector_store %arg10[%c0_132, %c0_133, %c0_134], %204 {strides = array<i32>} : memref<1x64x128xf32, #tpu.memory_space<vmem>>, vector<1x64x128xf32>,
    return
  }
  func.func @transform_0(%arg0: i32) -> (i32, i32, i32) {
    %c0_i32 = arith.constant 0 : i32
    %c0_i32_0 = arith.constant 0 : i32
    %c0_i32_1 = arith.constant 0 : i32
    return %arg0, %c0_i32, %c0_i32_0 : i32, i32, i32
  }
  func.func @transform_1(%arg0: i32) -> (i32, i32) {
    %c0_i32 = arith.constant 0 : i32
    %c0_i32_0 = arith.constant 0 : i32
    %c0_i32_1 = arith.constant 0 : i32
    return %c0_i32, %c0_i32_0 : i32, i32
  }
  func.func @transform_2(%arg0: i32) -> (i32, i32) {
    %c0_i32 = arith.constant 0 : i32
    %c0_i32_0 = arith.constant 0 : i32
    %c0_i32_1 = arith.constant 0 : i32
    return %c0_i32, %c0_i32_0 : i32, i32
  }
  func.func @transform_3(%arg0: i32) -> (i32, i32, i32) {
    %c0_i32 = arith.constant 0 : i32
    %c0_i32_0 = arith.constant 0 : i32
    %c0_i32_1 = arith.constant 0 : i32
    %c0_i32_2 = arith.constant 0 : i32
    return %c0_i32, %c0_i32_0, %c0_i32_1 : i32, i32, i32
  }
  func.func @transform_4(%arg0: i32) -> (i32, i32, i32) {
    %c0_i32 = arith.constant 0 : i32
    %c0_i32_0 = arith.constant 0 : i32
    %c0_i32_1 = arith.constant 0 : i32
    %c0_i32_2 = arith.constant 0 : i32
    return %c0_i32, %c0_i32_0, %c0_i32_1 : i32, i32, i32
  }
  func.func @transform_5(%arg0: i32) -> (i32, i32, i32) {
    %c0_i32 = arith.constant 0 : i32
    %c0_i32_0 = arith.constant 0 : i32
    %c0_i32_1 = arith.constant 0 : i32
    %c0_i32_2 = arith.constant 0 : i32
    return %c0_i32, %c0_i32_0, %c0_i32_1 : i32, i32, i32
  }
  func.func @transform_6(%arg0: i32) -> (i32, i32, i32) {
    %c0_i32 = arith.constant 0 : i32
    %c0_i32_0 = arith.constant 0 : i32
    %c0_i32_1 = arith.constant 0 : i32
    %c0_i32_2 = arith.constant 0 : i32
    return %c0_i32, %c0_i32_0, %c0_i32_1 : i32, i32, i32
  }
  func.func @transform_7(%arg0: i32) -> (i32, i32) {
    %c0_i32 = arith.constant 0 : i32
    %c0_i32_0 = arith.constant 0 : i32
    %c0_i32_1 = arith.constant 0 : i32
    return %c0_i32, %c0_i32_0 : i32, i32
  }
  func.func @transform_8(%arg0: i32) -> (i32, i32) {
    %c0_i32 = arith.constant 0 : i32
    %c0_i32_0 = arith.constant 0 : i32
    %c0_i32_1 = arith.constant 0 : i32
    return %c0_i32, %c0_i32_0 : i32, i32
  }
  func.func @transform_9(%arg0: i32) -> (i32, i32, i32) {
    %c0_i32 = arith.constant 0 : i32
    %c0_i32_0 = arith.constant 0 : i32
    %c0_i32_1 = arith.constant 0 : i32
    return %arg0, %c0_i32, %c0_i32_0 : i32, i32, i32
  }
}

</mosaic_0001>

<bundles_post_ra>
// kernel: tpu_custom_call.1
= control target key start
LH: loop header
LB: loop body
LE: loop exit
PB: predicated region body
PF: predicated region fallthrough
CT: control target
= control target key end

     0   :  { %s7742_s0 = inlined_call_operand.hbm [shape: bf16[2,64,128], index: 0, kind: input, shape index: {}]   ;;  %s7743_s1 = inlined_call_operand.hbm [shape: bf16[128,128], index: 1, kind: input, shape index: {}]   ;;  %s7744_s2 = inlined_call_operand.hbm [shape: f32[1,128], index: 2, kind: input, shape index: {}]   ;;  %s7745_s3 = inlined_call_operand.hbm [shape: bf16[6,384,256], index: 3, kind: input, shape index: {}]   ;;  %s7746_s4 = inlined_call_operand.hbm [shape: f32[6,1,256], index: 4, kind: input, shape index: {}]   ;;  %s7747_s5 = inlined_call_operand.hbm [shape: bf16[3,128,128], index: 5, kind: input, shape index: {}]   ;;  %s7748_s6 = inlined_call_operand.hbm [shape: f32[3,1,128], index: 6, kind: input, shape index: {}]   ;;  %s7749_s7 = inlined_call_operand.hbm [shape: bf16[128,128], index: 7, kind: input, shape index: {}]   ;;  %s7750_s8 = inlined_call_operand.hbm [shape: f32[1,128], index: 8, kind: input, shape index: {}]   ;;  %s7751_s9 = inlined_call_operand.hbm [shape: f32[2,64,128], index: 9, kind: output, shape index: {}]  }
   0x1   :  { %7759 = sst [smem:[#allocation25_spill]] %s7743_s1 }
   0x2   :  { %7760 = sst [smem:[#allocation26_spill]] %s7751_s9 }
   0x3   :  { %14 = vsyncpa [#allocation4], 0 }
   0x4   :  { %16 = vsyncpa [#allocation4 + $0x1], 0 }
   0x5   :  { %17 = vsyncpa [#allocation7], 0 }
   0x6   :  { %18 = vsyncpa [#allocation10], 0 }
   0x7   :  { %19 = vsyncpa [#allocation13], 0 }
   0x8   :  { %20 = vsyncpa [#allocation16], 0 }
   0x9   :  { %21 = vsyncpa [#allocation5], 0 }
   0xa   :  { %23 = vsyncpa [#allocation5 + $0x1], 0  ;;  %s6954_s30 = smov 0   ;;  %s6956_s10 = smov 0  }
   0xb   :  { %s6958_s11 = smov 0   ;;  %s6960_s12 = smov 0  }
   0xc LB: > { %s6882_s13 = smov [#allocation6]   ;;  %s6975_s15 = sadd.s32 4294967295, %s6880_s12   ;;  %s6880_s12 = sphi %s6960_s12, %s7789_s12   ;;  %s6876_s11 = sphi %s6958_s11, %s7788_s11   ;;  %s6872_s10 = sphi %s6956_s10, %s7787_s10   ;;  %s6868_s30 = sphi %s6954_s30, %s7786_s30  }
   0xd   : > { %s266_s14 = sshll.u32 %s6882_s13, 4  ;;  %p4893_p0 = scmp.ge.s32.totalorder %s6880_s12, 1  ;;  %s6980_s14 = int_to_ptr.vmem [resolvable:$true] %s266_s14 }
   0xe   : > { %p7755_p1 = scmp.eq.s32.totalorder %s6975_s15, 0  ;;  %p254_p2 = scmp.lt.s32.totalorder %s6880_s12, 3 }
   0xf   : > { %s6883_s17 = smov [#allocation9]   ;;  %s6884_s20 = smov [#allocation12]  }
  0x10   : > { %p6982_p3 = pnand %p4893_p0, %p254_p2  ;;  %s290_s18 = sshll.u32 %s6883_s17, 4  ;;  %s6995_s18 = int_to_ptr.vmem [resolvable:$true] %s290_s18 }
  0x11   : > { %s6997_s21 = sshll.u32 %s6884_s20, 4  ;;  %s7763_s1 = sld [smem:[#allocation25_spill]]  ;;  %s317_s21 = int_to_ptr.vmem [resolvable:$true] %s6997_s21 }
  0x12   : > { %s7761_s16 = scalar_select %p6982_p3, 1, 0 }
  0x13   : > { %p5741_p5 = pneg %p6982_p3 }
  0x15   : > { %p6991_p6 = pnand %p5741_p5, %p7755_p1 }
  0x17   : > { %s6544_s24 = scalar_lea.hbm %s7763_s1, 1024  ;;  %p7007_p8 = pneg %p6991_p6 }
  0x18   : > { %p6545_p7 = scmp.ne.s32.totalorder %s7763_s1, %s6544_s24  ;;  %p6551_p11 = scmp.lt.u32.totalorder %s6544_s24, %s7763_s1 }
  0x1a   : > { %p6547_p9 = pnand %p7007_p8, %p6545_p7 }
  0x1c   : > { %p6548_p10 = pneg %p6547_p9 }
  0x1e   : > { %p6553_p12 = pnand %p6551_p11, %p6548_p10 }
  0x20   : > { %6556 = shalt.err (!%p6553_p12)
}
  0x21   : > { %s6557_s13 = scalar_lea.vmem %s6980_s14, 1024  ;;  %p6565_p5 = scmp.lt.s32.totalorder %s6980_s14, %s6980_s14 }
  0x22   : > { %p6558_p13 = scmp.ne.s32.totalorder %s6980_s14, %s6557_s13  ;;  %p6566_p4 = scmp.lt.s32.totalorder %s6557_s13, %s6557_s13 }
  0x24   : > { %p6560_p0 = pnand %p6558_p13, %p7007_p8  ;;  %p6567_p7 = por %p6566_p4, %p6565_p5 }
  0x26   : > { %p6561_p2 = pneg %p6560_p0 }
  0x28   : > { %p6568_p9 = pnand %p6567_p7, %p6561_p2 }
  0x2a   : > { %6571 = shalt.err (!%p6568_p9)
}
  0x2b   : > { %s7753_s17 = smov 64   ;;  %s7757_s20 = smov 4  }
  0x2c   : > { %5744 = dma.hbm_to_vmem [thread:$0]  (!%p6991_p6), %s7763_s1, 1024, %s6980_s14, [#allocation7], %s7753_s17, %s7753_s17, %s7757_s20  }
  0x2d   : > { %s6572_s26 = scalar_lea.hbm %s7745_s3, 36864 }
  0x2e   : > { %p6573_p4 = scmp.ne.s32.totalorder %s7745_s3, %s6572_s26  ;;  %p6579_p12 = scmp.lt.u32.totalorder %s6572_s26, %s7745_s3 }
  0x30   : > { %p6575_p10 = pnand %p6573_p4, %p7007_p8 }
  0x32   : > { %p6576_p11 = pneg %p6575_p10 }
  0x34   : > { %p6581_p13 = pnand %p6579_p12, %p6576_p11 }
  0x36   : > { %6584 = shalt.err (!%p6581_p13)
}
  0x37   : > { %s6585_s14 = scalar_lea.vmem %s6995_s18, 36864  ;;  %p6593_p7 = scmp.lt.s32.totalorder %s6995_s18, %s6995_s18 }
  0x38   : > { %p6586_p0 = scmp.ne.s32.totalorder %s6995_s18, %s6585_s14  ;;  %p6594_p9 = scmp.lt.s32.totalorder %s6585_s14, %s6585_s14 }
  0x3a   : > { %p6588_p2 = pnand %p6586_p0, %p7007_p8  ;;  %p6595_p4 = por %p6594_p9, %p6593_p7 }
  0x3c   : > { %p6589_p5 = pneg %p6588_p2 }
  0x3e   : > { %p6596_p10 = pnand %p6595_p4, %p6589_p5 }
  0x40   : > { %6599 = shalt.err (!%p6596_p10)
}
  0x41   : > { %s6887_s22 = smov 128   ;;  %s6888_s9 = smov 8  }
  0x42   : > { %5750 = dma.hbm_to_vmem [thread:$0]  (!%p6991_p6), %s7745_s3, 36864, %s6995_s18, [#allocation10], %s6887_s22, %s6887_s22, %s6888_s9  }
  0x43   : > { %s6600_s28 = scalar_lea.hbm %s7747_s5, 3072 }
  0x44   : > { %p6601_p11 = scmp.ne.s32.totalorder %s7747_s5, %s6600_s28  ;;  %p6607_p0 = scmp.lt.u32.totalorder %s6600_s28, %s7747_s5 }
  0x46   : > { %p6603_p12 = pnand %p6601_p11, %p7007_p8 }
  0x48   : > { %p6604_p13 = pneg %p6603_p12 }
  0x4a   : > { %p6609_p2 = pnand %p6607_p0, %p6604_p13 }
  0x4c   : > { %6612 = shalt.err (!%p6609_p2)
}
  0x4d   : > { %s6613_s23 = scalar_lea.vmem %s317_s21, 3072  ;;  %p6621_p4 = scmp.lt.s32.totalorder %s317_s21, %s317_s21 }
  0x4e   : > { %p6614_p5 = scmp.ne.s32.totalorder %s317_s21, %s6613_s23  ;;  %p6622_p10 = scmp.lt.s32.totalorder %s6613_s23, %s6613_s23 }
  0x50   : > { %p6616_p7 = pnand %p6614_p5, %p7007_p8  ;;  %p6623_p1 = por %p6622_p10, %p6621_p4 }
  0x52   : > { %p6617_p9 = pneg %p6616_p7 }
  0x54   : > { %p6624_p3 = pnand %p6623_p1, %p6617_p9 }
  0x56   : > { %6627 = shalt.err (!%p6624_p3)
}
  0x57   : > { %s7765_s18 = smov 64   ;;  %s6889_s9 = smov [#allocation15]  }
  0x58   : > { %5756 = dma.hbm_to_vmem [thread:$0]  (!%p6991_p6), %s7747_s5, 3072, %s317_s21, [#allocation13], %s7765_s18, %s7765_s18, %s7757_s20  }
  0x59   : > { %s342_s24 = sshll.u32 %s6889_s9, 4  ;;  %s6890_s25 = smov [#allocation8]   ;;  %s343_s24 = int_to_ptr.vmem [resolvable:$true] %s342_s24 }
  0x5a   : > { %s280_s26 = sshll.u32 %s6890_s25, 4  ;;  %s6628_s13 = scalar_lea.hbm %s7749_s7, 1024  ;;  %s281_s26 = int_to_ptr.vmem [resolvable:$true] %s280_s26 }
  0x5b   : > { %p6629_p1 = scmp.ne.s32.totalorder %s7749_s7, %s6628_s13  ;;  %p6635_p12 = scmp.lt.u32.totalorder %s6628_s13, %s7749_s7 }
  0x5d   : > { %p6631_p3 = pnand %p6629_p1, %p7007_p8 }
  0x5f   : > { %p6632_p11 = pneg %p6631_p3 }
  0x61   : > { %p6637_p13 = pnand %p6635_p12, %p6632_p11 }
  0x63   : > { %6640 = shalt.err (!%p6637_p13)
}
  0x64   : > { %s6641_s21 = scalar_lea.vmem %s343_s24, 1024  ;;  %p6649_p7 = scmp.lt.s32.totalorder %s343_s24, %s343_s24 }
  0x65   : > { %p6642_p0 = scmp.ne.s32.totalorder %s343_s24, %s6641_s21  ;;  %p6650_p9 = scmp.lt.s32.totalorder %s6641_s21, %s6641_s21 }
  0x67   : > { %p6644_p2 = pnand %p6642_p0, %p7007_p8  ;;  %p6651_p4 = por %p6650_p9, %p6649_p7 }
  0x69   : > { %p6645_p5 = pneg %p6644_p2 }
  0x6b   : > { %p6652_p10 = pnand %p6651_p4, %p6645_p5 }
  0x6d   : > { %6655 = shalt.err (!%p6652_p10)
}
  0x6e   : > { %5762 = dma.hbm_to_vmem [thread:$0]  (!%p6991_p6), %s7749_s7, 1024, %s343_s24, [#allocation16], %s7765_s18, %s7765_s18, %s7757_s20  }
  0x6f   : > { %s6656_s28 = scalar_lea.hbm %s7744_s2, 16 }
  0x70   : > { %p6657_p1 = scmp.ne.s32.totalorder %s7744_s2, %s6656_s28  ;;  %p6663_p12 = scmp.lt.u32.totalorder %s6656_s28, %s7744_s2 }
  0x72   : > { %p6659_p3 = pnand %p6657_p1, %p7007_p8 }
  0x74   : > { %p6660_p11 = pneg %p6659_p3 }
  0x76   : > { %p6665_p13 = pnand %p6663_p12, %p6660_p11 }
  0x78   : > { %6668 = shalt.err (!%p6665_p13)
}
  0x79   : > { %s6669_s17 = scalar_lea.vmem %s281_s26, 16  ;;  %s6676_s24 = scalar_lea.vmem %s281_s26, 32 }
  0x7a   : > { %p6670_p0 = scmp.ne.s32.totalorder %s281_s26, %s6669_s17  ;;  %p6677_p7 = scmp.lt.s32.totalorder %s281_s26, %s281_s26 }
  0x7b   : > { %p6678_p9 = scmp.lt.s32.totalorder %s6676_s24, %s6669_s17 }
  0x7c   : > { %p6672_p2 = pnand %p6670_p0, %p7007_p8 }
  0x7d   : > { %p6679_p4 = por %p6678_p9, %p6677_p7 }
  0x7e   : > { %p6673_p5 = pneg %p6672_p2 }
  0x80   : > { %p6680_p10 = pnand %p6679_p4, %p6673_p5 }
  0x82   : > { %6683 = shalt.err (!%p6680_p10)
}
  0x83   : > { %5747 = dma.hbm_to_vmem [thread:$0]  (!%p6991_p6), %s7744_s2, 16, %s281_s26, [#allocation7]  }
  0x84   : > { %s6891_s22 = smov [#allocation11]   ;;  %s6684_s29 = scalar_lea.hbm %s7746_s4, 192 }
  0x85   : > { %s303_s9 = sshll.u32 %s6891_s22, 4  ;;  %p6685_p1 = scmp.ne.s32.totalorder %s7746_s4, %s6684_s29  ;;  %s304_s9 = int_to_ptr.vmem [resolvable:$true] %s303_s9 }
  0x86   : > { %p6691_p12 = scmp.lt.u32.totalorder %s6684_s29, %s7746_s4 }
  0x87   : > { %p6687_p3 = pnand %p6685_p1, %p7007_p8 }
  0x89   : > { %p6688_p11 = pneg %p6687_p3 }
  0x8b   : > { %p6693_p13 = pnand %p6691_p12, %p6688_p11 }
  0x8d   : > { %6696 = shalt.err (!%p6693_p13)
}
  0x8e   : > { %s6697_s26 = scalar_lea.vmem %s304_s9, 192  ;;  %p6705_p7 = scmp.lt.s32.totalorder %s304_s9, %s304_s9 }
  0x8f   : > { %p6698_p0 = scmp.ne.s32.totalorder %s304_s9, %s6697_s26  ;;  %p6706_p9 = scmp.lt.s32.totalorder %s6697_s26, %s6697_s26 }
  0x91   : > { %p6700_p2 = pnand %p6698_p0, %p7007_p8  ;;  %p6707_p4 = por %p6706_p9, %p6705_p7 }
  0x93   : > { %p6701_p5 = pneg %p6700_p2 }
  0x95   : > { %p6708_p10 = pnand %p6707_p4, %p6701_p5 }
  0x97   : > { %6711 = shalt.err (!%p6708_p10)
}
  0x98   : > { %s6892_s24 = smov 32   ;;  %s6893_s21 = smov 2  }
  0x99   : > { %5753 = dma.hbm_to_vmem [thread:$0]  (!%p6991_p6), %s7746_s4, 192, %s304_s9, [#allocation10], %s6892_s24, %s6892_s24, %s6893_s21  }
  0x9a   : > { %s6894_s25 = smov [#allocation14]   ;;  %s6712_s14 = scalar_lea.hbm %s7748_s6, 48 }
  0x9b   : > { %s329_s28 = sshll.u32 %s6894_s25, 4  ;;  %p6713_p1 = scmp.ne.s32.totalorder %s7748_s6, %s6712_s14  ;;  %s330_s28 = int_to_ptr.vmem [resolvable:$true] %s329_s28 }
  0x9c   : > { %p6719_p12 = scmp.lt.u32.totalorder %s6712_s14, %s7748_s6 }
  0x9d   : > { %p6715_p3 = pnand %p6713_p1, %p7007_p8 }
  0x9f   : > { %p6716_p11 = pneg %p6715_p3 }
  0xa1   : > { %p6721_p13 = pnand %p6719_p12, %p6716_p11 }
  0xa3   : > { %6724 = shalt.err (!%p6721_p13)
}
  0xa4   : > { %s6725_s9 = scalar_lea.vmem %s330_s28, 48  ;;  %s6732_s24 = scalar_lea.vmem %s330_s28, 64 }
  0xa5   : > { %p6726_p0 = scmp.ne.s32.totalorder %s330_s28, %s6725_s9  ;;  %p6733_p7 = scmp.lt.s32.totalorder %s330_s28, %s330_s28 }
  0xa6   : > { %p6734_p9 = scmp.lt.s32.totalorder %s6732_s24, %s6725_s9 }
  0xa7   : > { %p6728_p2 = pnand %p6726_p0, %p7007_p8 }
  0xa8   : > { %p6735_p4 = por %p6734_p9, %p6733_p7 }
  0xa9   : > { %p6729_p5 = pneg %p6728_p2 }
  0xab   : > { %p6736_p10 = pnand %p6735_p4, %p6729_p5 }
  0xad   : > { %6739 = shalt.err (!%p6736_p10)
}
  0xae   : > { %s6895_s21 = smov 16   ;;  %s6896_s1 = smov 1  }
  0xaf   : > { %5759 = dma.hbm_to_vmem [thread:$0]  (!%p6991_p6), %s7748_s6, 48, %s330_s28, [#allocation13], %s6895_s21, %s6895_s21, %s6896_s1  }
  0xb0   : > { %s6897_s25 = smov [#allocation17]   ;;  %s6740_s23 = scalar_lea.hbm %s7750_s8, 16 }
  0xb1   : > { %s356_s29 = sshll.u32 %s6897_s25, 4  ;;  %p6741_p1 = scmp.ne.s32.totalorder %s7750_s8, %s6740_s23  ;;  %s357_s29 = int_to_ptr.vmem [resolvable:$true] %s356_s29 }
  0xb2   : > { %p6747_p12 = scmp.lt.u32.totalorder %s6740_s23, %s7750_s8 }
  0xb3   : > { %p6743_p3 = pnand %p6741_p1, %p7007_p8 }
  0xb5   : > { %p6744_p11 = pneg %p6743_p3 }
  0xb7   : > { %p6749_p13 = pnand %p6747_p12, %p6744_p11 }
  0xb9   : > { %6752 = shalt.err (!%p6749_p13)
}
  0xba   : > { %s6753_s28 = scalar_lea.vmem %s357_s29, 16  ;;  %s6760_s21 = scalar_lea.vmem %s357_s29, 32 }
  0xbb   : > { %p6754_p0 = scmp.ne.s32.totalorder %s357_s29, %s6753_s28  ;;  %p6761_p7 = scmp.lt.s32.totalorder %s357_s29, %s357_s29 }
  0xbc   : > { %p6762_p9 = scmp.lt.s32.totalorder %s6760_s21, %s6753_s28 }
  0xbd   : > { %p6756_p2 = pnand %p6754_p0, %p7007_p8 }
  0xbe   : > { %p6763_p4 = por %p6762_p9, %p6761_p7 }
  0xbf   : > { %p6757_p5 = pneg %p6756_p2 }
  0xc1   : > { %p6764_p10 = pnand %p6763_p4, %p6757_p5 }
  0xc3   : > { %6767 = shalt.err (!%p6764_p10)
}
  0xc4   : > { %5765 = dma.hbm_to_vmem [thread:$0]  (!%p6991_p6), %s7750_s8, 16, %s357_s29, [#allocation16]  }
  0xc5   : > { %s4892_s27 = sadd.s32 4294967294, %s6880_s12   ;;  %s7171_s19 = sadd.s32 1, %s6880_s12  }
  0xc6   : > { %s33_s22 = ssub.s32 %s6880_s12, %s7171_s19  ;;  %s36_s25 = sadd.s32 1, %s6876_s11 }
  0xc7   : > { %p34_p8 = scmp.eq.s32.totalorder %s33_s22, 0  ;;  %p43_p1 = scmp.ne.s32.totalorder %s6876_s11, %s6872_s10 }
  0xc8   : > { %p44_p3 = scmp.eq.s32.totalorder %s6880_s12, 0  ;;  %p49_p11 = scmp.ne.s32.totalorder %s6872_s10, %s6868_s30 }
  0xc9   : > { %s7182_s13 = scalar_select %p34_p8, %s6876_s11, %s36_s25  }
  0xca   : > { %p7184_p12 = por %p44_p3, %p43_p1  ;;  %p7767_p13 = scmp.eq.s32.totalorder %s6975_s15, 0 }
  0xcb   : > { %p241_p0 = scmp.eq.s32.totalorder %s6975_s15, 1  ;;  %p247_p2 = scmp.eq.s32.totalorder %s4892_s27, 1 }
  0xcc   : > { %p7190_p6 = por %p7767_p13, %p49_p11  ;;  %p5782_p5 = scmp.lt.s32.totalorder %s6880_s12, 2 }
  0xcd   : > { %s367_s23 = sand.u32 1, %s6876_s11   ;;  %p7197_p7 = por %p241_p0, %p43_p1 }
  0xce   : > { %p7201_p9 = por %p247_p2, %p49_p11  ;;  %s4903_s9 = sshll.u32 %s367_s23, 5 }
  0xcf   : > { %s7769_s17 = scalar_select %p7197_p7, 1, 0 }
  0xd0   : > { %s7770_s26 = scalar_select %p7201_p9, 1, 0 }
  0xd1   : > { %s5315_s24 = sshll.u32 %s6880_s12, 9  ;;  %s371_s20 = scalar_lea.vmem [#allocation3], %s4903_s9 }
  0xd2   : > { %s7209_s1 = scalar_lea.hbm %s7742_s0, %s5315_s24  ;;  %s378_s27 = sshll.u32 %s371_s20, 4  ;;  %s7211_s27 = int_to_ptr.vmem [resolvable:$true] %s378_s27 }
  0xd3   : > { %p7215_p4 = pnand %p5782_p5, %p7184_p12  ;;  %s7219_s25 = scalar_lea.sflag [#allocation4], %s367_s23 }
  0xd4   : > { %s6768_s28 = scalar_lea.hbm %s7209_s1, 512  ;;  %s6773_s14 = scalar_lea.hbm %s7742_s0, 1024 }
  0xd5   : > { %p6769_p10 = scmp.ne.s32.totalorder %s7209_s1, %s6768_s28  ;;  %p6770_p8 = pneg %p7215_p4 }
  0xd6   : > { %p6774_p11 = scmp.lt.u32.totalorder %s7209_s1, %s7742_s0  ;;  %p6775_p12 = scmp.lt.u32.totalorder %s6773_s14, %s6768_s28 }
  0xd7   : > { %p6771_p1 = pnand %p6770_p8, %p6769_p10  ;;  %p6777_p0 = scmp.lt.u32.totalorder %s6768_s28, %s7209_s1 }
  0xd8   : > { %p6776_p13 = por %p6775_p12, %p6774_p11 }
  0xd9   : > { %p6772_p3 = pneg %p6771_p1 }
  0xda   : > { %p6778_p2 = por %p6777_p0, %p6776_p13 }
  0xdc   : > { %p6779_p5 = pnand %p6778_p2, %p6772_p3 }
  0xde   : > { %6782 = shalt.err (!%p6779_p5)
}
  0xdf   : > { %s6783_s23 = scalar_lea.vmem %s7211_s27, 512  ;;  %s6898_s9 = smov [#allocation3]  }
  0xe0   : > { %p6784_p10 = scmp.ne.s32.totalorder %s7211_s27, %s6783_s23  ;;  %s6788_s24 = sshll.u32 %s6898_s9, 4  ;;  %s6789_s24 = int_to_ptr.vmem [resolvable:$false] %s6788_s24 }
  0xe1   : > { %s6790_s21 = scalar_lea.vmem %s6789_s24, 1024  ;;  %p6791_p7 = scmp.lt.s32.totalorder %s7211_s27, %s6789_s24 }
  0xe2   : > { %p6786_p1 = pnand %p6784_p10, %p6770_p8  ;;  %p6792_p11 = scmp.lt.s32.totalorder %s6790_s21, %s6783_s23 }
  0xe4   : > { %p6787_p9 = pneg %p6786_p1  ;;  %p6793_p12 = por %p6792_p11, %p6791_p7 }
  0xe6   : > { %p6794_p13 = pnand %p6793_p12, %p6787_p9 }
  0xe8   : > { %6797 = shalt.err (!%p6794_p13)
}
  0xe9   : > { %s7772_s28 = smov 4   ;;  %p7773_p8 = scmp.ne.s32.totalorder %s7761_s16, 0 }
  0xea   : > { %5769 = dma.hbm_to_vmem [thread:$0]  (!%p7215_p4), %s7209_s1, 512, %s7211_s27, %s7219_s25, %s7765_s18, %s7765_s18, %s7772_s28  }
  0xeb   : > { %390 = sbr.rel (%p7773_p8) target bundleno = 3192 (0xc78), region = 56  ;;  %s7253_s14 = sand.u32 (!%p7773_p8), 1, %s6872_s10  }
  0xec   : > { %s4907_s20 = sshll.u32 (!%p7773_p8), %s7253_s14, 5  ;;  %s393_s23 = scalar_lea.sflag (!%p7773_p8), [#allocation4], %s7253_s14 }
  0xed   : > { %s7257_s9 = scalar_lea.vmem (!%p7773_p8), [#allocation3], %s4907_s20 }
  0xf2   : > { %6843 = dma.done.wait (%p7190_p6), %s393_s23, 512  }
  0xf3   : > { %6845 = vsyncadd (%p7190_p6), %s393_s23, 4294966784  ;;  %p7774_p7 = scmp.eq.s32.totalorder %s6975_s15, 0 }
  0xf5   : > { %6847 = dma.done.wait (%p7774_p7), [#allocation7], 1040   ;;  %p7775_p9 = pmov %p7774_p7 }
  0xf6   : > { %p7776_p4 = pmov %p7774_p7 }
  0xf7   : > { %6849 = vsyncadd (%p7775_p9), [#allocation7], 4294966256 }
  0xf8   : > { %6851 = dma.done.wait (%p7776_p4), [#allocation10], 37056   ;;  %p7777_p3 = pmov %p7776_p4 }
  0xfa   : > { %6853 = vsyncadd (%p7777_p3), [#allocation10], 4294930240  ;;  %p7778_p0 = pmov %p7777_p3 }
  0xfc   : > { %6855 = dma.done.wait (%p7778_p0), [#allocation13], 3120   ;;  %p7779_p2 = pmov %p7778_p0 }
  0xfd   : > { %p7780_p6 = pmov %p7778_p0 }
  0xfe   : > { %6857 = vsyncadd (%p7779_p2), [#allocation13], 4294964176 }
  0xff   : > { %6859 = dma.done.wait (%p7780_p6), [#allocation16], 1040   ;;  %p7781_p5 = pmov %p7778_p0 }
 0x100   : > { %v5844_v0 = vld [vmem:[#allocation6] sm:$0xff]   ;;  %v5845_v1 = vld [vmem:[#allocation6 + $0x8] sm:$0xff]   ;;  %v5846_v2 = vld [vmem:[#allocation6 + $0x10] sm:$0xff]   ;;  %v6899_v40 = vmov 0.0   ;;  %s4916_s16 = sshll.u32 %s7253_s14, 6  ;;  %s5316_s29 = sshll.u32 %s6975_s15, 10 }
 0x101   : > { %6861 = vsyncadd (%p7781_p5), [#allocation16], 4294966256  ;;  %5377 = vmatprep.subr.bf16.mxu0 %v5844_v0  ;;  %v5847_v3 = vld [vmem:[#allocation6 + $0x18] sm:$0xff]   ;;  %v5852_v4 = vld [vmem:[%s7257_s9] sm:$0xff]   ;;  %470 = vst [vmem:[#allocation2 + $0x30] sm:$0xff] %v6899_v40  ;;  %s462_s18 = scalar_lea.vmem [#allocation18], %s4916_s16 }
 0x102   : > { %5378 = vmatpush3.bf16.msra.mxu0 %v5844_v0  ;;  %5393 = vmatprep.mubr.bf16.mxu0 %v5852_v4  ;;  %v5848_v5 = vld [vmem:[#allocation6 + $0x20] sm:$0xff]   ;;  %v5849_v9 = vld [vmem:[#allocation6 + $0x28] sm:$0xff]   ;;  %v5861_v10 = vld [vmem:[#allocation9 + $0x10] ss:$8 sps:$4 sm:$0xff]   ;;  %464 = vst [vmem:[#allocation2] sm:$0xff] %v6899_v40  ;;  %s4743_s1 = sshll.u32 %s462_s18, 4  ;;  %s7698_s1 = int_to_ptr.vmem [resolvable:$true] %s4743_s1 }
 0x103   : > { %5379 = vmatprep.subr.bf16.mxu0 %v5845_v1  ;;  %v5856_v6 = vld [vmem:[#allocation9 + $0x4] ss:$8 sps:$4 sm:$0xff]   ;;  %v5858_v7 = vld [vmem:[#allocation9] ss:$8 sps:$4 sm:$0xff]   ;;  %v5859_v8 = vld [vmem:[#allocation9 + $0x14] ss:$8 sps:$4 sm:$0xff]  }
 0x104   : > { %983 = vmatprep.subr.bf16.mxu1 %v5856_v6  ;;  %v5862_v11 = vld [vmem:[#allocation9 + $0x24] ss:$8 sps:$4 sm:$0xff]   ;;  %v5864_v13 = vld [vmem:[#allocation9 + $0x20] ss:$8 sps:$4 sm:$0xff]   ;;  %v5865_v14 = vld [vmem:[#allocation9 + $0x34] ss:$8 sps:$4 sm:$0xff]  }
 0x105   : > { %984 = vmatpush1.bf16.msra.mxu1 %v5858_v7  ;;  %v5850_v12 = vld [vmem:[#allocation6 + $0x30] sm:$0xff]   ;;  %v5851_v15 = vld [vmem:[#allocation6 + $0x38] sm:$0xff]   ;;  %v5870_v18 = vld [vmem:[#allocation9 + $0x40] ss:$8 sps:$4 sm:$0xff]   ;;  %465 = vst [vmem:[#allocation2 + $0x8] sm:$0xff] %v6899_v40  ;;  %s7782_s25 = sld [smem:[#allocation26_spill]] }
 0x106   : > { %5380 = vmatpush3.bf16.msra.mxu0 %v5845_v1  ;;  %985 = vmatprep.subr.bf16.mxu1 %v5859_v8  ;;  %v5867_v16 = vld [vmem:[#allocation9 + $0x30] ss:$8 sps:$4 sm:$0xff]   ;;  %v5868_v17 = vld [vmem:[#allocation9 + $0x44] ss:$8 sps:$4 sm:$0xff]   ;;  %v5871_v19 = vld [vmem:[#allocation9 + $0x54] ss:$8 sps:$4 sm:$0xff]  }
 0x107   : > { %5381 = vmatprep.subr.bf16.mxu0 %v5846_v2  ;;  %v5853_v20 = vld [vmem:[%s7257_s9 + $0x8] sm:$0xff]   ;;  %v5854_v21 = vld [vmem:[%s7257_s9 + $0x10] sm:$0xff]   ;;  %v5855_v26 = vld [vmem:[%s7257_s9 + $0x18] sm:$0xff]   ;;  %466 = vst [vmem:[#allocation2 + $0x10] sm:$0xff] %v6899_v40  ;;  %s4730_s15 = scalar_lea.sflag [#allocation5], %s7253_s14  ;;  %s6798_s21 = scalar_lea.vmem %s7698_s1, 1024 }
 0x108   : > { %v5873_v22 = vld [vmem:[#allocation9 + $0x50] ss:$8 sps:$4 sm:$0xff]   ;;  %v5874_v23 = vld [vmem:[#allocation9 + $0x64] ss:$8 sps:$4 sm:$0xff]   ;;  %v5876_v24 = vld [vmem:[#allocation9 + $0x60] ss:$8 sps:$4 sm:$0xff]   ;;  %p6799_p10 = scmp.ne.s32.totalorder %s7698_s1, %s6798_s21 }
 0x109   : > { %986 = vmatpush1.bf16.msra.mxu1 %v5861_v10  ;;  %v5877_v25 = vld [vmem:[#allocation9 + $0x74] ss:$8 sps:$4 sm:$0xff]   ;;  %v5879_v27 = vld [vmem:[#allocation9 + $0x70] ss:$8 sps:$4 sm:$0xff]   ;;  %v5880_v28 = vld [vmem:[#allocation9 + $0x84] ss:$8 sps:$4 sm:$0xff]  }
 0x10a   : > { %5382 = vmatpush3.bf16.msra.mxu0 %v5846_v2  ;;  %987 = vmatprep.subr.bf16.mxu1 %v5862_v11  ;;  %v5882_v29 = vld [vmem:[#allocation9 + $0x80] ss:$8 sps:$4 sm:$0xff]   ;;  %v5883_v30 = vld [vmem:[#allocation9 + $0x94] ss:$8 sps:$4 sm:$0xff]   ;;  %v5885_v31 = vld [vmem:[#allocation9 + $0x90] ss:$8 sps:$4 sm:$0xff]  }
 0x10b   : > { %5383 = vmatprep.subr.bf16.mxu0 %v5847_v3  ;;  %v5886_v32 = vld [vmem:[#allocation9 + $0xa4] ss:$8 sps:$4 sm:$0xff]   ;;  %v5888_v33 = vld [vmem:[#allocation9 + $0xa0] ss:$8 sps:$4 sm:$0xff]   ;;  %v5889_v34 = vld [vmem:[#allocation9 + $0xb4] ss:$8 sps:$4 sm:$0xff]   ;;  %s7696_s24 = scalar_lea.hbm %s7782_s25, %s5316_s29 }
 0x10c   : > { %v5891_v35 = vld [vmem:[#allocation9 + $0xb0] ss:$8 sps:$4 sm:$0xff]   ;;  %v5892_v36 = vld [vmem:[#allocation9 + $0xc4] ss:$8 sps:$4 sm:$0xff]   ;;  %v5894_v37 = vld [vmem:[#allocation9 + $0xc0] ss:$8 sps:$4 sm:$0xff]  }
 0x10d   : > { %988 = vmatpush1.bf16.msra.mxu1 %v5864_v13  ;;  %v5895_v38 = vld [vmem:[#allocation9 + $0xd4] ss:$8 sps:$4 sm:$0xff]   ;;  %v5897_v39 = vld [vmem:[#allocation9 + $0xd0] ss:$8 sps:$4 sm:$0xff]   ;;  %467 = vst [vmem:[#allocation2 + $0x18] sm:$0xff] %v6899_v40  ;;  %468 = vst [vmem:[#allocation2 + $0x20] sm:$0xff] %v6899_v40 }
 0x10e   : > { %5384 = vmatpush3.bf16.msra.mxu0 %v5847_v3  ;;  %989 = vmatprep.subr.bf16.mxu1 %v5865_v14  ;;  %469 = vst [vmem:[#allocation2 + $0x28] sm:$0xff] %v6899_v40  ;;  %v5898_v41 = vld [vmem:[#allocation9 + $0xe4] ss:$8 sps:$4 sm:$0xff]   ;;  %v5900_v42 = vld [vmem:[#allocation9 + $0xe0] ss:$8 sps:$4 sm:$0xff]   ;;  %p7783_p1 = scmp.ne.s32.totalorder %s7769_s17, 0 }
 0x10f   : > { %5385 = vmatprep.subr.bf16.mxu0 %v5848_v5  ;;  %v5901_v43 = vld [vmem:[#allocation9 + $0xf4] ss:$8 sps:$4 sm:$0xff]   ;;  %v5903_v44 = vld [vmem:[#allocation9 + $0xf0] ss:$8 sps:$4 sm:$0xff]   ;;  %v5906_v45 = vld [vmem:[#allocation9 + $0x104] ss:$8 sps:$4 sm:$0xff]  }
 0x110   : > { %v5928_v46 = vld [vmem:[#allocation9 + $0x180] ss:$8 sps:$4 sm:$0xff]   ;;  %v5930_v47 = vld [vmem:[#allocation9 + $0x184] ss:$8 sps:$4 sm:$0xff]   ;;  %v5933_v48 = vld [vmem:[#allocation9 + $0x194] ss:$8 sps:$4 sm:$0xff]   ;;  %p6800_p11 = pnand %p6799_p10, %p7783_p1 }
 0x111   : > { %990 = vmatpush1.bf16.msra.mxu1 %v5867_v16  ;;  %v5931_v49 = vld [vmem:[#allocation9 + $0x190] ss:$8 sps:$4 sm:$0xff]   ;;  %v5936_v50 = vld [vmem:[#allocation9 + $0x1a4] ss:$8 sps:$4 sm:$0xff]   ;;  %v5934_v51 = vld [vmem:[#allocation9 + $0x1a0] ss:$8 sps:$4 sm:$0xff]  }
 0x112   : > { %5386 = vmatpush3.bf16.msra.mxu0 %v5848_v5  ;;  %991 = vmatprep.subr.bf16.mxu1 %v5868_v17  ;;  %v5939_v52 = vld [vmem:[#allocation9 + $0x1b4] ss:$8 sps:$4 sm:$0xff]   ;;  %v5937_v53 = vld [vmem:[#allocation9 + $0x1b0] ss:$8 sps:$4 sm:$0xff]   ;;  %v5942_v54 = vld [vmem:[#allocation9 + $0x1c4] ss:$8 sps:$4 sm:$0xff]   ;;  %p6801_p12 = pneg %p6800_p11 }
 0x113   : > { %5387 = vmatprep.subr.bf16.mxu0 %v5849_v9  ;;  %v5940_v55 = vld [vmem:[#allocation9 + $0x1c0] ss:$8 sps:$4 sm:$0xff]   ;;  %v4917_v56 = vld [vmem:[#allocation8] ss:$0 sm:$0xff]  ;;  %v5919_v40 = vld [vmem:[#allocation9 + $0x150] ss:$8 sps:$4 sm:$0xff]  }
 0x114   : > { %v5904_v16 = vld [vmem:[#allocation9 + $0x100] ss:$8 sps:$4 sm:$0xff]   ;;  %s6901_s28 = smov [#allocation18]  }
 0x115   : > { %992 = vmatpush1.bf16.msra.mxu1 %v5870_v18  ;;  %v5909_v18 = vld [vmem:[#allocation9 + $0x114] ss:$8 sps:$4 sm:$0xff]   ;;  %s6802_s20 = sshll.u32 %s6901_s28, 4  ;;  %s6803_s20 = int_to_ptr.vmem [resolvable:$false] %s6802_s20 }
 0x116   : > { %5388 = vmatpush3.bf16.msra.mxu0 %v5849_v9  ;;  %993 = vmatprep.subr.bf16.mxu1 %v5871_v19  ;;  %s6804_s23 = scalar_lea.vmem %s6803_s20, 2048  ;;  %p6805_p13 = scmp.lt.s32.totalorder %s7698_s1, %s6803_s20 }
 0x117   : > { %5389 = vmatprep.subr.bf16.mxu0 %v5850_v12  ;;  %p6806_p8 = scmp.lt.s32.totalorder %s6804_s23, %s6798_s21 }
 0x119   : > { %994 = vmatpush1.bf16.msra.mxu1 %v5873_v22  ;;  %p6807_p7 = por %p6806_p8, %p6805_p13 }
 0x11a   : > { %5390 = vmatpush3.bf16.msra.mxu0 %v5850_v12  ;;  %995 = vmatprep.subr.bf16.mxu1 %v5874_v23 }
 0x11b   : > { %5391 = vmatprep.subr.bf16.mxu0 %v5851_v15  ;;  %p6808_p9 = pnand %p6807_p7, %p6801_p12 }
 0x11d   : > { %996 = vmatpush1.bf16.msra.mxu1 %v5876_v24 }
 0x11e   : > { %5392 = vmatpush3.bf16.msra.mxu0 %v5851_v15  ;;  %997 = vmatprep.subr.bf16.mxu1 %v5877_v25  ;;  %v5910_v25 = vld [vmem:[#allocation9 + $0x120] ss:$8 sps:$4 sm:$0xff]  }
 0x11f   : > { %1555 = vmatprep.subr.bf16.mxu0 %v5930_v47  ;;  %v5925_v47 = vld [vmem:[#allocation9 + $0x170] ss:$8 sps:$4 sm:$0xff]  }
 0x121   : > { %5394 = vmatmul.mubr.bf16.vlgmr.msra.gmra.mrb[0].mxu0 %v5853_v20  ;;  %998 = vmatpush1.bf16.msra.mxu1 %v5879_v27  ;;  %v5907_v20 = vld [vmem:[#allocation9 + $0x110] ss:$8 sps:$4 sm:$0xff]  }
 0x122   : > { %5397 = vmatprep.mubr.bf16.mxu0 %v5854_v21  ;;  %999 = vmatprep.subr.bf16.mxu1 %v5880_v28  ;;  %v5912_v21 = vld [vmem:[#allocation9 + $0x124] ss:$8 sps:$4 sm:$0xff]   ;;  %v5915_v28 = vld [vmem:[#allocation9 + $0x134] ss:$8 sps:$4 sm:$0xff]  }
 0x123   : > { %1556 = vmatpush1.bf16.msra.mxu0 %v5928_v46  ;;  %v5927_v46 = vld [vmem:[#allocation9 + $0x174] ss:$8 sps:$4 sm:$0xff]  }
 0x124   : > { %1557 = vmatprep.subr.bf16.mxu0 %v5933_v48  ;;  %v6900_v48 = vmov 0  }
 0x125   : > { %1000 = vmatpush1.bf16.msra.mxu1 %v5882_v29 }
 0x126   : > { %1001 = vmatprep.subr.bf16.mxu1 %v5883_v30  ;;  %v5913_v30 = vld [vmem:[#allocation9 + $0x130] ss:$8 sps:$4 sm:$0xff]  }
 0x127   : > { %1558 = vmatpush1.bf16.msra.mxu0 %v5931_v49 }
 0x128   : > { %1559 = vmatprep.subr.bf16.mxu0 %v5936_v50 }
 0x129   : > { %5398 = vmatmul.mubr.bf16.gmra.mrb[4].mxu0 %v5855_v26  ;;  %1002 = vmatpush1.bf16.msra.mxu1 %v5885_v31  ;;  %v5918_v31 = vld [vmem:[#allocation9 + $0x144] ss:$8 sps:$4 sm:$0xff]  }
 0x12a   : > { %1003 = vmatprep.subr.bf16.mxu1 %v5886_v32 }
 0x12b   : > { %1560 = vmatpush1.bf16.msra.mxu0 %v5934_v51 }
 0x12c   : > { %1561 = vmatprep.subr.bf16.mxu0 %v5939_v52 }
 0x12d   : > { %1004 = vmatpush1.bf16.msra.mxu1 %v5888_v33 }
 0x12e   : > { %1005 = vmatprep.subr.bf16.mxu1 %v5889_v34 }
 0x12f   : > { %1562 = vmatpush1.bf16.msra.mxu0 %v5937_v53  ;;  %v5945_v53 = vld [vmem:[#allocation9 + $0x1d4] ss:$8 sps:$4 sm:$0xff]  }
 0x130   : > { %1563 = vmatprep.subr.bf16.mxu0 %v5942_v54  ;;  %v5943_v54 = vld [vmem:[#allocation9 + $0x1d0] ss:$8 sps:$4 sm:$0xff]  }
 0x131   : > { %1006 = vmatpush1.bf16.msra.mxu1 %v5891_v35 }
 0x132   : > { %1007 = vmatprep.subr.bf16.mxu1 %v5892_v36  ;;  %v5916_v36 = vld [vmem:[#allocation9 + $0x140] ss:$8 sps:$4 sm:$0xff]  }
 0x133   : > { %1564 = vmatpush1.bf16.msra.mxu0 %v5940_v55  ;;  %v5948_v55 = vld [vmem:[#allocation9 + $0x1e4] ss:$8 sps:$4 sm:$0xff]  }
 0x134   : > { %1565 = vmatprep.subr.bf16.mxu0 %v5945_v53 }
 0x135   : > { %1008 = vmatpush1.bf16.msra.mxu1 %v5894_v37 }
 0x136   : > { %1009 = vmatprep.subr.bf16.mxu1 %v5895_v38  ;;  %v5921_v38 = vld [vmem:[#allocation9 + $0x154] ss:$8 sps:$4 sm:$0xff]  }
 0x137   : > { %1566 = vmatpush1.bf16.msra.mxu0 %v5943_v54 }
 0x138   : > { %1567 = vmatprep.subr.bf16.mxu0 %v5948_v55 }
 0x139   : > { %1010 = vmatpush1.bf16.msra.mxu1 %v5897_v39 }
 0x13a   : > { %1011 = vmatprep.subr.bf16.mxu1 %v5898_v41  ;;  %v5924_v41 = vld [vmem:[#allocation9 + $0x164] ss:$8 sps:$4 sm:$0xff]  }
 0x13d   : > { %1012 = vmatpush1.bf16.msra.mxu1 %v5900_v42 }
 0x13e   : > { %1013 = vmatprep.subr.bf16.mxu1 %v5901_v43 }
 0x141   : > { %1014 = vmatpush1.bf16.msra.mxu1 %v5903_v44  ;;  %v5922_v44 = vld [vmem:[#allocation9 + $0x160] ss:$8 sps:$4 sm:$0xff]  }
 0x142   : > { %1056 = vmatprep.subr.bf16.mxu1 %v5906_v45 }
 0x1f4   : > { %v5395_v57 = vpop.f32.mrb[0].mxu0 }
 0x1f5   : > { %v7283_v58 = vadd.f32 %v5395_v57, %v4917_v56  ;;  %v608_v59 = vpop.f32.mrb[1].mxu0  ;;  %v5951_v57 = vld [vmem:[#allocation9 + $0x1f4] ss:$8 sps:$4 sm:$0xff]  }
 0x1f6   : > { %v7285_v60 = vadd.f32 %v4917_v56, %v608_v59  ;;  %v5396_v61 = vpop.f32.mrb[2].mxu0  ;;  %v5949_v59 = vld [vmem:[#allocation9 + $0x1f0] ss:$8 sps:$4 sm:$0xff]  }
 0x1f7   : > { %641 = vst [vmem:[#allocation2 + $0x48] sm:$0xff] %v7283_v58  ;;  %v7288_v62 = vadd.f32 %v5396_v61, %v4917_v56  ;;  %v611_v63 = vpop.f32.mrb[3].mxu0  ;;  %v5954_v61 = vld [vmem:[#allocation9 + $0x204] ss:$8 sps:$4 sm:$0xff]  }
 0x1f8   : > { %639 = vst [vmem:[#allocation2 + $0x38] sm:$0xff] %v7285_v60  ;;  %v7291_v0 = vadd.f32 %v4917_v56, %v611_v63  ;;  %v5952_v63 = vld [vmem:[#allocation9 + $0x200] ss:$8 sps:$4 sm:$0xff]  }
 0x1f9   : > { %642 = vst [vmem:[#allocation2 + $0x50] sm:$0xff] %v7288_v62  ;;  %v676_v50 = vpack.c.bf16 %v7288_v62, %v7283_v58 }
 0x1fa   : > { %640 = vst [vmem:[#allocation2 + $0x40] sm:$0xff] %v7291_v0  ;;  %v673_v49 = vpack.c.bf16 %v7291_v0, %v7285_v60 }
 0x1fc   : > { %v5399_v1 = vpop.f32.mrb[4].mxu0 }
 0x1fd   : > { %v7295_v2 = vadd.f32 %v5399_v1, %v4917_v56  ;;  %v624_v3 = vpop.f32.mrb[5].mxu0  ;;  %v5957_v1 = vld [vmem:[#allocation9 + $0x214] ss:$8 sps:$4 sm:$0xff]  }
 0x1fe   : > { %v7297_v4 = vadd.f32 %v4917_v56, %v624_v3  ;;  %v5400_v5 = vpop.f32.mrb[6].mxu0  ;;  %v5955_v3 = vld [vmem:[#allocation9 + $0x210] ss:$8 sps:$4 sm:$0xff]  }
 0x1ff   : > { %645 = vst [vmem:[#allocation2 + $0x68] sm:$0xff] %v7295_v2  ;;  %v7300_v6 = vadd.f32 %v5400_v5, %v4917_v56  ;;  %v627_v7 = vpop.f32.mrb[7].mxu0  ;;  %v655_v9 = vld [vmem:[#allocation2 + $0x37] sm:$0xff] }
 0x200   : > { %643 = vst [vmem:[#allocation2 + $0x58] sm:$0xff] %v7297_v4  ;;  %v7303_v8 = vadd.f32 %v4917_v56, %v627_v7  ;;  %v647_v10 = vld [vmem:[#allocation2 + $0x36] sm:$0xff]  ;;  %v650_v22 = vld [vmem:[#allocation2 + $0x4e] sm:$0xff]  ;;  %v5960_v5 = vld [vmem:[#allocation9 + $0x224] ss:$8 sps:$4 sm:$0xff]  }
 0x201   : > { %v658_v11 = vld [vmem:[#allocation2 + $0x4f] sm:$0xff]  ;;  %v648_v12 = vld [vmem:[#allocation2 + $0x3e] sm:$0xff]  ;;  %646 = vst [vmem:[#allocation2 + $0x70] sm:$0xff] %v7300_v6  ;;  %v657_v14 = vld [vmem:[#allocation2 + $0x47] sm:$0xff]  ;;  %v682_v52 = vpack.c.bf16 %v7300_v6, %v7295_v2 }
 0x202   : > { %v656_v13 = vld [vmem:[#allocation2 + $0x3f] sm:$0xff]  ;;  %644 = vst [vmem:[#allocation2 + $0x60] sm:$0xff] %v7303_v8  ;;  %v671_v17 = vpack.c.bf16 %v648_v12, %v647_v10  ;;  %v675_v19 = vpack.c.bf16 %v658_v11, %v657_v14  ;;  %v679_v51 = vpack.c.bf16 %v7303_v8, %v7297_v4  ;;  %v5961_v10 = vld [vmem:[#allocation9 + $0x230] ss:$8 sps:$4 sm:$0xff]  }
 0x203   : > { %v672_v15 = vpack.c.bf16 %v656_v13, %v655_v9  ;;  %v649_v23 = vld [vmem:[#allocation2 + $0x46] sm:$0xff]  ;;  %v5946_v56 = vld [vmem:[#allocation9 + $0x1e0] ss:$8 sps:$4 sm:$0xff]   ;;  %v5963_v9 = vld [vmem:[#allocation9 + $0x234] ss:$8 sps:$4 sm:$0xff]  }
 0x204   : > { %v674_v27 = vpack.c.bf16 %v650_v22, %v649_v23  ;;  %1568 = vmatpush1.bf16.msra.mxu0 %v5946_v56  ;;  %v5958_v7 = vld [vmem:[#allocation9 + $0x220] ss:$8 sps:$4 sm:$0xff]   ;;  %v5966_v11 = vld [vmem:[#allocation9 + $0x244] ss:$8 sps:$4 sm:$0xff]   ;;  %v5969_v13 = vld [vmem:[#allocation9 + $0x254] ss:$8 sps:$4 sm:$0xff]  }
 0x205   : > { %1015 = vmatprep.mubr.bf16.mxu1 %v672_v15  ;;  %1569 = vmatprep.subr.bf16.mxu0 %v5951_v57  ;;  %v5964_v12 = vld [vmem:[#allocation9 + $0x240] ss:$8 sps:$4 sm:$0xff]   ;;  %v5967_v14 = vld [vmem:[#allocation9 + $0x250] ss:$8 sps:$4 sm:$0xff]   ;;  %v5972_v15 = vld [vmem:[#allocation9 + $0x264] ss:$8 sps:$4 sm:$0xff]  }
 0x206   : > { %1016 = vmatmul.mubr.bf16.vlgmr.msra.gmra.mrb[0].mxu1 %v671_v17  ;;  %v5975_v17 = vld [vmem:[#allocation9 + $0x274] ss:$8 sps:$4 sm:$0xff]   ;;  %v6003_v23 = vld [vmem:[#allocation9 + $0x310] ss:$8 sps:$4 sm:$0xff]  }
 0x207   : > { %1057 = vmatpush1.bf16.msra.mxu1 %v5904_v16  ;;  %1025 = vmatprep.mubr.bf16.mxu1 %v675_v19  ;;  %v659_v26 = vld [vmem:[#allocation2 + $0x57] sm:$0xff] }
 0x208   : > { %1058 = vmatprep.subr.bf16.mxu1 %v5909_v18  ;;  %v662_v33 = vld [vmem:[#allocation2 + $0x6f] sm:$0xff]  ;;  %1570 = vmatpush1.bf16.msra.mxu0 %v5949_v59  ;;  %v5970_v16 = vld [vmem:[#allocation9 + $0x260] ss:$8 sps:$4 sm:$0xff]   ;;  %v5978_v19 = vld [vmem:[#allocation9 + $0x284] ss:$8 sps:$4 sm:$0xff]  }
 0x209   : > { %v660_v24 = vld [vmem:[#allocation2 + $0x5f] sm:$0xff]  ;;  %v661_v34 = vld [vmem:[#allocation2 + $0x67] sm:$0xff]  ;;  %v651_v35 = vld [vmem:[#allocation2 + $0x56] sm:$0xff]  ;;  %1571 = vmatprep.subr.bf16.mxu0 %v5954_v61 }
 0x20a   : > { %v678_v29 = vpack.c.bf16 %v660_v24, %v659_v26  ;;  %v652_v32 = vld [vmem:[#allocation2 + $0x5e] sm:$0xff]  ;;  %v681_v39 = vpack.c.bf16 %v662_v33, %v661_v34  ;;  %v654_v42 = vld [vmem:[#allocation2 + $0x6e] sm:$0xff]  ;;  %v653_v43 = vld [vmem:[#allocation2 + $0x66] sm:$0xff] }
 0x20b   : > { %1059 = vmatpush1.bf16.msra.mxu1 %v5907_v20  ;;  %v677_v37 = vpack.c.bf16 %v652_v32, %v651_v35  ;;  %v680_v45 = vpack.c.bf16 %v654_v42, %v653_v43  ;;  %v5973_v18 = vld [vmem:[#allocation9 + $0x270] ss:$8 sps:$4 sm:$0xff]   ;;  %v6000_v20 = vld [vmem:[#allocation9 + $0x300] ss:$8 sps:$4 sm:$0xff]   ;;  %v6005_v22 = vld [vmem:[#allocation9 + $0x314] ss:$8 sps:$4 sm:$0xff]  }
 0x20c   : > { %1060 = vmatprep.subr.bf16.mxu1 %v5912_v21  ;;  %1572 = vmatpush1.bf16.msra.mxu0 %v5952_v63  ;;  %v6002_v21 = vld [vmem:[#allocation9 + $0x304] ss:$8 sps:$4 sm:$0xff]   ;;  %v6011_v26 = vld [vmem:[#allocation9 + $0x334] ss:$8 sps:$4 sm:$0xff]   ;;  %v731_v33 = vld [vmem:[#allocation11] sm:$0x3] }
 0x20d   : > { %1573 = vmatprep.subr.bf16.mxu0 %v5957_v1  ;;  %v6008_v24 = vld [vmem:[#allocation9 + $0x324] ss:$8 sps:$4 sm:$0xff]  }
 0x20e   : > { %1026 = vmatmul.mubr.bf16.gmra.mrb[4].mxu1 %v674_v27  ;;  %v733_v27 = vlaneseq }
 0x20f   : > { %1061 = vmatpush1.bf16.msra.mxu1 %v5910_v25  ;;  %1035 = vmatprep.mubr.bf16.mxu1 %v678_v29  ;;  %v6006_v25 = vld [vmem:[#allocation9 + $0x320] ss:$8 sps:$4 sm:$0xff]   ;;  %v6014_v29 = vld [vmem:[#allocation9 + $0x344] ss:$8 sps:$4 sm:$0xff]  }
 0x210   : > { %1062 = vmatprep.subr.bf16.mxu1 %v5915_v28  ;;  %1574 = vmatpush1.bf16.msra.mxu0 %v5955_v3  ;;  %v6009_v28 = vld [vmem:[#allocation9 + $0x330] ss:$8 sps:$4 sm:$0xff]  }
 0x211   : > { %1575 = vmatprep.subr.bf16.mxu0 %v5960_v5 }
 0x213   : > { %1063 = vmatpush1.bf16.msra.mxu1 %v5913_v30  ;;  %v734_v30 = vshrl.u32 %v733_v27, 7 }
 0x214   : > { %1064 = vmatprep.subr.bf16.mxu1 %v5918_v31  ;;  %1576 = vmatpush1.bf16.msra.mxu0 %v5958_v7  ;;  %v6012_v31 = vld [vmem:[#allocation9 + $0x340] ss:$8 sps:$4 sm:$0xff]  }
 0x215   : > { %1577 = vmatprep.subr.bf16.mxu0 %v5963_v9  ;;  %v7319_v32 = vsub.s32 0, %v734_v30  ;;  %v7324_v63 = vsub.s32 1, %v734_v30 }
 0x216   : > { %1036 = vmatmul.mubr.bf16.gmra.mrb[8].mxu1 %v677_v37 }
 0x217   : > { %1065 = vmatpush1.bf16.msra.mxu1 %v5916_v36  ;;  %1045 = vmatprep.mubr.bf16.mxu1 %v681_v39  ;;  %v736_v34 = vrot.slane %v731_v33, %v7319_v32 }
 0x218   : > { %1066 = vmatprep.subr.bf16.mxu1 %v5921_v38  ;;  %1578 = vmatpush1.bf16.msra.mxu0 %v5961_v10  ;;  %v7329_v10 = vrot.slane %v731_v33, %v7324_v63 }
 0x219   : > { %1579 = vmatprep.subr.bf16.mxu0 %v5966_v11 }
 0x21b   : > { %1067 = vmatpush1.bf16.msra.mxu1 %v5919_v40 }
 0x21c   : > { %1068 = vmatprep.subr.bf16.mxu1 %v5924_v41  ;;  %1580 = vmatpush1.bf16.msra.mxu0 %v5964_v12 }
 0x21d   : > { %1581 = vmatprep.subr.bf16.mxu0 %v5969_v13 }
 0x21e   : > { %1046 = vmatmul.mubr.bf16.gmra.mrb[12].mxu1 %v680_v45 }
 0x21f   : > { %1069 = vmatpush1.bf16.msra.mxu1 %v5922_v44  ;;  %1088 = vmatprep.mubr.bf16.mxu1 %v6900_v48 }
 0x220   : > { %1070 = vmatprep.subr.bf16.mxu1 %v5927_v46  ;;  %1582 = vmatpush1.bf16.msra.mxu0 %v5967_v14 }
 0x221   : > { %1583 = vmatprep.subr.bf16.mxu0 %v5972_v15 }
 0x223   : > { %1071 = vmatpush1.bf16.msra.mxu1 %v5925_v47 }
 0x224   : > { %1584 = vmatpush1.bf16.msra.mxu0 %v5970_v16  ;;  %2127 = vmatprep.subr.bf16.mxu1 %v6002_v21 }
 0x225   : > { %1585 = vmatprep.subr.bf16.mxu0 %v5975_v17 }
 0x226   : > { %1089 = vmatmul.mubr.bf16.vlgmr.msra.gmra.mrb[0].mxu1 %v673_v49 }
 0x227   : > { %1098 = vmatprep.mubr.bf16.mxu1 %v6900_v48  ;;  %2128 = vmatpush1.bf16.msra.mxu1 %v6000_v20 }
 0x228   : > { %1586 = vmatpush1.bf16.msra.mxu0 %v5973_v18  ;;  %2129 = vmatprep.subr.bf16.mxu1 %v6005_v22 }
 0x229   : > { %1628 = vmatprep.subr.bf16.mxu0 %v5978_v19 }
 0x22b   : > { %2130 = vmatpush1.bf16.msra.mxu1 %v6003_v23 }
 0x22c   : > { %2131 = vmatprep.subr.bf16.mxu1 %v6008_v24 }
 0x22e   : > { %1099 = vmatmul.mubr.bf16.gmra.mrb[4].mxu1 %v676_v50 }
 0x22f   : > { %1108 = vmatprep.mubr.bf16.mxu1 %v6900_v48  ;;  %2132 = vmatpush1.bf16.msra.mxu1 %v6006_v25 }
 0x230   : > { %2133 = vmatprep.subr.bf16.mxu1 %v6011_v26 }
 0x233   : > { %2134 = vmatpush1.bf16.msra.mxu1 %v6009_v28 }
 0x234   : > { %2135 = vmatprep.subr.bf16.mxu1 %v6014_v29 }
 0x236   : > { %1109 = vmatmul.mubr.bf16.gmra.mrb[8].mxu1 %v679_v51 }
 0x237   : > { %1118 = vmatprep.mubr.bf16.mxu1 %v6900_v48  ;;  %2136 = vmatpush1.bf16.msra.mxu1 %v6012_v31 }
 0x23e   : > { %1119 = vmatmul.mubr.bf16.gmra.mrb[12].mxu1 %v682_v52 }
 0x2f9   : > { %v1090_v35 = vpop.f32.mrb[0].mxu1 }
 0x2fa   : > { %v5513_v36 = vadd.f32 %v1090_v35, %v736_v34  ;;  %v1092_v37 = vpop.f32.mrb[1].mxu1 }
 0x2fb   : > { %v1094_v38 = vpop.f32.mrb[2].mxu1  ;;  %v5514_v18 = vadd.f32 %v1092_v37, %v7329_v10 }
 0x2fc   : > { %v4978_v39 = vmul.f32 -1.442695, %v5513_v36  ;;  %v5515_v40 = vadd.f32 %v1094_v38, %v736_v34  ;;  %v1096_v41 = vpop.f32.mrb[3].mxu1 }
 0x2fd   : > { %v5516_v23 = vadd.f32 %v1096_v41, %v7329_v10 }
 0x2fe   : > { %6320 = vpow2.f32 %v4978_v39  ;;  %v4979_v42 = vmul.f32 -1.442695, %v5515_v40 }
 0x300   : > { %6322 = vpow2.f32 %v4979_v42 }
 0x301   : > { %v1100_v43 = vpop.f32.mrb[4].mxu1 }
 0x302   : > { %v5517_v44 = vadd.f32 %v1100_v43, %v736_v34  ;;  %v1102_v45 = vpop.f32.mrb[5].mxu1 }
 0x303   : > { %v1104_v46 = vpop.f32.mrb[6].mxu1  ;;  %v5518_v39 = vadd.f32 %v1102_v45, %v7329_v10 }
 0x304   : > { %v4980_v47 = vmul.f32 -1.442695, %v5517_v44  ;;  %v5519_v49 = vadd.f32 %v1104_v46, %v736_v34  ;;  %v1106_v50 = vpop.f32.mrb[7].mxu1 }
 0x305   : > { %v5520_v42 = vadd.f32 %v1106_v50, %v7329_v10 }
 0x306   : > { %6324 = vpow2.f32 %v4980_v47  ;;  %v4981_v51 = vmul.f32 -1.442695, %v5519_v49 }
 0x308   : > { %v6321_v52 = vpop.eup %6320  ;;  %6326 = vpow2.f32 %v4981_v51 }
 0x309   : > { %v1153_v53 = vadd.f32 1.0, %v6321_v52  ;;  %v1110_v54 = vpop.f32.mrb[8].mxu1 }
 0x30a   : > { %v6323_v55 = vpop.eup %6322  ;;  %v5521_v56 = vadd.f32 %v1110_v54, %v736_v34  ;;  %v7322_v57 = vpop.f32.mrb[9].mxu1 }
 0x30b   : > { %6328 = vrcp.f32 %v1153_v53  ;;  %v1154_v59 = vadd.f32 1.0, %v6323_v55  ;;  %v1114_v61 = vpop.f32.mrb[10].mxu1  ;;  %v5522_v50 = vadd.f32 %v7322_v57, %v7329_v10 }
 0x30c   : > { %v4982_v1 = vmul.f32 -1.442695, %v5521_v56  ;;  %v5523_v3 = vadd.f32 %v1114_v61, %v736_v34  ;;  %v7326_v5 = vpop.f32.mrb[11].mxu1 }
 0x30d   : > { %6330 = vrcp.f32 %v1154_v59 }
 0x30e   : > { %6332 = vpow2.f32 %v4982_v1  ;;  %v4983_v7 = vmul.f32 -1.442695, %v5523_v3 }
 0x310   : > { %v6325_v9 = vpop.eup %6324  ;;  %6334 = vpow2.f32 %v4983_v7 }
 0x311   : > { %v1155_v11 = vadd.f32 1.0, %v6325_v9  ;;  %v1120_v12 = vpop.f32.mrb[12].mxu1  ;;  %v5976_v9 = vld [vmem:[#allocation9 + $0x280] ss:$8 sps:$4 sm:$0xff]  }
 0x312   : > { %v6327_v13 = vpop.eup %6326  ;;  %v5525_v14 = vadd.f32 %v1120_v12, %v736_v34  ;;  %v7331_v15 = vpop.f32.mrb[13].mxu1 }
 0x313   : > { %6336 = vrcp.f32 %v1155_v11  ;;  %v1156_v16 = vadd.f32 1.0, %v6327_v13  ;;  %v1124_v17 = vpop.f32.mrb[14].mxu1  ;;  %v5981_v13 = vld [vmem:[#allocation9 + $0x294] ss:$8 sps:$4 sm:$0xff]  }
 0x314   : > { %v4984_v19 = vmul.f32 -1.442695, %v5525_v14  ;;  %v5527_v20 = vadd.f32 %v1124_v17, %v736_v34  ;;  %v7334_v21 = vpop.f32.mrb[15].mxu1 }
 0x315   : > { %v6329_v22 = vpop.eup %6328  ;;  %6338 = vrcp.f32 %v1156_v16 }
 0x316   : > { %v1177_v24 = vmul.f32 %v6329_v22, %v5514_v18  ;;  %v1185_v25 = vsub.f32 1.0, %v6329_v22  ;;  %6340 = vpow2.f32 %v4984_v19  ;;  %v4985_v26 = vmul.f32 -1.442695, %v5527_v20  ;;  %v5979_v18 = vld [vmem:[#allocation9 + $0x290] ss:$8 sps:$4 sm:$0xff]  }
 0x317   : > { %v6331_v27 = vpop.eup %6330  ;;  %v5984_v19 = vld [vmem:[#allocation9 + $0x2a4] ss:$8 sps:$4 sm:$0xff]   ;;  %v5526_v22 = vadd.f32 %v7331_v15, %v7329_v10 }
 0x318   : > { %v6333_v28 = vpop.eup %6332  ;;  %v1193_v29 = vmul.f32 %v1185_v25, %v7285_v60  ;;  %v1178_v30 = vmul.f32 %v6331_v27, %v5516_v23  ;;  %v1186_v31 = vsub.f32 1.0, %v6331_v27  ;;  %6342 = vpow2.f32 %v4985_v26 }
 0x319   : > { %v1157_v33 = vadd.f32 1.0, %v6333_v28 }
 0x31a   : > { %v6335_v35 = vpop.eup %6334  ;;  %v7338_v34 = vadd.f32 %v1193_v29, %v1177_v24  ;;  %v1194_v36 = vmul.f32 %v1186_v31, %v7291_v0  ;;  %v5528_v24 = vadd.f32 %v7334_v21, %v7329_v10 }
 0x31b   : > { %6344 = vrcp.f32 %v1157_v33  ;;  %v1158_v37 = vadd.f32 1.0, %v6335_v35  ;;  %v5987_v35 = vld [vmem:[#allocation9 + $0x2b4] ss:$8 sps:$4 sm:$0xff]  }
 0x31c   : > { %1209 = vst [vmem:[#allocation2 + $0x38] sm:$0xff] %v7338_v34  ;;  %v7342_v38 = vadd.f32 %v1194_v36, %v1178_v30  ;;  %v5982_v30 = vld [vmem:[#allocation9 + $0x2a0] ss:$8 sps:$4 sm:$0xff]  }
 0x31d   : > { %v6337_v40 = vpop.eup %6336  ;;  %6346 = vrcp.f32 %v1158_v37 }
 0x31e   : > { %1210 = vst [vmem:[#allocation2 + $0x40] sm:$0xff] %v7342_v38  ;;  %v1179_v60 = vmul.f32 %v6337_v40, %v5518_v39  ;;  %v1187_v41 = vsub.f32 1.0, %v6337_v40  ;;  %v5985_v39 = vld [vmem:[#allocation9 + $0x2b0] ss:$8 sps:$4 sm:$0xff]   ;;  %v5990_v40 = vld [vmem:[#allocation9 + $0x2c4] ss:$8 sps:$4 sm:$0xff]  }
 0x31f   : > { %v6339_v43 = vpop.eup %6338 }
 0x320   : > { %v6341_v44 = vpop.eup %6340  ;;  %v1195_v0 = vmul.f32 %v1187_v41, %v7283_v58  ;;  %v1180_v46 = vmul.f32 %v6339_v43, %v5520_v42  ;;  %v1188_v47 = vsub.f32 1.0, %v6339_v43  ;;  %v5524_v58 = vadd.f32 %v7326_v5, %v7329_v10 }
 0x321   : > { %v1159_v49 = vadd.f32 1.0, %v6341_v44 }
 0x322   : > { %v6343_v51 = vpop.eup %6342  ;;  %v7348_v52 = vadd.f32 %v1195_v0, %v1179_v60  ;;  %v1196_v45 = vmul.f32 %v1188_v47, %v7288_v62  ;;  %v5988_v0 = vld [vmem:[#allocation9 + $0x2c0] ss:$8 sps:$4 sm:$0xff]   ;;  %v5991_v47 = vld [vmem:[#allocation9 + $0x2d0] ss:$8 sps:$4 sm:$0xff]  }
 0x323   : > { %6348 = vrcp.f32 %v1159_v49  ;;  %v1160_v53 = vadd.f32 1.0, %v6343_v51  ;;  %v1225_v55 = vld [vmem:[#allocation2 + $0x35] sm:$0xff]  ;;  %v5996_v49 = vld [vmem:[#allocation9 + $0x2e4] ss:$8 sps:$4 sm:$0xff]  }
 0x324   : > { %1211 = vst [vmem:[#allocation2 + $0x48] sm:$0xff] %v7348_v52  ;;  %v7352_v54 = vadd.f32 %v1196_v45, %v1180_v46  ;;  %v1217_v61 = vld [vmem:[#allocation2 + $0x32] sm:$0xff] }
 0x325   : > { %v6345_v56 = vpop.eup %6344  ;;  %6350 = vrcp.f32 %v1160_v53  ;;  %v1226_v59 = vld [vmem:[#allocation2 + $0x3d] sm:$0xff] }
 0x326   : > { %v1218_v1 = vld [vmem:[#allocation2 + $0x3a] sm:$0xff]  ;;  %1212 = vst [vmem:[#allocation2 + $0x50] sm:$0xff] %v7352_v54  ;;  %v1181_v62 = vmul.f32 %v6345_v56, %v5522_v50  ;;  %v1189_v3 = vsub.f32 1.0, %v6345_v56  ;;  %v1242_v7 = vpack.c.bf16 %v1226_v59, %v1225_v55  ;;  %v5999_v59 = vld [vmem:[#allocation9 + $0x2f4] ss:$8 sps:$4 sm:$0xff]  }
 0x327   : > { %v1241_v11 = vpack.c.bf16 %v1218_v1, %v1217_v61  ;;  %v6347_v12 = vpop.eup %6346  ;;  %v5994_v56 = vld [vmem:[#allocation9 + $0x2e0] ss:$8 sps:$4 sm:$0xff]   ;;  %v5997_v61 = vld [vmem:[#allocation9 + $0x2f0] ss:$8 sps:$4 sm:$0xff]   ;;  %v1243_v1 = vpack.c.bf16 %v7342_v38, %v7338_v34 }
 0x328   : > { %v1197_v57 = vmul.f32 %v1189_v3, %v7297_v4  ;;  %v1182_v14 = vmul.f32 %v6347_v12, %v5524_v58  ;;  %v1190_v16 = vsub.f32 1.0, %v6347_v12  ;;  %1587 = vmatprep.mubr.bf16.mxu0 %v1242_v7  ;;  %v6020_v12 = vld [vmem:[#allocation9 + $0x364] ss:$8 sps:$4 sm:$0xff]  }
 0x329   : > { %1588 = vmatmul.mubr.bf16.vlgmr.msra.gmra.mrb[8].mxu0 %v1241_v11  ;;  %v6015_v11 = vld [vmem:[#allocation9 + $0x350] ss:$8 sps:$4 sm:$0xff]  }
 0x32a   : > { %v7360_v5 = vadd.f32 %v1197_v57, %v1181_v62  ;;  %v1198_v17 = vmul.f32 %v1190_v16, %v7303_v8  ;;  %1629 = vmatpush1.bf16.msra.mxu0 %v5976_v9  ;;  %v1246_v62 = vpack.c.bf16 %v7352_v54, %v7348_v52  ;;  %v6017_v9 = vld [vmem:[#allocation9 + $0x354] ss:$8 sps:$4 sm:$0xff]   ;;  %v6026_v16 = vld [vmem:[#allocation9 + $0x384] ss:$8 sps:$4 sm:$0xff]  }
 0x32b   : > { %1630 = vmatprep.subr.bf16.mxu0 %v5981_v13  ;;  %v1227_v4 = vld [vmem:[#allocation2 + $0x45] sm:$0xff]  ;;  %2137 = vmatprep.subr.bf16.mxu1 %v6017_v9  ;;  %v6023_v57 = vld [vmem:[#allocation9 + $0x374] ss:$8 sps:$4 sm:$0xff]  }
 0x32c   : > { %1213 = vst [vmem:[#allocation2 + $0x58] sm:$0xff] %v7360_v5  ;;  %v7364_v20 = vadd.f32 %v1198_v17, %v1182_v14  ;;  %v1219_v26 = vld [vmem:[#allocation2 + $0x42] sm:$0xff]  ;;  %2138 = vmatpush1.bf16.msra.mxu1 %v6015_v11  ;;  %v6021_v14 = vld [vmem:[#allocation9 + $0x370] ss:$8 sps:$4 sm:$0xff]  }
 0x32d   : > { %v6349_v23 = vpop.eup %6348  ;;  %v1228_v25 = vld [vmem:[#allocation2 + $0x4d] sm:$0xff]  ;;  %v6018_v13 = vld [vmem:[#allocation9 + $0x360] ss:$8 sps:$4 sm:$0xff]   ;;  %2139 = vmatprep.subr.bf16.mxu1 %v6020_v12 }
 0x32e   : > { %v1220_v27 = vld [vmem:[#allocation2 + $0x4a] sm:$0xff]  ;;  %1214 = vst [vmem:[#allocation2 + $0x60] sm:$0xff] %v7364_v20  ;;  %v1183_v8 = vmul.f32 %v6349_v23, %v5526_v22  ;;  %v1191_v28 = vsub.f32 1.0, %v6349_v23  ;;  %1631 = vmatpush1.bf16.msra.mxu0 %v5979_v18  ;;  %v1245_v29 = vpack.c.bf16 %v1228_v25, %v1227_v4  ;;  %v1249_v3 = vpack.c.bf16 %v7364_v20, %v7360_v5  ;;  %v6024_v17 = vld [vmem:[#allocation9 + $0x380] ss:$8 sps:$4 sm:$0xff]  }
 0x32f   : > { %v1244_v31 = vpack.c.bf16 %v1220_v27, %v1219_v26  ;;  %v6351_v33 = vpop.eup %6350  ;;  %1632 = vmatprep.subr.bf16.mxu0 %v5984_v19  ;;  %v6029_v18 = vld [vmem:[#allocation9 + $0x394] ss:$8 sps:$4 sm:$0xff]   ;;  %v6027_v19 = vld [vmem:[#allocation9 + $0x390] ss:$8 sps:$4 sm:$0xff]   ;;  %v6032_v22 = vld [vmem:[#allocation9 + $0x3a4] ss:$8 sps:$4 sm:$0xff]  }
 0x330   : > { %v1199_v15 = vmul.f32 %v1191_v28, %v7295_v2  ;;  %v1184_v36 = vmul.f32 %v6351_v33, %v5528_v24  ;;  %v1192_v37 = vsub.f32 1.0, %v6351_v33  ;;  %1597 = vmatprep.mubr.bf16.mxu0 %v1245_v29  ;;  %2140 = vmatpush1.bf16.msra.mxu1 %v6018_v13  ;;  %v6030_v4 = vld [vmem:[#allocation9 + $0x3a0] ss:$8 sps:$4 sm:$0xff]   ;;  %v6035_v23 = vld [vmem:[#allocation9 + $0x3b4] ss:$8 sps:$4 sm:$0xff]  }
 0x331   : > { %1598 = vmatmul.mubr.bf16.gmra.mrb[12].mxu0 %v1244_v31  ;;  %2141 = vmatprep.subr.bf16.mxu1 %v6023_v57  ;;  %v6033_v24 = vld [vmem:[#allocation9 + $0x3b0] ss:$8 sps:$4 sm:$0xff]   ;;  %v6038_v25 = vld [vmem:[#allocation9 + $0x3c4] ss:$8 sps:$4 sm:$0xff]   ;;  %v6036_v26 = vld [vmem:[#allocation9 + $0x3c0] ss:$8 sps:$4 sm:$0xff]  }
 0x332   : > { %v7372_v10 = vadd.f32 %v1199_v15, %v1183_v8  ;;  %v1200_v21 = vmul.f32 %v1192_v37, %v7300_v6  ;;  %1633 = vmatpush1.bf16.msra.mxu0 %v5982_v30  ;;  %v5993_v6 = vld [vmem:[#allocation9 + $0x2d4] ss:$8 sps:$4 sm:$0xff]   ;;  %v6039_v8 = vld [vmem:[#allocation9 + $0x3d0] ss:$8 sps:$4 sm:$0xff]   ;;  %v6044_v28 = vld [vmem:[#allocation9 + $0x3e4] ss:$8 sps:$4 sm:$0xff]  }
 0x333   : > { %1634 = vmatprep.subr.bf16.mxu0 %v5987_v35  ;;  %v1229_v41 = vld [vmem:[#allocation2 + $0x55] sm:$0xff]  ;;  %v6050_v33 = vld [vmem:[#allocation9 + $0x404] ss:$8 sps:$4 sm:$0xff]  }
 0x334   : > { %1215 = vst [vmem:[#allocation2 + $0x68] sm:$0xff] %v7372_v10  ;;  %v7376_v60 = vadd.f32 %v1200_v21, %v1184_v36  ;;  %v1221_v43 = vld [vmem:[#allocation2 + $0x52] sm:$0xff]  ;;  %2142 = vmatpush1.bf16.msra.mxu1 %v6021_v14  ;;  %v6042_v29 = vld [vmem:[#allocation9 + $0x3e0] ss:$8 sps:$4 sm:$0xff]   ;;  %v6074_v15 = vld [vmem:[#allocation9 + $0x484] ss:$8 sps:$4 sm:$0xff]  }
 0x335   : > { %v1230_v42 = vld [vmem:[#allocation2 + $0x5d] sm:$0xff]  ;;  %2143 = vmatprep.subr.bf16.mxu1 %v6026_v16  ;;  %v6041_v27 = vld [vmem:[#allocation9 + $0x3d4] ss:$8 sps:$4 sm:$0xff]   ;;  %v6045_v31 = vld [vmem:[#allocation9 + $0x3f0] ss:$8 sps:$4 sm:$0xff]  }
 0x336   : > { %v1222_v2 = vld [vmem:[#allocation2 + $0x5a] sm:$0xff]  ;;  %1216 = vst [vmem:[#allocation2 + $0x70] sm:$0xff] %v7376_v60  ;;  %1635 = vmatpush1.bf16.msra.mxu0 %v5985_v39  ;;  %v1248_v44 = vpack.c.bf16 %v1230_v42, %v1229_v41  ;;  %v1252_v7 = vpack.c.bf16 %v7376_v60, %v7372_v10  ;;  %v6047_v30 = vld [vmem:[#allocation9 + $0x3f4] ss:$8 sps:$4 sm:$0xff]   ;;  %v6075_v37 = vld [vmem:[#allocation9 + $0x490] ss:$8 sps:$4 sm:$0xff]  }
 0x337   : > { %v1247_v46 = vpack.c.bf16 %v1222_v2, %v1221_v43  ;;  %1636 = vmatprep.subr.bf16.mxu0 %v5990_v40  ;;  %v6072_v35 = vld [vmem:[#allocation9 + $0x480] ss:$8 sps:$4 sm:$0xff]   ;;  %v6077_v36 = vld [vmem:[#allocation9 + $0x494] ss:$8 sps:$4 sm:$0xff]   ;;  %v6080_v21 = vld [vmem:[#allocation9 + $0x4a4] ss:$8 sps:$4 sm:$0xff]  }
 0x338   : > { %1607 = vmatprep.mubr.bf16.mxu0 %v1248_v44  ;;  %2144 = vmatpush1.bf16.msra.mxu1 %v6024_v17  ;;  %v6078_v39 = vld [vmem:[#allocation9 + $0x4a0] ss:$8 sps:$4 sm:$0xff]   ;;  %v6083_v40 = vld [vmem:[#allocation9 + $0x4b4] ss:$8 sps:$4 sm:$0xff]   ;;  %v6081_v41 = vld [vmem:[#allocation9 + $0x4b0] ss:$8 sps:$4 sm:$0xff]  }
 0x339   : > { %1608 = vmatmul.mubr.bf16.gmra.mrb[16].mxu0 %v1247_v46  ;;  %2145 = vmatprep.subr.bf16.mxu1 %v6029_v18  ;;  %v6086_v42 = vld [vmem:[#allocation9 + $0x4c4] ss:$8 sps:$4 sm:$0xff]   ;;  %v6084_v43 = vld [vmem:[#allocation9 + $0x4c0] ss:$8 sps:$4 sm:$0xff]   ;;  %v6089_v2 = vld [vmem:[#allocation9 + $0x4d4] ss:$8 sps:$4 sm:$0xff]  }
 0x33a   : > { %1637 = vmatpush1.bf16.msra.mxu0 %v5988_v0  ;;  %v6087_v44 = vld [vmem:[#allocation9 + $0x4d0] ss:$8 sps:$4 sm:$0xff]   ;;  %v1303_v0 = vld [vmem:[#allocation11 + $0x2] sm:$0x3]  ;;  %v6092_v46 = vld [vmem:[#allocation9 + $0x4e4] ss:$8 sps:$4 sm:$0xff]  }
 0x33b   : > { %1638 = vmatprep.subr.bf16.mxu0 %v5993_v6  ;;  %v1231_v51 = vld [vmem:[#allocation2 + $0x65] sm:$0xff]  ;;  %v1308_v6 = vrot.slane %v1303_v0, %v7319_v32 }
 0x33c   : > { %v1223_v53 = vld [vmem:[#allocation2 + $0x62] sm:$0xff]  ;;  %2146 = vmatpush1.bf16.msra.mxu1 %v6027_v19 }
 0x33d   : > { %v1232_v45 = vld [vmem:[#allocation2 + $0x6d] sm:$0xff]  ;;  %2147 = vmatprep.subr.bf16.mxu1 %v6032_v22 }
 0x33e   : > { %v1224_v50 = vld [vmem:[#allocation2 + $0x6a] sm:$0xff]  ;;  %1639 = vmatpush1.bf16.msra.mxu0 %v5991_v47  ;;  %v1251_v55 = vpack.c.bf16 %v1232_v45, %v1231_v51  ;;  %v6090_v47 = vld [vmem:[#allocation9 + $0x4e0] ss:$8 sps:$4 sm:$0xff]  }
 0x33f   : > { %v1250_v58 = vpack.c.bf16 %v1224_v50, %v1223_v53  ;;  %1640 = vmatprep.subr.bf16.mxu0 %v5996_v49 }
 0x340   : > { %1617 = vmatprep.mubr.bf16.mxu0 %v1251_v55  ;;  %2148 = vmatpush1.bf16.msra.mxu1 %v6030_v4 }
 0x341   : > { %1618 = vmatmul.mubr.bf16.gmra.mrb[20].mxu0 %v1250_v58  ;;  %2149 = vmatprep.subr.bf16.mxu1 %v6035_v23 }
 0x342   : > { %1641 = vmatpush1.bf16.msra.mxu0 %v5994_v56  ;;  %1660 = vmatprep.mubr.bf16.mxu0 %v6900_v48 }
 0x343   : > { %1642 = vmatprep.subr.bf16.mxu0 %v5999_v59 }
 0x344   : > { %2150 = vmatpush1.bf16.msra.mxu1 %v6033_v24 }
 0x345   : > { %2151 = vmatprep.subr.bf16.mxu1 %v6038_v25 }
 0x346   : > { %1643 = vmatpush1.bf16.msra.mxu0 %v5997_v61 }
 0x347   : > { %2699 = vmatprep.subr.bf16.mxu0 %v6074_v15 }
 0x348   : > { %2152 = vmatpush1.bf16.msra.mxu1 %v6036_v26  ;;  %v7397_v26 = vrot.slane %v1303_v0, %v7324_v63 }
 0x349   : > { %1661 = vmatmul.mubr.bf16.vlgmr.msra.gmra.mrb[8].mxu0 %v1243_v1  ;;  %2153 = vmatprep.subr.bf16.mxu1 %v6041_v27 }
 0x34a   : > { %1670 = vmatprep.mubr.bf16.mxu0 %v6900_v48  ;;  %2700 = vmatpush1.bf16.msra.mxu0 %v6072_v35 }
 0x34b   : > { %2701 = vmatprep.subr.bf16.mxu0 %v6077_v36 }
 0x34c   : > { %2154 = vmatpush1.bf16.msra.mxu1 %v6039_v8 }
 0x34d   : > { %2155 = vmatprep.subr.bf16.mxu1 %v6044_v28 }
 0x34e   : > { %2702 = vmatpush1.bf16.msra.mxu0 %v6075_v37 }
 0x34f   : > { %2703 = vmatprep.subr.bf16.mxu0 %v6080_v21 }
 0x350   : > { %2156 = vmatpush1.bf16.msra.mxu1 %v6042_v29 }
 0x351   : > { %1671 = vmatmul.mubr.bf16.gmra.mrb[12].mxu0 %v1246_v62  ;;  %2157 = vmatprep.subr.bf16.mxu1 %v6047_v30 }
 0x352   : > { %1680 = vmatprep.mubr.bf16.mxu0 %v6900_v48  ;;  %2704 = vmatpush1.bf16.msra.mxu0 %v6078_v39 }
 0x353   : > { %2705 = vmatprep.subr.bf16.mxu0 %v6083_v40 }
 0x354   : > { %2158 = vmatpush1.bf16.msra.mxu1 %v6045_v31 }
 0x355   : > { %2200 = vmatprep.subr.bf16.mxu1 %v6050_v33 }
 0x356   : > { %2706 = vmatpush1.bf16.msra.mxu0 %v6081_v41 }
 0x357   : > { %2707 = vmatprep.subr.bf16.mxu0 %v6086_v42 }
 0x359   : > { %1681 = vmatmul.mubr.bf16.gmra.mrb[16].mxu0 %v1249_v3 }
 0x35a   : > { %1690 = vmatprep.mubr.bf16.mxu0 %v6900_v48  ;;  %2708 = vmatpush1.bf16.msra.mxu0 %v6084_v43 }
 0x35b   : > { %2709 = vmatprep.subr.bf16.mxu0 %v6089_v2 }
 0x35e   : > { %2710 = vmatpush1.bf16.msra.mxu0 %v6087_v44 }
 0x35f   : > { %2711 = vmatprep.subr.bf16.mxu0 %v6092_v46 }
 0x361   : > { %1691 = vmatmul.mubr.bf16.gmra.mrb[20].mxu0 %v1252_v7 }
 0x362   : > { %2712 = vmatpush1.bf16.msra.mxu0 %v6090_v47 }
 0x41c   : > { %v1662_v49 = vpop.f32.mrb[8].mxu0 }
 0x41d   : > { %v5529_v51 = vadd.f32 %v1662_v49, %v1308_v6  ;;  %v1664_v45 = vpop.f32.mrb[9].mxu0 }
 0x41e   : > { %v1666_v53 = vpop.f32.mrb[10].mxu0  ;;  %v5530_v35 = vadd.f32 %v1664_v45, %v7397_v26 }
 0x41f   : > { %v5034_v50 = vmul.f32 -1.442695, %v5529_v51  ;;  %v5531_v55 = vadd.f32 %v1666_v53, %v1308_v6  ;;  %v1668_v56 = vpop.f32.mrb[11].mxu0 }
 0x420   : > { %v5532_v39 = vadd.f32 %v1668_v56, %v7397_v26 }
 0x421   : > { %6352 = vpow2.f32 %v5034_v50  ;;  %v5035_v58 = vmul.f32 -1.442695, %v5531_v55 }
 0x423   : > { %6354 = vpow2.f32 %v5035_v58 }
 0x424   : > { %v1672_v59 = vpop.f32.mrb[12].mxu0 }
 0x425   : > { %v5533_v61 = vadd.f32 %v1672_v59, %v1308_v6  ;;  %v1674_v1 = vpop.f32.mrb[13].mxu0 }
 0x426   : > { %v1676_v62 = vpop.f32.mrb[14].mxu0  ;;  %v5534_v55 = vadd.f32 %v1674_v1, %v7397_v26 }
 0x427   : > { %v5036_v3 = vmul.f32 -1.442695, %v5533_v61  ;;  %v5535_v7 = vadd.f32 %v1676_v62, %v1308_v6  ;;  %v1678_v9 = vpop.f32.mrb[15].mxu0 }
 0x428   : > { %v5536_v59 = vadd.f32 %v1678_v9, %v7397_v26 }
 0x429   : > { %6356 = vpow2.f32 %v5036_v3  ;;  %v5037_v11 = vmul.f32 -1.442695, %v5535_v7 }
 0x42b   : > { %v6353_v12 = vpop.eup %6352  ;;  %6358 = vpow2.f32 %v5037_v11  ;;  %v1789_v11 = vld [vmem:[#allocation2 + $0x26] sm:$0xff] }
 0x42c   : > { %v1725_v13 = vadd.f32 1.0, %v6353_v12  ;;  %v1682_v57 = vpop.f32.mrb[16].mxu0  ;;  %v1790_v12 = vld [vmem:[#allocation2 + $0x2e] sm:$0xff] }
 0x42d   : > { %v6355_v14 = vpop.eup %6354  ;;  %v5537_v16 = vadd.f32 %v1682_v57, %v1308_v6  ;;  %v7392_v17 = vpop.f32.mrb[17].mxu0  ;;  %v1797_v57 = vld [vmem:[#allocation2 + $0x2f] sm:$0xff] }
 0x42e   : > { %6360 = vrcp.f32 %v1725_v13  ;;  %v1726_v18 = vadd.f32 1.0, %v6355_v14  ;;  %v1686_v19 = vpop.f32.mrb[18].mxu0 }
 0x42f   : > { %v5038_v22 = vmul.f32 -1.442695, %v5537_v16  ;;  %v5539_v4 = vadd.f32 %v1686_v19, %v1308_v6  ;;  %v7394_v23 = vpop.f32.mrb[19].mxu0 }
 0x430   : > { %6362 = vrcp.f32 %v1726_v18 }
 0x431   : > { %6364 = vpow2.f32 %v5038_v22  ;;  %v5039_v24 = vmul.f32 -1.442695, %v5539_v4  ;;  %v1813_v22 = vpack.c.bf16 %v1790_v12, %v1789_v11 }
 0x433   : > { %v6357_v25 = vpop.eup %6356  ;;  %6366 = vpow2.f32 %v5039_v24  ;;  %v6048_v24 = vld [vmem:[#allocation9 + $0x400] ss:$8 sps:$4 sm:$0xff]  }
 0x434   : > { %v1727_v27 = vadd.f32 1.0, %v6357_v25  ;;  %v1692_v8 = vpop.f32.mrb[20].mxu0 }
 0x435   : > { %v6359_v28 = vpop.eup %6358  ;;  %v5541_v29 = vadd.f32 %v1692_v8, %v1308_v6  ;;  %v7399_v30 = vpop.f32.mrb[21].mxu0 }
 0x436   : > { %6368 = vrcp.f32 %v1727_v27  ;;  %v1728_v31 = vadd.f32 1.0, %v6359_v28  ;;  %v1696_v33 = vpop.f32.mrb[22].mxu0  ;;  %v6053_v27 = vld [vmem:[#allocation9 + $0x414] ss:$8 sps:$4 sm:$0xff]   ;;  %v5540_v28 = vadd.f32 %v7394_v23, %v7397_v26 }
 0x437   : > { %v5040_v15 = vmul.f32 -1.442695, %v5541_v29  ;;  %v5543_v36 = vadd.f32 %v1696_v33, %v1308_v6  ;;  %v1698_v37 = vpop.f32.mrb[23].mxu0 }
 0x438   : > { %v6361_v21 = vpop.eup %6360  ;;  %6370 = vrcp.f32 %v1728_v31  ;;  %v7404_v40 = vadd.f32 %v1698_v37, %v7397_v26 }
 0x439   : > { %v1749_v41 = vmul.f32 %v6361_v21, %v5530_v35  ;;  %v1757_v42 = vsub.f32 1.0, %v6361_v21  ;;  %6372 = vpow2.f32 %v5040_v15  ;;  %v5041_v43 = vmul.f32 -1.442695, %v5543_v36  ;;  %v6056_v15 = vld [vmem:[#allocation9 + $0x424] ss:$8 sps:$4 sm:$0xff]  }
 0x43a   : > { %v6363_v2 = vpop.eup %6362 }
 0x43b   : > { %v6365_v44 = vpop.eup %6364  ;;  %v1765_v0 = vmul.f32 %v1757_v42, %v7338_v34  ;;  %v1750_v46 = vmul.f32 %v6363_v2, %v5532_v39  ;;  %v1758_v47 = vsub.f32 1.0, %v6363_v2  ;;  %6374 = vpow2.f32 %v5041_v43  ;;  %v6054_v43 = vld [vmem:[#allocation9 + $0x420] ss:$8 sps:$4 sm:$0xff]  }
 0x43c   : > { %v1729_v6 = vadd.f32 1.0, %v6365_v44 }
 0x43d   : > { %v6367_v49 = vpop.eup %6366  ;;  %v7407_v51 = vadd.f32 %v1765_v0, %v1749_v41  ;;  %v1766_v45 = vmul.f32 %v1758_v47, %v7342_v38 }
 0x43e   : > { %6376 = vrcp.f32 %v1729_v6  ;;  %v1730_v53 = vadd.f32 1.0, %v6367_v49 }
 0x43f   : > { %1781 = vst [vmem:[#allocation2 + $0x38] sm:$0xff] %v7407_v51  ;;  %v7411_v50 = vadd.f32 %v1766_v45, %v1750_v46  ;;  %v6059_v46 = vld [vmem:[#allocation9 + $0x434] ss:$8 sps:$4 sm:$0xff]  }
 0x440   : > { %v6369_v56 = vpop.eup %6368  ;;  %6378 = vrcp.f32 %v1730_v53  ;;  %v6062_v53 = vld [vmem:[#allocation9 + $0x444] ss:$8 sps:$4 sm:$0xff]  }
 0x441   : > { %1782 = vst [vmem:[#allocation2 + $0x40] sm:$0xff] %v7411_v50  ;;  %v1751_v34 = vmul.f32 %v6369_v56, %v5534_v55  ;;  %v1759_v58 = vsub.f32 1.0, %v6369_v56 }
 0x442   : > { %v6371_v61 = vpop.eup %6370 }
 0x443   : > { %v6373_v62 = vpop.eup %6372  ;;  %v1767_v38 = vmul.f32 %v1759_v58, %v7348_v52  ;;  %v1752_v3 = vmul.f32 %v6371_v61, %v5536_v59  ;;  %v1760_v7 = vsub.f32 1.0, %v6371_v61  ;;  %v5538_v52 = vadd.f32 %v7392_v17, %v7397_v26  ;;  %v6051_v17 = vld [vmem:[#allocation9 + $0x410] ss:$8 sps:$4 sm:$0xff]  }
 0x444   : > { %v1731_v13 = vadd.f32 1.0, %v6373_v62  ;;  %v6060_v62 = vld [vmem:[#allocation9 + $0x440] ss:$8 sps:$4 sm:$0xff]  }
 0x445   : > { %v6375_v14 = vpop.eup %6374  ;;  %v7417_v1 = vadd.f32 %v1767_v38, %v1751_v34  ;;  %v1768_v16 = vmul.f32 %v1760_v7, %v7352_v54  ;;  %v6063_v7 = vld [vmem:[#allocation9 + $0x450] ss:$8 sps:$4 sm:$0xff]  }
 0x446   : > { %6380 = vrcp.f32 %v1731_v13  ;;  %v1732_v18 = vadd.f32 1.0, %v6375_v14  ;;  %v1798_v19 = vld [vmem:[#allocation2 + $0x37] sm:$0xff] }
 0x447   : > { %1783 = vst [vmem:[#allocation2 + $0x48] sm:$0xff] %v7417_v1  ;;  %v7421_v9 = vadd.f32 %v1768_v16, %v1752_v3  ;;  %v1814_v4 = vpack.c.bf16 %v1798_v19, %v1797_v57  ;;  %v1791_v2 = vld [vmem:[#allocation2 + $0x36] sm:$0xff] }
 0x448   : > { %v6377_v25 = vpop.eup %6376  ;;  %6382 = vrcp.f32 %v1732_v18  ;;  %v1792_v21 = vld [vmem:[#allocation2 + $0x3e] sm:$0xff]  ;;  %v6065_v3 = vld [vmem:[#allocation9 + $0x454] ss:$8 sps:$4 sm:$0xff]  }
 0x449   : > { %1784 = vst [vmem:[#allocation2 + $0x50] sm:$0xff] %v7421_v9  ;;  %v1753_v8 = vmul.f32 %v6377_v25, %v5538_v52  ;;  %v1761_v54 = vsub.f32 1.0, %v6377_v25  ;;  %2159 = vmatprep.mubr.bf16.mxu1 %v1814_v4  ;;  %v1799_v39 = vld [vmem:[#allocation2 + $0x3f] sm:$0xff]  ;;  %v1816_v0 = vpack.c.bf16 %v1792_v21, %v1791_v2  ;;  %v6071_v19 = vld [vmem:[#allocation9 + $0x474] ss:$8 sps:$4 sm:$0xff]   ;;  %v1815_v52 = vpack.c.bf16 %v7411_v50, %v7407_v51 }
 0x44a   : > { %v6379_v29 = vpop.eup %6378  ;;  %2160 = vmatmul.mubr.bf16.vlgmr.msra.gmra.mrb[16].mxu1 %v1813_v22  ;;  %v6066_v14 = vld [vmem:[#allocation9 + $0x460] ss:$8 sps:$4 sm:$0xff]   ;;  %v6069_v22 = vld [vmem:[#allocation9 + $0x470] ss:$8 sps:$4 sm:$0xff]   ;;  %v1818_v4 = vpack.c.bf16 %v7421_v9, %v7417_v1 }
 0x44b   : > { %v1769_v31 = vmul.f32 %v1761_v54, %v7360_v5  ;;  %v1754_v33 = vmul.f32 %v6379_v29, %v5540_v28  ;;  %v1762_v35 = vsub.f32 1.0, %v6379_v29  ;;  %2201 = vmatpush1.bf16.msra.mxu1 %v6048_v24  ;;  %v5542_v5 = vadd.f32 %v7399_v30, %v7397_v26  ;;  %v6057_v30 = vld [vmem:[#allocation9 + $0x430] ss:$8 sps:$4 sm:$0xff]   ;;  %v6098_v54 = vld [vmem:[#allocation9 + $0x504] ss:$8 sps:$4 sm:$0xff]  }
 0x44c   : > { %2202 = vmatprep.subr.bf16.mxu1 %v6053_v27  ;;  %v6095_v27 = vld [vmem:[#allocation9 + $0x4f4] ss:$8 sps:$4 sm:$0xff]   ;;  %v6096_v28 = vld [vmem:[#allocation9 + $0x500] ss:$8 sps:$4 sm:$0xff]   ;;  %v6117_v2 = vld [vmem:[#allocation9 + $0x570] ss:$8 sps:$4 sm:$0xff]  }
 0x44d   : > { %v7429_v36 = vadd.f32 %v1769_v31, %v1753_v8  ;;  %v1770_v37 = vmul.f32 %v1762_v35, %v7364_v20  ;;  %v6093_v8 = vld [vmem:[#allocation9 + $0x4f0] ss:$8 sps:$4 sm:$0xff]   ;;  %2713 = vmatprep.subr.bf16.mxu0 %v6095_v27  ;;  %v6101_v29 = vld [vmem:[#allocation9 + $0x514] ss:$8 sps:$4 sm:$0xff]   ;;  %v6102_v35 = vld [vmem:[#allocation9 + $0x520] ss:$8 sps:$4 sm:$0xff]  }
 0x44e   : > { %v1800_v41 = vld [vmem:[#allocation2 + $0x47] sm:$0xff]  ;;  %2714 = vmatpush1.bf16.msra.mxu0 %v6093_v8  ;;  %v6108_v21 = vld [vmem:[#allocation9 + $0x540] ss:$8 sps:$4 sm:$0xff]  }
 0x44f   : > { %1785 = vst [vmem:[#allocation2 + $0x58] sm:$0xff] %v7429_v36  ;;  %v7433_v23 = vadd.f32 %v1770_v37, %v1754_v33  ;;  %2203 = vmatpush1.bf16.msra.mxu1 %v6051_v17  ;;  %v1817_v42 = vpack.c.bf16 %v1800_v41, %v1799_v39  ;;  %2715 = vmatprep.subr.bf16.mxu0 %v6098_v54  ;;  %v6099_v31 = vld [vmem:[#allocation9 + $0x510] ss:$8 sps:$4 sm:$0xff]   ;;  %v6104_v33 = vld [vmem:[#allocation9 + $0x524] ss:$8 sps:$4 sm:$0xff]  }
 0x450   : > { %v6381_v44 = vpop.eup %6380  ;;  %2204 = vmatprep.subr.bf16.mxu1 %v6056_v15  ;;  %v1794_v34 = vld [vmem:[#allocation2 + $0x4e] sm:$0xff]  ;;  %v6110_v37 = vld [vmem:[#allocation9 + $0x544] ss:$8 sps:$4 sm:$0xff]  }
 0x451   : > { %1786 = vst [vmem:[#allocation2 + $0x60] sm:$0xff] %v7433_v23  ;;  %v1755_v20 = vmul.f32 %v6381_v44, %v5542_v5  ;;  %v1763_v47 = vsub.f32 1.0, %v6381_v44  ;;  %2169 = vmatprep.mubr.bf16.mxu1 %v1817_v42  ;;  %v1801_v58 = vld [vmem:[#allocation2 + $0x4f] sm:$0xff]  ;;  %v1821_v24 = vpack.c.bf16 %v7433_v23, %v7429_v36  ;;  %v6116_v5 = vld [vmem:[#allocation9 + $0x564] ss:$8 sps:$4 sm:$0xff]  }
 0x452   : > { %v6383_v6 = vpop.eup %6382  ;;  %2170 = vmatmul.mubr.bf16.gmra.mrb[20].mxu1 %v1816_v0  ;;  %2716 = vmatpush1.bf16.msra.mxu0 %v6096_v28  ;;  %v6107_v17 = vld [vmem:[#allocation9 + $0x534] ss:$8 sps:$4 sm:$0xff]   ;;  %v6105_v15 = vld [vmem:[#allocation9 + $0x530] ss:$8 sps:$4 sm:$0xff]   ;;  %v6114_v42 = vld [vmem:[#allocation9 + $0x560] ss:$8 sps:$4 sm:$0xff]  }
 0x453   : > { %v1771_v49 = vmul.f32 %v1763_v47, %v7372_v10  ;;  %v1756_v45 = vmul.f32 %v6383_v6, %v7404_v40  ;;  %v1764_v26 = vsub.f32 1.0, %v6383_v6  ;;  %2205 = vmatpush1.bf16.msra.mxu1 %v6054_v43  ;;  %v1793_v40 = vld [vmem:[#allocation2 + $0x46] sm:$0xff]  ;;  %2717 = vmatprep.subr.bf16.mxu0 %v6101_v29  ;;  %v6113_v39 = vld [vmem:[#allocation9 + $0x554] ss:$8 sps:$4 sm:$0xff]   ;;  %v2369_v44 = vld [vmem:[#allocation2 + $0x1d] sm:$0xff] }
 0x454   : > { %2206 = vmatprep.subr.bf16.mxu1 %v6059_v46  ;;  %v1819_v38 = vpack.c.bf16 %v1794_v34, %v1793_v40  ;;  %v6111_v41 = vld [vmem:[#allocation9 + $0x550] ss:$8 sps:$4 sm:$0xff]   ;;  %v6119_v43 = vld [vmem:[#allocation9 + $0x574] ss:$8 sps:$4 sm:$0xff]   ;;  %v6122_v6 = vld [vmem:[#allocation9 + $0x584] ss:$8 sps:$4 sm:$0xff]  }
 0x455   : > { %v7440_v55 = vadd.f32 %v1771_v49, %v1755_v20  ;;  %v1772_v56 = vmul.f32 %v1764_v26, %v7376_v60  ;;  %v6068_v60 = vld [vmem:[#allocation9 + $0x464] ss:$8 sps:$4 sm:$0xff]   ;;  %v2362_v47 = vld [vmem:[#allocation2 + $0xa] sm:$0xff] }
 0x456   : > { %v1802_v59 = vld [vmem:[#allocation2 + $0x57] sm:$0xff]  ;;  %2718 = vmatpush1.bf16.msra.mxu0 %v6099_v31  ;;  %v2370_v0 = vld [vmem:[#allocation2 + $0x25] sm:$0xff] }
 0x457   : > { %1787 = vst [vmem:[#allocation2 + $0x68] sm:$0xff] %v7440_v55  ;;  %v7444_v61 = vadd.f32 %v1772_v56, %v1756_v45  ;;  %2207 = vmatpush1.bf16.msra.mxu1 %v6057_v30  ;;  %v1820_v10 = vpack.c.bf16 %v1802_v59, %v1801_v58  ;;  %v1795_v16 = vld [vmem:[#allocation2 + $0x56] sm:$0xff]  ;;  %2719 = vmatprep.subr.bf16.mxu0 %v6104_v33  ;;  %v2361_v20 = vld [vmem:[#allocation2 + $0x2] sm:$0xff]  ;;  %v6123_v30 = vld [vmem:[#allocation9 + $0x590] ss:$8 sps:$4 sm:$0xff]  }
 0x458   : > { %2208 = vmatprep.subr.bf16.mxu1 %v6062_v53  ;;  %v1796_v11 = vld [vmem:[#allocation2 + $0x5e] sm:$0xff]  ;;  %v2386_v46 = vpack.c.bf16 %v2370_v0, %v2369_v44  ;;  %v2385_v49 = vpack.c.bf16 %v2362_v47, %v2361_v20  ;;  %v6125_v26 = vld [vmem:[#allocation9 + $0x594] ss:$8 sps:$4 sm:$0xff]   ;;  %v6129_v58 = vld [vmem:[#allocation9 + $0x5b0] ss:$8 sps:$4 sm:$0xff]  }
 0x459   : > { %2179 = vmatprep.mubr.bf16.mxu1 %v1820_v10  ;;  %v1803_v12 = vld [vmem:[#allocation2 + $0x5f] sm:$0xff]  ;;  %v1822_v18 = vpack.c.bf16 %v1796_v11, %v1795_v16  ;;  %v1824_v25 = vpack.c.bf16 %v7444_v61, %v7440_v55  ;;  %v6131_v34 = vld [vmem:[#allocation9 + $0x5b4] ss:$8 sps:$4 sm:$0xff]   ;;  %v6135_v40 = vld [vmem:[#allocation9 + $0x5d0] ss:$8 sps:$4 sm:$0xff]  }
 0x45a   : > { %2180 = vmatmul.mubr.bf16.gmra.mrb[24].mxu1 %v1819_v38  ;;  %2720 = vmatpush1.bf16.msra.mxu0 %v6102_v35  ;;  %v6120_v45 = vld [vmem:[#allocation9 + $0x580] ss:$8 sps:$4 sm:$0xff]   ;;  %v6128_v53 = vld [vmem:[#allocation9 + $0x5a4] ss:$8 sps:$4 sm:$0xff]  }
 0x45b   : > { %2209 = vmatpush1.bf16.msra.mxu1 %v6060_v62  ;;  %2721 = vmatprep.subr.bf16.mxu0 %v6107_v17  ;;  %v6126_v56 = vld [vmem:[#allocation9 + $0x5a0] ss:$8 sps:$4 sm:$0xff]   ;;  %v6134_v59 = vld [vmem:[#allocation9 + $0x5c4] ss:$8 sps:$4 sm:$0xff]   ;;  %v6137_v62 = vld [vmem:[#allocation9 + $0x5d4] ss:$8 sps:$4 sm:$0xff]  }
 0x45c   : > { %2210 = vmatprep.subr.bf16.mxu1 %v6065_v3  ;;  %2731 = vmatprep.mubr.bf16.mxu0 %v2386_v46  ;;  %v6132_v10 = vld [vmem:[#allocation9 + $0x5c0] ss:$8 sps:$4 sm:$0xff]   ;;  %v6140_v3 = vld [vmem:[#allocation9 + $0x5e4] ss:$8 sps:$4 sm:$0xff]  }
 0x45d   : > { %v6138_v38 = vld [vmem:[#allocation9 + $0x5e0] ss:$8 sps:$4 sm:$0xff]  }
 0x45e   : > { %v1804_v13 = vld [vmem:[#allocation2 + $0x67] sm:$0xff]  ;;  %2722 = vmatpush1.bf16.msra.mxu0 %v6105_v15  ;;  %v6144_v11 = vld [vmem:[#allocation9 + $0x600] ss:$8 sps:$4 sm:$0xff]  }
 0x45f   : > { %2211 = vmatpush1.bf16.msra.mxu1 %v6063_v7  ;;  %v1823_v57 = vpack.c.bf16 %v1804_v13, %v1803_v12  ;;  %2723 = vmatprep.subr.bf16.mxu0 %v6110_v37  ;;  %v6143_v7 = vld [vmem:[#allocation9 + $0x5f4] ss:$8 sps:$4 sm:$0xff]   ;;  %v6146_v12 = vld [vmem:[#allocation9 + $0x604] ss:$8 sps:$4 sm:$0xff]   ;;  %v6150_v16 = vld [vmem:[#allocation9 + $0x620] ss:$8 sps:$4 sm:$0xff]  }
 0x460   : > { %2212 = vmatprep.subr.bf16.mxu1 %v6068_v60  ;;  %v6141_v60 = vld [vmem:[#allocation9 + $0x5f0] ss:$8 sps:$4 sm:$0xff]   ;;  %v6149_v13 = vld [vmem:[#allocation9 + $0x614] ss:$8 sps:$4 sm:$0xff]  }
 0x461   : > { %2189 = vmatprep.mubr.bf16.mxu1 %v1823_v57  ;;  %v6147_v57 = vld [vmem:[#allocation9 + $0x610] ss:$8 sps:$4 sm:$0xff]  }
 0x462   : > { %2190 = vmatmul.mubr.bf16.gmra.mrb[28].mxu1 %v1822_v18  ;;  %2724 = vmatpush1.bf16.msra.mxu0 %v6108_v21  ;;  %v6155_v18 = vld [vmem:[#allocation9 + $0x634] ss:$8 sps:$4 sm:$0xff]  }
 0x463   : > { %2213 = vmatpush1.bf16.msra.mxu1 %v6066_v14  ;;  %2232 = vmatprep.mubr.bf16.mxu1 %v6900_v48  ;;  %v6152_v14 = vld [vmem:[#allocation9 + $0x624] ss:$8 sps:$4 sm:$0xff]  }
 0x464   : > { %2214 = vmatprep.subr.bf16.mxu1 %v6071_v19  ;;  %2725 = vmatprep.subr.bf16.mxu0 %v6113_v39  ;;  %v6153_v19 = vld [vmem:[#allocation9 + $0x630] ss:$8 sps:$4 sm:$0xff]  }
 0x466   : > { %2726 = vmatpush1.bf16.msra.mxu0 %v6111_v41 }
 0x467   : > { %2215 = vmatpush1.bf16.msra.mxu1 %v6069_v22  ;;  %2727 = vmatprep.subr.bf16.mxu0 %v6116_v5  ;;  %v6158_v22 = vld [vmem:[#allocation9 + $0x644] ss:$8 sps:$4 sm:$0xff]  }
 0x468   : > { %3271 = vmatprep.subr.bf16.mxu1 %v6146_v12 }
 0x46a   : > { %2233 = vmatmul.mubr.bf16.vlgmr.msra.gmra.mrb[16].mxu1 %v1815_v52  ;;  %2728 = vmatpush1.bf16.msra.mxu0 %v6114_v42  ;;  %v6156_v52 = vld [vmem:[#allocation9 + $0x640] ss:$8 sps:$4 sm:$0xff]  }
 0x46b   : > { %2242 = vmatprep.mubr.bf16.mxu1 %v6900_v48  ;;  %2729 = vmatprep.subr.bf16.mxu0 %v6119_v43 }
 0x46c   : > { %3272 = vmatpush1.bf16.msra.mxu1 %v6144_v11 }
 0x46d   : > { %3273 = vmatprep.subr.bf16.mxu1 %v6149_v13 }
 0x46e   : > { %2730 = vmatpush1.bf16.msra.mxu0 %v6117_v2 }
 0x46f   : > { %2772 = vmatprep.subr.bf16.mxu0 %v6122_v6 }
 0x470   : > { %3274 = vmatpush1.bf16.msra.mxu1 %v6147_v57 }
 0x471   : > { %2732 = vmatmul.mubr.bf16.vlgmr.msra.gmra.mrb[24].mxu0 %v2385_v49  ;;  %3275 = vmatprep.subr.bf16.mxu1 %v6152_v14 }
 0x472   : > { %2243 = vmatmul.mubr.bf16.gmra.mrb[20].mxu1 %v1818_v4  ;;  %2773 = vmatpush1.bf16.msra.mxu0 %v6120_v45  ;;  %v1875_v4 = vld [vmem:[#allocation11 + $0x4] sm:$0x3] }
 0x473   : > { %2252 = vmatprep.mubr.bf16.mxu1 %v6900_v48  ;;  %2774 = vmatprep.subr.bf16.mxu0 %v6125_v26 }
 0x474   : > { %3276 = vmatpush1.bf16.msra.mxu1 %v6150_v16 }
 0x475   : > { %3277 = vmatprep.subr.bf16.mxu1 %v6155_v18 }
 0x476   : > { %2775 = vmatpush1.bf16.msra.mxu0 %v6123_v30 }
 0x477   : > { %2776 = vmatprep.subr.bf16.mxu0 %v6128_v53  ;;  %v7464_v53 = vrot.slane %v1875_v4, %v7324_v63 }
 0x478   : > { %3278 = vmatpush1.bf16.msra.mxu1 %v6153_v19 }
 0x479   : > { %3279 = vmatprep.subr.bf16.mxu1 %v6158_v22 }
 0x47a   : > { %2253 = vmatmul.mubr.bf16.gmra.mrb[24].mxu1 %v1821_v24  ;;  %2777 = vmatpush1.bf16.msra.mxu0 %v6126_v56  ;;  %v1880_v24 = vrot.slane %v1875_v4, %v7319_v32 }
 0x47b   : > { %2262 = vmatprep.mubr.bf16.mxu1 %v6900_v48  ;;  %2778 = vmatprep.subr.bf16.mxu0 %v6131_v34 }
 0x47c   : > { %3280 = vmatpush1.bf16.msra.mxu1 %v6156_v52 }
 0x47e   : > { %2779 = vmatpush1.bf16.msra.mxu0 %v6129_v58 }
 0x47f   : > { %2780 = vmatprep.subr.bf16.mxu0 %v6134_v59 }
 0x482   : > { %2263 = vmatmul.mubr.bf16.gmra.mrb[28].mxu1 %v1824_v25  ;;  %2781 = vmatpush1.bf16.msra.mxu0 %v6132_v10 }
 0x483   : > { %2782 = vmatprep.subr.bf16.mxu0 %v6137_v62 }
 0x486   : > { %2783 = vmatpush1.bf16.msra.mxu0 %v6135_v40 }
 0x487   : > { %2784 = vmatprep.subr.bf16.mxu0 %v6140_v3 }
 0x48a   : > { %2785 = vmatpush1.bf16.msra.mxu0 %v6138_v38 }
 0x48b   : > { %2786 = vmatprep.subr.bf16.mxu0 %v6143_v7 }
 0x48e   : > { %2787 = vmatpush1.bf16.msra.mxu0 %v6141_v60 }
 0x53d   : > { %v2234_v25 = vpop.f32.mrb[16].mxu1 }
 0x53e   : > { %v5545_v27 = vadd.f32 %v2234_v25, %v1880_v24  ;;  %v2236_v8 = vpop.f32.mrb[17].mxu1 }
 0x53f   : > { %v2238_v54 = vpop.f32.mrb[18].mxu1  ;;  %v5546_v38 = vadd.f32 %v2236_v8, %v7464_v53 }
 0x540   : > { %v5090_v28 = vmul.f32 -1.442695, %v5545_v27  ;;  %v5547_v29 = vadd.f32 %v2238_v54, %v1880_v24  ;;  %v2240_v31 = vpop.f32.mrb[19].mxu1 }
 0x541   : > { %v5548_v12 = vadd.f32 %v2240_v31, %v7464_v53 }
 0x542   : > { %6384 = vpow2.f32 %v5090_v28  ;;  %v5091_v33 = vmul.f32 -1.442695, %v5547_v29 }
 0x544   : > { %6386 = vpow2.f32 %v5091_v33 }
 0x545   : > { %v2244_v35 = vpop.f32.mrb[20].mxu1 }
 0x546   : > { %v5549_v17 = vadd.f32 %v2244_v35, %v1880_v24  ;;  %v2246_v15 = vpop.f32.mrb[21].mxu1 }
 0x547   : > { %v2248_v37 = vpop.f32.mrb[22].mxu1  ;;  %v5550_v28 = vadd.f32 %v2246_v15, %v7464_v53 }
 0x548   : > { %v5092_v21 = vmul.f32 -1.442695, %v5549_v17  ;;  %v5551_v39 = vadd.f32 %v2248_v37, %v1880_v24  ;;  %v2250_v41 = vpop.f32.mrb[23].mxu1 }
 0x549   : > { %v5552_v33 = vadd.f32 %v2250_v41, %v7464_v53 }
 0x54a   : > { %6388 = vpow2.f32 %v5092_v21  ;;  %v5093_v5 = vmul.f32 -1.442695, %v5551_v39  ;;  %v2363_v39 = vld [vmem:[#allocation2 + $0x12] sm:$0xff] }
 0x54c   : > { %v6385_v42 = vpop.eup %6384  ;;  %6390 = vpow2.f32 %v5093_v5  ;;  %v2364_v5 = vld [vmem:[#allocation2 + $0x1a] sm:$0xff] }
 0x54d   : > { %v2297_v43 = vadd.f32 1.0, %v6385_v42  ;;  %v2254_v2 = vpop.f32.mrb[24].mxu1 }
 0x54e   : > { %v6387_v44 = vpop.eup %6386  ;;  %v5553_v0 = vadd.f32 %v2254_v2, %v1880_v24  ;;  %v7459_v46 = vpop.f32.mrb[25].mxu1 }
 0x54f   : > { %6392 = vrcp.f32 %v2297_v43  ;;  %v2298_v20 = vadd.f32 1.0, %v6387_v44  ;;  %v2258_v47 = vpop.f32.mrb[26].mxu1  ;;  %v2371_v43 = vld [vmem:[#allocation2 + $0x2d] sm:$0xff] }
 0x550   : > { %v5094_v6 = vmul.f32 -1.442695, %v5553_v0  ;;  %v5555_v49 = vadd.f32 %v2258_v47, %v1880_v24  ;;  %v7461_v45 = vpop.f32.mrb[27].mxu1  ;;  %v2388_v47 = vpack.c.bf16 %v2364_v5, %v2363_v39  ;;  %v6168_v39 = vld [vmem:[#allocation9 + $0x680] ss:$8 sps:$4 sm:$0xff]  }
 0x551   : > { %6394 = vrcp.f32 %v2298_v20  ;;  %v6173_v5 = vld [vmem:[#allocation9 + $0x694] ss:$8 sps:$4 sm:$0xff]  }
 0x552   : > { %6396 = vpow2.f32 %v5094_v6  ;;  %v5095_v26 = vmul.f32 -1.442695, %v5555_v49 }
 0x554   : > { %v6389_v30 = vpop.eup %6388  ;;  %6398 = vpow2.f32 %v5095_v26 }
 0x555   : > { %v2299_v56 = vadd.f32 1.0, %v6389_v30  ;;  %v2264_v34 = vpop.f32.mrb[28].mxu1 }
 0x556   : > { %v6391_v58 = vpop.eup %6390  ;;  %v5557_v59 = vadd.f32 %v2264_v34, %v1880_v24  ;;  %v7466_v10 = vpop.f32.mrb[29].mxu1 }
 0x557   : > { %6400 = vrcp.f32 %v2299_v56  ;;  %v2300_v62 = vadd.f32 1.0, %v6391_v58  ;;  %v2268_v40 = vpop.f32.mrb[30].mxu1 }
 0x558   : > { %v5096_v3 = vmul.f32 -1.442695, %v5557_v59  ;;  %v5559_v7 = vadd.f32 %v2268_v40, %v1880_v24  ;;  %v7469_v60 = vpop.f32.mrb[31].mxu1  ;;  %v2366_v40 = vld [vmem:[#allocation2 + $0x2a] sm:$0xff] }
 0x559   : > { %v6393_v11 = vpop.eup %6392  ;;  %6402 = vrcp.f32 %v2300_v62  ;;  %v2365_v62 = vld [vmem:[#allocation2 + $0x22] sm:$0xff] }
 0x55a   : > { %v2321_v13 = vmul.f32 %v6393_v11, %v5546_v38  ;;  %v2329_v57 = vsub.f32 1.0, %v6393_v11  ;;  %6404 = vpow2.f32 %v5096_v3  ;;  %v5097_v14 = vmul.f32 -1.442695, %v5559_v7 }
 0x55b   : > { %v6395_v16 = vpop.eup %6394  ;;  %v2391_v11 = vpack.c.bf16 %v2366_v40, %v2365_v62  ;;  %v6219_v62 = vld [vmem:[#allocation9 + $0x790] ss:$8 sps:$4 sm:$0xff]   ;;  %v6224_v40 = vld [vmem:[#allocation9 + $0x7a4] ss:$8 sps:$4 sm:$0xff]  }
 0x55c   : > { %v6397_v18 = vpop.eup %6396  ;;  %v2337_v19 = vmul.f32 %v2329_v57, %v7407_v51  ;;  %v2322_v22 = vmul.f32 %v6395_v16, %v5548_v12  ;;  %v2330_v52 = vsub.f32 1.0, %v6395_v16  ;;  %6406 = vpow2.f32 %v5097_v14 }
 0x55d   : > { %v2301_v4 = vadd.f32 1.0, %v6397_v18  ;;  %v5560_v16 = vadd.f32 %v7469_v60, %v7464_v53 }
 0x55e   : > { %v6399_v25 = vpop.eup %6398  ;;  %v7473_v24 = vadd.f32 %v2337_v19, %v2321_v13  ;;  %v2338_v27 = vmul.f32 %v2330_v52, %v7411_v50 }
 0x55f   : > { %6408 = vrcp.f32 %v2301_v4  ;;  %v2302_v8 = vadd.f32 1.0, %v6399_v25 }
 0x560   : > { %2353 = vst [vmem:[#allocation2 + $0x38] sm:$0xff] %v7473_v24  ;;  %v7477_v54 = vadd.f32 %v2338_v27, %v2322_v22 }
 0x561   : > { %v6401_v29 = vpop.eup %6400  ;;  %6410 = vrcp.f32 %v2302_v8 }
 0x562   : > { %2354 = vst [vmem:[#allocation2 + $0x40] sm:$0xff] %v7477_v54  ;;  %v2323_v51 = vmul.f32 %v6401_v29, %v5550_v28  ;;  %v2331_v31 = vsub.f32 1.0, %v6401_v29 }
 0x563   : > { %v6403_v35 = vpop.eup %6402 }
 0x564   : > { %v6405_v17 = vpop.eup %6404  ;;  %v2339_v50 = vmul.f32 %v2331_v31, %v7417_v1  ;;  %v2324_v37 = vmul.f32 %v6403_v35, %v5552_v33  ;;  %v2332_v21 = vsub.f32 1.0, %v6403_v35  ;;  %v5554_v1 = vadd.f32 %v7459_v46, %v7464_v53  ;;  %v6161_v31 = vld [vmem:[#allocation9 + $0x654] ss:$8 sps:$4 sm:$0xff]   ;;  %v6159_v33 = vld [vmem:[#allocation9 + $0x650] ss:$8 sps:$4 sm:$0xff]  }
 0x565   : > { %v2303_v42 = vadd.f32 1.0, %v6405_v17  ;;  %3281 = vmatprep.subr.bf16.mxu1 %v6161_v31  ;;  %v6164_v35 = vld [vmem:[#allocation9 + $0x664] ss:$8 sps:$4 sm:$0xff]   ;;  %v6162_v17 = vld [vmem:[#allocation9 + $0x660] ss:$8 sps:$4 sm:$0xff]  }
 0x566   : > { %v6407_v2 = vpop.eup %6406  ;;  %v7483_v15 = vadd.f32 %v2339_v50, %v2323_v51  ;;  %v2340_v44 = vmul.f32 %v2332_v21, %v7421_v9  ;;  %v5556_v9 = vadd.f32 %v7461_v45, %v7464_v53  ;;  %v5558_v45 = vadd.f32 %v7466_v10, %v7464_v53  ;;  %3282 = vmatpush1.bf16.msra.mxu1 %v6159_v33  ;;  %v6167_v50 = vld [vmem:[#allocation9 + $0x674] ss:$8 sps:$4 sm:$0xff]   ;;  %v6170_v21 = vld [vmem:[#allocation9 + $0x684] ss:$8 sps:$4 sm:$0xff]  }
 0x567   : > { %6412 = vrcp.f32 %v2303_v42  ;;  %v2304_v0 = vadd.f32 1.0, %v6407_v2  ;;  %v2372_v20 = vld [vmem:[#allocation2 + $0x35] sm:$0xff]  ;;  %3283 = vmatprep.subr.bf16.mxu1 %v6164_v35 }
 0x568   : > { %2355 = vst [vmem:[#allocation2 + $0x48] sm:$0xff] %v7483_v15  ;;  %v7487_v41 = vadd.f32 %v2340_v44, %v2324_v37  ;;  %v2389_v6 = vpack.c.bf16 %v2372_v20, %v2371_v43  ;;  %v2367_v29 = vld [vmem:[#allocation2 + $0x32] sm:$0xff]  ;;  %v6176_v43 = vld [vmem:[#allocation9 + $0x6a4] ss:$8 sps:$4 sm:$0xff]   ;;  %v6174_v2 = vld [vmem:[#allocation9 + $0x6a0] ss:$8 sps:$4 sm:$0xff]  }
 0x569   : > { %v6409_v49 = vpop.eup %6408  ;;  %6414 = vrcp.f32 %v2304_v0  ;;  %v2373_v3 = vld [vmem:[#allocation2 + $0x3d] sm:$0xff]  ;;  %v6165_v37 = vld [vmem:[#allocation9 + $0x670] ss:$8 sps:$4 sm:$0xff]   ;;  %v6179_v44 = vld [vmem:[#allocation9 + $0x6b4] ss:$8 sps:$4 sm:$0xff]  }
 0x56a   : > { %2356 = vst [vmem:[#allocation2 + $0x50] sm:$0xff] %v7487_v41  ;;  %v2325_v26 = vmul.f32 %v6409_v49, %v5554_v1  ;;  %v2333_v30 = vsub.f32 1.0, %v6409_v49  ;;  %2741 = vmatprep.mubr.bf16.mxu0 %v2389_v6  ;;  %v2368_v25 = vld [vmem:[#allocation2 + $0x3a] sm:$0xff]  ;;  %3284 = vmatpush1.bf16.msra.mxu1 %v6162_v17  ;;  %v6171_v42 = vld [vmem:[#allocation9 + $0x690] ss:$8 sps:$4 sm:$0xff]  }
 0x56b   : > { %v6411_v56 = vpop.eup %6410  ;;  %2742 = vmatmul.mubr.bf16.gmra.mrb[28].mxu0 %v2388_v47  ;;  %v2394_v51 = vpack.c.bf16 %v2368_v25, %v2367_v29  ;;  %3285 = vmatprep.subr.bf16.mxu1 %v6167_v50  ;;  %v6177_v0 = vld [vmem:[#allocation9 + $0x6b0] ss:$8 sps:$4 sm:$0xff]   ;;  %v6182_v20 = vld [vmem:[#allocation9 + $0x6c4] ss:$8 sps:$4 sm:$0xff]   ;;  %v6180_v47 = vld [vmem:[#allocation9 + $0x6c0] ss:$8 sps:$4 sm:$0xff]  }
 0x56c   : > { %v2341_v34 = vmul.f32 %v2333_v30, %v7429_v36  ;;  %v2326_v58 = vmul.f32 %v6411_v56, %v5556_v9  ;;  %v2334_v59 = vsub.f32 1.0, %v6411_v56  ;;  %v6185_v1 = vld [vmem:[#allocation9 + $0x6d4] ss:$8 sps:$4 sm:$0xff]   ;;  %v6183_v6 = vld [vmem:[#allocation9 + $0x6d0] ss:$8 sps:$4 sm:$0xff]  }
 0x56d   : > { %v6188_v49 = vld [vmem:[#allocation9 + $0x6e4] ss:$8 sps:$4 sm:$0xff]   ;;  %v6191_v30 = vld [vmem:[#allocation9 + $0x6f4] ss:$8 sps:$4 sm:$0xff]   ;;  %v6189_v9 = vld [vmem:[#allocation9 + $0x6f0] ss:$8 sps:$4 sm:$0xff]  }
 0x56e   : > { %v7495_v46 = vadd.f32 %v2341_v34, %v2325_v26  ;;  %v2342_v38 = vmul.f32 %v2334_v59, %v7433_v23  ;;  %3286 = vmatpush1.bf16.msra.mxu1 %v6165_v37  ;;  %v6186_v26 = vld [vmem:[#allocation9 + $0x6e0] ss:$8 sps:$4 sm:$0xff]   ;;  %v6194_v56 = vld [vmem:[#allocation9 + $0x704] ss:$8 sps:$4 sm:$0xff]   ;;  %v6221_v59 = vld [vmem:[#allocation9 + $0x794] ss:$8 sps:$4 sm:$0xff]  }
 0x56f   : > { %v2374_v7 = vld [vmem:[#allocation2 + $0x45] sm:$0xff]  ;;  %3287 = vmatprep.subr.bf16.mxu1 %v6170_v21 }
 0x570   : > { %2357 = vst [vmem:[#allocation2 + $0x58] sm:$0xff] %v7495_v46  ;;  %v7499_v12 = vadd.f32 %v2342_v38, %v2326_v58  ;;  %v2392_v13 = vpack.c.bf16 %v2374_v7, %v2373_v3  ;;  %v6216_v34 = vld [vmem:[#allocation9 + $0x780] ss:$8 sps:$4 sm:$0xff]   ;;  %v6218_v58 = vld [vmem:[#allocation9 + $0x784] ss:$8 sps:$4 sm:$0xff]  }
 0x571   : > { %v6413_v36 = vpop.eup %6412  ;;  %v2375_v10 = vld [vmem:[#allocation2 + $0x4d] sm:$0xff]  ;;  %3843 = vmatprep.subr.bf16.mxu0 %v6218_v58  ;;  %v6222_v38 = vld [vmem:[#allocation9 + $0x7a0] ss:$8 sps:$4 sm:$0xff]  }
 0x572   : > { %v2327_v57 = vmul.f32 %v6413_v36, %v5558_v45  ;;  %v2335_v14 = vsub.f32 1.0, %v6413_v36  ;;  %2751 = vmatprep.mubr.bf16.mxu0 %v2392_v13  ;;  %v2393_v53 = vpack.c.bf16 %v7499_v12, %v7495_v46  ;;  %3288 = vmatpush1.bf16.msra.mxu1 %v6168_v39  ;;  %v6227_v3 = vld [vmem:[#allocation9 + $0x7b4] ss:$8 sps:$4 sm:$0xff]   ;;  %v6225_v7 = vld [vmem:[#allocation9 + $0x7b0] ss:$8 sps:$4 sm:$0xff]  }
 0x573   : > { %v6415_v18 = vpop.eup %6414  ;;  %2752 = vmatmul.mubr.bf16.gmra.mrb[32].mxu0 %v2391_v11  ;;  %3289 = vmatprep.subr.bf16.mxu1 %v6173_v5  ;;  %v6230_v11 = vld [vmem:[#allocation9 + $0x7c4] ss:$8 sps:$4 sm:$0xff]   ;;  %v6228_v45 = vld [vmem:[#allocation9 + $0x7c0] ss:$8 sps:$4 sm:$0xff]  }
 0x574   : > { %v2343_v23 = vmul.f32 %v2335_v14, %v7440_v55  ;;  %v2328_v19 = vmul.f32 %v6415_v18, %v5560_v16  ;;  %v2336_v22 = vsub.f32 1.0, %v6415_v18  ;;  %v2387_v55 = vpack.c.bf16 %v7477_v54, %v7473_v24  ;;  %v2447_v13 = vld [vmem:[#allocation11 + $0x6] sm:$0x3] }
 0x575   : > { %v2452_v36 = vrot.slane %v2447_v13, %v7319_v32 }
 0x576   : > { %v7506_v52 = vadd.f32 %v2343_v23, %v2327_v57  ;;  %v2344_v4 = vmul.f32 %v2336_v22, %v7444_v61  ;;  %v2390_v61 = vpack.c.bf16 %v7487_v41, %v7483_v15  ;;  %3290 = vmatpush1.bf16.msra.mxu1 %v6171_v42 }
 0x577   : > { %v2376_v27 = vld [vmem:[#allocation2 + $0x55] sm:$0xff]  ;;  %3291 = vmatprep.subr.bf16.mxu1 %v6176_v43 }
 0x578   : > { %v7509_v8 = vadd.f32 %v2344_v4, %v2328_v19  ;;  %v2395_v28 = vpack.c.bf16 %v2376_v27, %v2375_v10 }
 0x57a   : > { %2761 = vmatprep.mubr.bf16.mxu0 %v2395_v28  ;;  %v2396_v60 = vpack.c.bf16 %v7509_v8, %v7506_v52  ;;  %3292 = vmatpush1.bf16.msra.mxu1 %v6174_v2  ;;  %v7529_v2 = vrot.slane %v2447_v13, %v7324_v63 }
 0x57b   : > { %2762 = vmatmul.mubr.bf16.gmra.mrb[36].mxu0 %v2394_v51  ;;  %3293 = vmatprep.subr.bf16.mxu1 %v6179_v44 }
 0x57c   : > { %2804 = vmatprep.mubr.bf16.mxu0 %v6900_v48 }
 0x57e   : > { %3294 = vmatpush1.bf16.msra.mxu1 %v6177_v0 }
 0x57f   : > { %3295 = vmatprep.subr.bf16.mxu1 %v6182_v20 }
 0x582   : > { %3296 = vmatpush1.bf16.msra.mxu1 %v6180_v47 }
 0x583   : > { %2805 = vmatmul.mubr.bf16.vlgmr.msra.gmra.mrb[24].mxu0 %v2387_v55  ;;  %3297 = vmatprep.subr.bf16.mxu1 %v6185_v1 }
 0x584   : > { %2814 = vmatprep.mubr.bf16.mxu0 %v6900_v48  ;;  %3844 = vmatpush1.bf16.msra.mxu0 %v6216_v34 }
 0x585   : > { %3845 = vmatprep.subr.bf16.mxu0 %v6221_v59 }
 0x586   : > { %3298 = vmatpush1.bf16.msra.mxu1 %v6183_v6 }
 0x587   : > { %3299 = vmatprep.subr.bf16.mxu1 %v6188_v49 }
 0x588   : > { %3846 = vmatpush1.bf16.msra.mxu0 %v6219_v62 }
 0x589   : > { %3847 = vmatprep.subr.bf16.mxu0 %v6224_v40 }
 0x58a   : > { %3300 = vmatpush1.bf16.msra.mxu1 %v6186_v26 }
 0x58b   : > { %2815 = vmatmul.mubr.bf16.gmra.mrb[28].mxu0 %v2390_v61  ;;  %3301 = vmatprep.subr.bf16.mxu1 %v6191_v30 }
 0x58c   : > { %2824 = vmatprep.mubr.bf16.mxu0 %v6900_v48  ;;  %3848 = vmatpush1.bf16.msra.mxu0 %v6222_v38 }
 0x58d   : > { %3849 = vmatprep.subr.bf16.mxu0 %v6227_v3 }
 0x58e   : > { %3302 = vmatpush1.bf16.msra.mxu1 %v6189_v9 }
 0x58f   : > { %3344 = vmatprep.subr.bf16.mxu1 %v6194_v56 }
 0x590   : > { %3850 = vmatpush1.bf16.msra.mxu0 %v6225_v7 }
 0x591   : > { %3851 = vmatprep.subr.bf16.mxu0 %v6230_v11 }
 0x593   : > { %2825 = vmatmul.mubr.bf16.gmra.mrb[32].mxu0 %v2393_v53 }
 0x594   : > { %2834 = vmatprep.mubr.bf16.mxu0 %v6900_v48  ;;  %3852 = vmatpush1.bf16.msra.mxu0 %v6228_v45 }
 0x59b   : > { %2835 = vmatmul.mubr.bf16.gmra.mrb[36].mxu0 %v2396_v60 }
 0x656   : > { %v2806_v57 = vpop.f32.mrb[24].mxu0 }
 0x657   : > { %v5561_v14 = vadd.f32 %v2806_v57, %v2452_v36  ;;  %v2808_v16 = vpop.f32.mrb[25].mxu0 }
 0x658   : > { %v2810_v18 = vpop.f32.mrb[26].mxu0  ;;  %v5562_v26 = vadd.f32 %v2808_v16, %v7529_v2 }
 0x659   : > { %v5146_v23 = vmul.f32 -1.442695, %v5561_v14  ;;  %v5563_v19 = vadd.f32 %v2810_v18, %v2452_v36  ;;  %v2812_v22 = vpop.f32.mrb[27].mxu0 }
 0x65a   : > { %v5564_v58 = vadd.f32 %v2812_v22, %v7529_v2 }
 0x65b   : > { %6416 = vpow2.f32 %v5146_v23  ;;  %v5147_v4 = vmul.f32 -1.442695, %v5563_v19 }
 0x65d   : > { %6418 = vpow2.f32 %v5147_v4 }
 0x65e   : > { %v2816_v25 = vpop.f32.mrb[28].mxu0 }
 0x65f   : > { %v5565_v10 = vadd.f32 %v2816_v25, %v2452_v36  ;;  %v2818_v27 = vpop.f32.mrb[29].mxu0 }
 0x660   : > { %v2820_v28 = vpop.f32.mrb[30].mxu0  ;;  %v5566_v23 = vadd.f32 %v2818_v27, %v7529_v2 }
 0x661   : > { %v5148_v29 = vmul.f32 -1.442695, %v5565_v10  ;;  %v5567_v51 = vadd.f32 %v2820_v28, %v2452_v36  ;;  %v2822_v55 = vpop.f32.mrb[31].mxu0 }
 0x662   : > { %v5568_v4 = vadd.f32 %v2822_v55, %v7529_v2 }
 0x663   : > { %6420 = vpow2.f32 %v5148_v29  ;;  %v5149_v61 = vmul.f32 -1.442695, %v5567_v51 }
 0x665   : > { %v6417_v53 = vpop.eup %6416  ;;  %6422 = vpow2.f32 %v5149_v61 }
 0x666   : > { %v2869_v60 = vadd.f32 1.0, %v6417_v53  ;;  %v2826_v31 = vpop.f32.mrb[32].mxu0 }
 0x667   : > { %v6419_v33 = vpop.eup %6418  ;;  %v5569_v35 = vadd.f32 %v2826_v31, %v2452_v36  ;;  %v7524_v17 = vpop.f32.mrb[33].mxu0 }
 0x668   : > { %6424 = vrcp.f32 %v2869_v60  ;;  %v2870_v50 = vadd.f32 1.0, %v6419_v33  ;;  %v2830_v37 = vpop.f32.mrb[34].mxu0  ;;  %v5570_v55 = vadd.f32 %v7524_v17, %v7529_v2 }
 0x669   : > { %v5150_v21 = vmul.f32 -1.442695, %v5569_v35  ;;  %v5571_v39 = vadd.f32 %v2830_v37, %v2452_v36  ;;  %v7526_v5 = vpop.f32.mrb[35].mxu0 }
 0x66a   : > { %6426 = vrcp.f32 %v2870_v50 }
 0x66b   : > { %6428 = vpow2.f32 %v5150_v21  ;;  %v5151_v42 = vmul.f32 -1.442695, %v5571_v39 }
 0x66d   : > { %v6421_v43 = vpop.eup %6420  ;;  %6430 = vpow2.f32 %v5151_v42 }
 0x66e   : > { %v2871_v44 = vadd.f32 1.0, %v6421_v43  ;;  %v2836_v0 = vpop.f32.mrb[36].mxu0  ;;  %v6192_v43 = vld [vmem:[#allocation9 + $0x700] ss:$8 sps:$4 sm:$0xff]  }
 0x66f   : > { %v6423_v20 = vpop.eup %6422  ;;  %v5573_v47 = vadd.f32 %v2836_v0, %v2452_v36  ;;  %v7531_v1 = vpop.f32.mrb[37].mxu0 }
 0x670   : > { %6432 = vrcp.f32 %v2871_v44  ;;  %v2872_v6 = vadd.f32 1.0, %v6423_v20  ;;  %v2840_v49 = vpop.f32.mrb[38].mxu0  ;;  %v6197_v20 = vld [vmem:[#allocation9 + $0x714] ss:$8 sps:$4 sm:$0xff]  }
 0x671   : > { %v5152_v30 = vmul.f32 -1.442695, %v5573_v47  ;;  %v5575_v9 = vadd.f32 %v2840_v49, %v2452_v36  ;;  %v7534_v56 = vpop.f32.mrb[39].mxu0 }
 0x672   : > { %v6425_v34 = vpop.eup %6424  ;;  %6434 = vrcp.f32 %v2872_v6 }
 0x673   : > { %v2893_v59 = vmul.f32 %v6425_v34, %v5562_v26  ;;  %v2901_v62 = vsub.f32 1.0, %v6425_v34  ;;  %6436 = vpow2.f32 %v5152_v30  ;;  %v5153_v40 = vmul.f32 -1.442695, %v5575_v9  ;;  %v6195_v26 = vld [vmem:[#allocation9 + $0x710] ss:$8 sps:$4 sm:$0xff]  }
 0x674   : > { %v6427_v38 = vpop.eup %6426  ;;  %v6200_v30 = vld [vmem:[#allocation9 + $0x724] ss:$8 sps:$4 sm:$0xff]   ;;  %v5574_v34 = vadd.f32 %v7531_v1, %v7529_v2 }
 0x675   : > { %v6429_v3 = vpop.eup %6428  ;;  %v2909_v7 = vmul.f32 %v2901_v62, %v7473_v24  ;;  %v2894_v11 = vmul.f32 %v6427_v38, %v5564_v58  ;;  %v2902_v45 = vsub.f32 1.0, %v6427_v38  ;;  %6438 = vpow2.f32 %v5153_v40 }
 0x676   : > { %v2873_v13 = vadd.f32 1.0, %v6429_v3 }
 0x677   : > { %v6431_v57 = vpop.eup %6430  ;;  %v7538_v36 = vadd.f32 %v2909_v7, %v2893_v59  ;;  %v2910_v14 = vmul.f32 %v2902_v45, %v7477_v54  ;;  %v5576_v59 = vadd.f32 %v7534_v56, %v7529_v2 }
 0x678   : > { %6440 = vrcp.f32 %v2873_v13  ;;  %v2874_v16 = vadd.f32 1.0, %v6431_v57  ;;  %v6203_v57 = vld [vmem:[#allocation9 + $0x734] ss:$8 sps:$4 sm:$0xff]  }
 0x679   : > { %2925 = vst [vmem:[#allocation2 + $0x38] sm:$0xff] %v7538_v36  ;;  %v7542_v18 = vadd.f32 %v2910_v14, %v2894_v11  ;;  %v6198_v11 = vld [vmem:[#allocation9 + $0x720] ss:$8 sps:$4 sm:$0xff]  }
 0x67a   : > { %v6433_v19 = vpop.eup %6432  ;;  %6442 = vrcp.f32 %v2874_v16 }
 0x67b   : > { %2926 = vst [vmem:[#allocation2 + $0x40] sm:$0xff] %v7542_v18  ;;  %v2895_v24 = vmul.f32 %v6433_v19, %v5566_v23  ;;  %v2903_v22 = vsub.f32 1.0, %v6433_v19  ;;  %v6201_v23 = vld [vmem:[#allocation9 + $0x730] ss:$8 sps:$4 sm:$0xff]   ;;  %v6206_v19 = vld [vmem:[#allocation9 + $0x744] ss:$8 sps:$4 sm:$0xff]  }
 0x67c   : > { %v6435_v25 = vpop.eup %6434 }
 0x67d   : > { %v6437_v10 = vpop.eup %6436  ;;  %v2911_v54 = vmul.f32 %v2903_v22, %v7483_v15  ;;  %v2896_v28 = vmul.f32 %v6435_v25, %v5568_v4  ;;  %v2904_v29 = vsub.f32 1.0, %v6435_v25  ;;  %v5572_v15 = vadd.f32 %v7526_v5, %v7529_v2 }
 0x67e   : > { %v2875_v51 = vadd.f32 1.0, %v6437_v10 }
 0x67f   : > { %v6439_v61 = vpop.eup %6438  ;;  %v7548_v53 = vadd.f32 %v2911_v54, %v2895_v24  ;;  %v2912_v27 = vmul.f32 %v2904_v29, %v7487_v41  ;;  %v6204_v54 = vld [vmem:[#allocation9 + $0x740] ss:$8 sps:$4 sm:$0xff]   ;;  %v6207_v29 = vld [vmem:[#allocation9 + $0x750] ss:$8 sps:$4 sm:$0xff]  }
 0x680   : > { %6444 = vrcp.f32 %v2875_v51  ;;  %v2876_v60 = vadd.f32 1.0, %v6439_v61  ;;  %v2941_v33 = vld [vmem:[#allocation2 + $0x37] sm:$0xff] }
 0x681   : > { %2927 = vst [vmem:[#allocation2 + $0x48] sm:$0xff] %v7548_v53  ;;  %v7552_v31 = vadd.f32 %v2912_v27, %v2896_v28  ;;  %v2933_v37 = vld [vmem:[#allocation2 + $0x36] sm:$0xff]  ;;  %v6212_v51 = vld [vmem:[#allocation9 + $0x764] ss:$8 sps:$4 sm:$0xff]  }
 0x682   : > { %v6441_v35 = vpop.eup %6440  ;;  %6446 = vrcp.f32 %v2876_v60  ;;  %v2942_v50 = vld [vmem:[#allocation2 + $0x3f] sm:$0xff] }
 0x683   : > { %v2934_v21 = vld [vmem:[#allocation2 + $0x3e] sm:$0xff]  ;;  %2928 = vst [vmem:[#allocation2 + $0x50] sm:$0xff] %v7552_v31  ;;  %v2897_v41 = vmul.f32 %v6441_v35, %v5570_v55  ;;  %v2905_v39 = vsub.f32 1.0, %v6441_v35  ;;  %v2958_v42 = vpack.c.bf16 %v2942_v50, %v2941_v33  ;;  %v6215_v50 = vld [vmem:[#allocation9 + $0x774] ss:$8 sps:$4 sm:$0xff]  }
 0x684   : > { %v2957_v44 = vpack.c.bf16 %v2934_v21, %v2933_v37  ;;  %v6443_v0 = vpop.eup %6442  ;;  %v6210_v35 = vld [vmem:[#allocation9 + $0x760] ss:$8 sps:$4 sm:$0xff]   ;;  %v6213_v37 = vld [vmem:[#allocation9 + $0x770] ss:$8 sps:$4 sm:$0xff]   ;;  %v2959_v21 = vpack.c.bf16 %v7542_v18, %v7538_v36 }
 0x685   : > { %v2913_v17 = vmul.f32 %v2905_v39, %v7495_v46  ;;  %v2898_v47 = vmul.f32 %v6443_v0, %v5572_v15  ;;  %v2906_v6 = vsub.f32 1.0, %v6443_v0  ;;  %3303 = vmatprep.mubr.bf16.mxu1 %v2958_v42  ;;  %v6236_v0 = vld [vmem:[#allocation9 + $0x7e4] ss:$8 sps:$4 sm:$0xff]  }
 0x686   : > { %3304 = vmatmul.mubr.bf16.vlgmr.msra.gmra.mrb[32].mxu1 %v2957_v44  ;;  %v6231_v44 = vld [vmem:[#allocation9 + $0x7d0] ss:$8 sps:$4 sm:$0xff]  }
 0x687   : > { %v7560_v5 = vadd.f32 %v2913_v17, %v2897_v41  ;;  %v2914_v49 = vmul.f32 %v2906_v6, %v7499_v12  ;;  %3345 = vmatpush1.bf16.msra.mxu1 %v6192_v43  ;;  %v2962_v41 = vpack.c.bf16 %v7552_v31, %v7548_v53  ;;  %v6233_v43 = vld [vmem:[#allocation9 + $0x7d4] ss:$8 sps:$4 sm:$0xff]   ;;  %v6242_v6 = vld [vmem:[#allocation9 + $0x804] ss:$8 sps:$4 sm:$0xff]  }
 0x688   : > { %3346 = vmatprep.subr.bf16.mxu1 %v6197_v20  ;;  %v2943_v46 = vld [vmem:[#allocation2 + $0x47] sm:$0xff]  ;;  %3853 = vmatprep.subr.bf16.mxu0 %v6233_v43  ;;  %v6234_v20 = vld [vmem:[#allocation9 + $0x7e0] ss:$8 sps:$4 sm:$0xff]  }
 0x689   : > { %2929 = vst [vmem:[#allocation2 + $0x58] sm:$0xff] %v7560_v5  ;;  %v7564_v9 = vadd.f32 %v2914_v49, %v2898_v47  ;;  %v2935_v40 = vld [vmem:[#allocation2 + $0x46] sm:$0xff]  ;;  %3854 = vmatpush1.bf16.msra.mxu0 %v6231_v44  ;;  %v6239_v17 = vld [vmem:[#allocation9 + $0x7f4] ss:$8 sps:$4 sm:$0xff]   ;;  %v6240_v49 = vld [vmem:[#allocation9 + $0x800] ss:$8 sps:$4 sm:$0xff]  }
 0x68a   : > { %v6445_v58 = vpop.eup %6444  ;;  %v2944_v62 = vld [vmem:[#allocation2 + $0x4f] sm:$0xff]  ;;  %3855 = vmatprep.subr.bf16.mxu0 %v6236_v0 }
 0x68b   : > { %v2936_v38 = vld [vmem:[#allocation2 + $0x4e] sm:$0xff]  ;;  %2930 = vst [vmem:[#allocation2 + $0x60] sm:$0xff] %v7564_v9  ;;  %v2899_v12 = vmul.f32 %v6445_v58, %v5574_v34  ;;  %v2907_v3 = vsub.f32 1.0, %v6445_v58  ;;  %3347 = vmatpush1.bf16.msra.mxu1 %v6195_v26  ;;  %v2961_v7 = vpack.c.bf16 %v2944_v62, %v2943_v46  ;;  %v2965_v39 = vpack.c.bf16 %v7564_v9, %v7560_v5  ;;  %v6248_v34 = vld [vmem:[#allocation9 + $0x824] ss:$8 sps:$4 sm:$0xff]  }
 0x68c   : > { %v2960_v45 = vpack.c.bf16 %v2936_v38, %v2935_v40  ;;  %v6447_v13 = vpop.eup %6446  ;;  %3348 = vmatprep.subr.bf16.mxu1 %v6200_v30  ;;  %v6237_v47 = vld [vmem:[#allocation9 + $0x7f0] ss:$8 sps:$4 sm:$0xff]   ;;  %v6245_v26 = vld [vmem:[#allocation9 + $0x814] ss:$8 sps:$4 sm:$0xff]   ;;  %v6246_v46 = vld [vmem:[#allocation9 + $0x820] ss:$8 sps:$4 sm:$0xff]  }
 0x68d   : > { %v2915_v1 = vmul.f32 %v2907_v3, %v7506_v52  ;;  %v2900_v14 = vmul.f32 %v6447_v13, %v5576_v59  ;;  %v2908_v16 = vsub.f32 1.0, %v6447_v13  ;;  %3313 = vmatprep.mubr.bf16.mxu1 %v2961_v7  ;;  %3856 = vmatpush1.bf16.msra.mxu0 %v6234_v20  ;;  %v6243_v30 = vld [vmem:[#allocation9 + $0x810] ss:$8 sps:$4 sm:$0xff]   ;;  %v6251_v58 = vld [vmem:[#allocation9 + $0x834] ss:$8 sps:$4 sm:$0xff]  }
 0x68e   : > { %3314 = vmatmul.mubr.bf16.gmra.mrb[36].mxu1 %v2960_v45  ;;  %3857 = vmatprep.subr.bf16.mxu0 %v6239_v17  ;;  %v6249_v59 = vld [vmem:[#allocation9 + $0x830] ss:$8 sps:$4 sm:$0xff]   ;;  %v6254_v62 = vld [vmem:[#allocation9 + $0x844] ss:$8 sps:$4 sm:$0xff]   ;;  %v6252_v40 = vld [vmem:[#allocation9 + $0x840] ss:$8 sps:$4 sm:$0xff]  }
 0x68f   : > { %v7572_v2 = vadd.f32 %v2915_v1, %v2899_v12  ;;  %v2916_v56 = vmul.f32 %v2908_v16, %v7509_v8  ;;  %3349 = vmatpush1.bf16.msra.mxu1 %v6198_v11  ;;  %v6209_v8 = vld [vmem:[#allocation9 + $0x754] ss:$8 sps:$4 sm:$0xff]   ;;  %v6255_v12 = vld [vmem:[#allocation9 + $0x850] ss:$8 sps:$4 sm:$0xff]   ;;  %v6260_v3 = vld [vmem:[#allocation9 + $0x864] ss:$8 sps:$4 sm:$0xff]  }
 0x690   : > { %3350 = vmatprep.subr.bf16.mxu1 %v6203_v57  ;;  %v2945_v22 = vld [vmem:[#allocation2 + $0x57] sm:$0xff]  ;;  %v6261_v45 = vld [vmem:[#allocation9 + $0x870] ss:$8 sps:$4 sm:$0xff]   ;;  %v3019_v57 = vld [vmem:[#allocation11 + $0x8] sm:$0x3] }
 0x691   : > { %2931 = vst [vmem:[#allocation2 + $0x68] sm:$0xff] %v7572_v2  ;;  %v7576_v24 = vadd.f32 %v2916_v56, %v2900_v14  ;;  %v2937_v25 = vld [vmem:[#allocation2 + $0x56] sm:$0xff]  ;;  %3858 = vmatpush1.bf16.msra.mxu0 %v6237_v47  ;;  %v6266_v13 = vld [vmem:[#allocation9 + $0x884] ss:$8 sps:$4 sm:$0xff]   ;;  %v3024_v1 = vrot.slane %v3019_v57, %v7319_v32  ;;  %v7597_v44 = vrot.slane %v3019_v57, %v7324_v63 }
 0x692   : > { %v2946_v4 = vld [vmem:[#allocation2 + $0x5f] sm:$0xff]  ;;  %3859 = vmatprep.subr.bf16.mxu0 %v6242_v6  ;;  %v6257_v38 = vld [vmem:[#allocation9 + $0x854] ss:$8 sps:$4 sm:$0xff]  }
 0x693   : > { %v2938_v52 = vld [vmem:[#allocation2 + $0x5e] sm:$0xff]  ;;  %2932 = vst [vmem:[#allocation2 + $0x70] sm:$0xff] %v7576_v24  ;;  %3351 = vmatpush1.bf16.msra.mxu1 %v6201_v23  ;;  %v2964_v10 = vpack.c.bf16 %v2946_v4, %v2945_v22  ;;  %v2968_v42 = vpack.c.bf16 %v7576_v24, %v7572_v2  ;;  %v6263_v11 = vld [vmem:[#allocation9 + $0x874] ss:$8 sps:$4 sm:$0xff]  }
 0x694   : > { %v2963_v28 = vpack.c.bf16 %v2938_v52, %v2937_v25  ;;  %3352 = vmatprep.subr.bf16.mxu1 %v6206_v19  ;;  %v6258_v7 = vld [vmem:[#allocation9 + $0x860] ss:$8 sps:$4 sm:$0xff]  }
 0x695   : > { %3323 = vmatprep.mubr.bf16.mxu1 %v2964_v10  ;;  %3860 = vmatpush1.bf16.msra.mxu0 %v6240_v49 }
 0x696   : > { %3324 = vmatmul.mubr.bf16.gmra.mrb[40].mxu1 %v2963_v28  ;;  %3861 = vmatprep.subr.bf16.mxu0 %v6245_v26 }
 0x697   : > { %3353 = vmatpush1.bf16.msra.mxu1 %v6204_v54 }
 0x698   : > { %3354 = vmatprep.subr.bf16.mxu1 %v6209_v8  ;;  %v2947_v61 = vld [vmem:[#allocation2 + $0x67] sm:$0xff] }
 0x699   : > { %v2939_v60 = vld [vmem:[#allocation2 + $0x66] sm:$0xff]  ;;  %3862 = vmatpush1.bf16.msra.mxu0 %v6243_v30 }
 0x69a   : > { %v2948_v27 = vld [vmem:[#allocation2 + $0x6f] sm:$0xff]  ;;  %3863 = vmatprep.subr.bf16.mxu0 %v6248_v34 }
 0x69b   : > { %v2940_v55 = vld [vmem:[#allocation2 + $0x6e] sm:$0xff]  ;;  %3355 = vmatpush1.bf16.msra.mxu1 %v6207_v29  ;;  %v2967_v33 = vpack.c.bf16 %v2948_v27, %v2947_v61 }
 0x69c   : > { %v2966_v15 = vpack.c.bf16 %v2940_v55, %v2939_v60  ;;  %3356 = vmatprep.subr.bf16.mxu1 %v6212_v51 }
 0x69d   : > { %3333 = vmatprep.mubr.bf16.mxu1 %v2967_v33  ;;  %3864 = vmatpush1.bf16.msra.mxu0 %v6246_v46 }
 0x69e   : > { %3334 = vmatmul.mubr.bf16.gmra.mrb[44].mxu1 %v2966_v15  ;;  %3865 = vmatprep.subr.bf16.mxu0 %v6251_v58 }
 0x69f   : > { %3357 = vmatpush1.bf16.msra.mxu1 %v6210_v35  ;;  %3376 = vmatprep.mubr.bf16.mxu1 %v6900_v48 }
 0x6a0   : > { %3358 = vmatprep.subr.bf16.mxu1 %v6215_v50 }
 0x6a1   : > { %3866 = vmatpush1.bf16.msra.mxu0 %v6249_v59 }
 0x6a2   : > { %3867 = vmatprep.subr.bf16.mxu0 %v6254_v62 }
 0x6a3   : > { %3359 = vmatpush1.bf16.msra.mxu1 %v6213_v37 }
 0x6a5   : > { %3868 = vmatpush1.bf16.msra.mxu0 %v6252_v40 }
 0x6a6   : > { %3377 = vmatmul.mubr.bf16.vlgmr.msra.gmra.mrb[32].mxu1 %v2959_v21  ;;  %3869 = vmatprep.subr.bf16.mxu0 %v6257_v38 }
 0x6a7   : > { %3386 = vmatprep.mubr.bf16.mxu1 %v6900_v48 }
 0x6a9   : > { %3870 = vmatpush1.bf16.msra.mxu0 %v6255_v12 }
 0x6aa   : > { %3871 = vmatprep.subr.bf16.mxu0 %v6260_v3 }
 0x6ad   : > { %3872 = vmatpush1.bf16.msra.mxu0 %v6258_v7 }
 0x6ae   : > { %3387 = vmatmul.mubr.bf16.gmra.mrb[36].mxu1 %v2962_v41  ;;  %3873 = vmatprep.subr.bf16.mxu0 %v6263_v11 }
 0x6af   : > { %3396 = vmatprep.mubr.bf16.mxu1 %v6900_v48 }
 0x6b1   : > { %3874 = vmatpush1.bf16.msra.mxu0 %v6261_v45 }
 0x6b2   : > { %3916 = vmatprep.subr.bf16.mxu0 %v6266_v13 }
 0x6b6   : > { %3397 = vmatmul.mubr.bf16.gmra.mrb[40].mxu1 %v2965_v39 }
 0x6b7   : > { %3406 = vmatprep.mubr.bf16.mxu1 %v6900_v48 }
 0x6be   : > { %3407 = vmatmul.mubr.bf16.gmra.mrb[44].mxu1 %v2968_v42 }
 0x779   : > { %v3378_v14 = vpop.f32.mrb[32].mxu1 }
 0x77a   : > { %v5577_v16 = vadd.f32 %v3378_v14, %v3024_v1  ;;  %v3380_v56 = vpop.f32.mrb[33].mxu1 }
 0x77b   : > { %v3382_v23 = vpop.f32.mrb[34].mxu1  ;;  %v5578_v30 = vadd.f32 %v3380_v56, %v7597_v44 }
 0x77c   : > { %v5202_v19 = vmul.f32 -1.442695, %v5577_v16  ;;  %v5579_v22 = vadd.f32 %v3382_v23, %v3024_v1  ;;  %v3384_v4 = vpop.f32.mrb[35].mxu1 }
 0x77d   : > { %v5580_v62 = vadd.f32 %v3384_v4, %v7597_v44 }
 0x77e   : > { %6448 = vpow2.f32 %v5202_v19  ;;  %v5203_v25 = vmul.f32 -1.442695, %v5579_v22 }
 0x780   : > { %6450 = vpow2.f32 %v5203_v25 }
 0x781   : > { %v3388_v52 = vpop.f32.mrb[36].mxu1 }
 0x782   : > { %v5581_v10 = vadd.f32 %v3388_v52, %v3024_v1  ;;  %v3390_v54 = vpop.f32.mrb[37].mxu1 }
 0x783   : > { %v3392_v28 = vpop.f32.mrb[38].mxu1  ;;  %v5582_v19 = vadd.f32 %v3390_v54, %v7597_v44 }
 0x784   : > { %v5204_v8 = vmul.f32 -1.442695, %v5581_v10  ;;  %v5583_v29 = vadd.f32 %v3392_v28, %v3024_v1  ;;  %v3394_v51 = vpop.f32.mrb[39].mxu1 }
 0x785   : > { %v5584_v25 = vadd.f32 %v3394_v51, %v7597_v44 }
 0x786   : > { %6452 = vpow2.f32 %v5204_v8  ;;  %v5205_v61 = vmul.f32 -1.442695, %v5583_v29 }
 0x788   : > { %v6449_v27 = vpop.eup %6448  ;;  %6454 = vpow2.f32 %v5205_v61 }
 0x789   : > { %v3441_v60 = vadd.f32 1.0, %v6449_v27  ;;  %v3398_v55 = vpop.f32.mrb[40].mxu1 }
 0x78a   : > { %v6451_v33 = vpop.eup %6450  ;;  %v5585_v35 = vadd.f32 %v3398_v55, %v3024_v1  ;;  %v7592_v15 = vpop.f32.mrb[41].mxu1 }
 0x78b   : > { %6456 = vrcp.f32 %v3441_v60  ;;  %v3442_v50 = vadd.f32 1.0, %v6451_v33  ;;  %v3402_v37 = vpop.f32.mrb[42].mxu1  ;;  %v5586_v51 = vadd.f32 %v7592_v15, %v7597_v44 }
 0x78c   : > { %v5206_v21 = vmul.f32 -1.442695, %v5585_v35  ;;  %v5587_v41 = vadd.f32 %v3402_v37, %v3024_v1  ;;  %v7594_v39 = vpop.f32.mrb[43].mxu1 }
 0x78d   : > { %6458 = vrcp.f32 %v3442_v50 }
 0x78e   : > { %6460 = vpow2.f32 %v5206_v21  ;;  %v5207_v42 = vmul.f32 -1.442695, %v5587_v41 }
 0x790   : > { %v6453_v43 = vpop.eup %6452  ;;  %6462 = vpow2.f32 %v5207_v42 }
 0x791   : > { %v3443_v0 = vadd.f32 1.0, %v6453_v43  ;;  %v3408_v20 = vpop.f32.mrb[44].mxu1  ;;  %v6264_v43 = vld [vmem:[#allocation9 + $0x880] ss:$8 sps:$4 sm:$0xff]  }
 0x792   : > { %v6455_v17 = vpop.eup %6454  ;;  %v5589_v47 = vadd.f32 %v3408_v20, %v3024_v1  ;;  %v7599_v6 = vpop.f32.mrb[45].mxu1 }
 0x793   : > { %6464 = vrcp.f32 %v3443_v0  ;;  %v3444_v49 = vadd.f32 1.0, %v6455_v17  ;;  %v3412_v26 = vpop.f32.mrb[46].mxu1  ;;  %v6269_v17 = vld [vmem:[#allocation9 + $0x894] ss:$8 sps:$4 sm:$0xff]  }
 0x794   : > { %v5208_v34 = vmul.f32 -1.442695, %v5589_v47  ;;  %v5591_v46 = vadd.f32 %v3412_v26, %v3024_v1  ;;  %v7602_v58 = vpop.f32.mrb[47].mxu1 }
 0x795   : > { %v6457_v59 = vpop.eup %6456  ;;  %6466 = vrcp.f32 %v3444_v49 }
 0x796   : > { %v3465_v40 = vmul.f32 %v6457_v59, %v5578_v30  ;;  %v3473_v38 = vsub.f32 1.0, %v6457_v59  ;;  %6468 = vpow2.f32 %v5208_v34  ;;  %v5209_v12 = vmul.f32 -1.442695, %v5591_v46  ;;  %v6267_v30 = vld [vmem:[#allocation9 + $0x890] ss:$8 sps:$4 sm:$0xff]  }
 0x797   : > { %v6459_v3 = vpop.eup %6458  ;;  %v6272_v34 = vld [vmem:[#allocation9 + $0x8a4] ss:$8 sps:$4 sm:$0xff]   ;;  %v5590_v59 = vadd.f32 %v7599_v6, %v7597_v44 }
 0x798   : > { %v6461_v7 = vpop.eup %6460  ;;  %v3481_v11 = vmul.f32 %v3473_v38, %v7538_v36  ;;  %v3466_v45 = vmul.f32 %v6459_v3, %v5580_v62  ;;  %v3474_v13 = vsub.f32 1.0, %v6459_v3  ;;  %6470 = vpow2.f32 %v5209_v12 }
 0x799   : > { %v3445_v57 = vadd.f32 1.0, %v6461_v7 }
 0x79a   : > { %v6463_v14 = vpop.eup %6462  ;;  %v7606_v1 = vadd.f32 %v3481_v11, %v3465_v40  ;;  %v3482_v16 = vmul.f32 %v3474_v13, %v7542_v18  ;;  %v5592_v40 = vadd.f32 %v7602_v58, %v7597_v44 }
 0x79b   : > { %6472 = vrcp.f32 %v3445_v57  ;;  %v3446_v56 = vadd.f32 1.0, %v6463_v14  ;;  %v6275_v14 = vld [vmem:[#allocation9 + $0x8b4] ss:$8 sps:$4 sm:$0xff]  }
 0x79c   : > { %3497 = vst [vmem:[#allocation2 + $0x38] sm:$0xff] %v7606_v1  ;;  %v7610_v23 = vadd.f32 %v3482_v16, %v3466_v45  ;;  %v6270_v45 = vld [vmem:[#allocation9 + $0x8a0] ss:$8 sps:$4 sm:$0xff]  }
 0x79d   : > { %v6465_v22 = vpop.eup %6464  ;;  %6474 = vrcp.f32 %v3446_v56 }
 0x79e   : > { %3498 = vst [vmem:[#allocation2 + $0x40] sm:$0xff] %v7610_v23  ;;  %v3467_v36 = vmul.f32 %v6465_v22, %v5582_v19  ;;  %v3475_v4 = vsub.f32 1.0, %v6465_v22  ;;  %v6273_v19 = vld [vmem:[#allocation9 + $0x8b0] ss:$8 sps:$4 sm:$0xff]   ;;  %v6278_v22 = vld [vmem:[#allocation9 + $0x8c4] ss:$8 sps:$4 sm:$0xff]  }
 0x79f   : > { %v6467_v52 = vpop.eup %6466 }
 0x7a0   : > { %v6469_v10 = vpop.eup %6468  ;;  %v3483_v18 = vmul.f32 %v3475_v4, %v7548_v53  ;;  %v3468_v28 = vmul.f32 %v6467_v52, %v5584_v25  ;;  %v3476_v8 = vsub.f32 1.0, %v6467_v52  ;;  %v5588_v53 = vadd.f32 %v7594_v39, %v7597_v44 }
 0x7a1   : > { %v3447_v29 = vadd.f32 1.0, %v6469_v10 }
 0x7a2   : > { %v6471_v61 = vpop.eup %6470  ;;  %v7616_v27 = vadd.f32 %v3483_v18, %v3467_v36  ;;  %v3484_v54 = vmul.f32 %v3476_v8, %v7552_v31  ;;  %v6276_v18 = vld [vmem:[#allocation9 + $0x8c0] ss:$8 sps:$4 sm:$0xff]   ;;  %v6279_v8 = vld [vmem:[#allocation9 + $0x8d0] ss:$8 sps:$4 sm:$0xff]  }
 0x7a3   : > { %6476 = vrcp.f32 %v3447_v29  ;;  %v3448_v60 = vadd.f32 1.0, %v6471_v61  ;;  %v3513_v33 = vld [vmem:[#allocation2 + $0x37] sm:$0xff] }
 0x7a4   : > { %3499 = vst [vmem:[#allocation2 + $0x48] sm:$0xff] %v7616_v27  ;;  %v7620_v55 = vadd.f32 %v3484_v54, %v3468_v28  ;;  %v3505_v37 = vld [vmem:[#allocation2 + $0x36] sm:$0xff]  ;;  %v6284_v29 = vld [vmem:[#allocation9 + $0x8e4] ss:$8 sps:$4 sm:$0xff]  }
 0x7a5   : > { %v6473_v35 = vpop.eup %6472  ;;  %6478 = vrcp.f32 %v3448_v60  ;;  %v3514_v50 = vld [vmem:[#allocation2 + $0x3f] sm:$0xff] }
 0x7a6   : > { %v3506_v21 = vld [vmem:[#allocation2 + $0x3e] sm:$0xff]  ;;  %3500 = vst [vmem:[#allocation2 + $0x50] sm:$0xff] %v7620_v55  ;;  %v3469_v31 = vmul.f32 %v6473_v35, %v5586_v51  ;;  %v3477_v41 = vsub.f32 1.0, %v6473_v35  ;;  %v3530_v42 = vpack.c.bf16 %v3514_v50, %v3513_v33  ;;  %v6287_v50 = vld [vmem:[#allocation9 + $0x8f4] ss:$8 sps:$4 sm:$0xff]  }
 0x7a7   : > { %v3529_v0 = vpack.c.bf16 %v3506_v21, %v3505_v37  ;;  %v6475_v20 = vpop.eup %6474  ;;  %v6282_v35 = vld [vmem:[#allocation9 + $0x8e0] ss:$8 sps:$4 sm:$0xff]   ;;  %v6285_v37 = vld [vmem:[#allocation9 + $0x8f0] ss:$8 sps:$4 sm:$0xff]   ;;  %v3531_v21 = vpack.c.bf16 %v7610_v23, %v7606_v1 }
 0x7a8   : > { %v3485_v15 = vmul.f32 %v3477_v41, %v7560_v5  ;;  %v3470_v47 = vmul.f32 %v6475_v20, %v5588_v53  ;;  %v3478_v49 = vsub.f32 1.0, %v6475_v20  ;;  %3875 = vmatprep.mubr.bf16.mxu0 %v3530_v42  ;;  %v6290_v20 = vld [vmem:[#allocation12 + $0x10] sm:$0xff]  }
 0x7a9   : > { %3876 = vmatmul.mubr.bf16.vlgmr.msra.gmra.mrb[40].mxu0 %v3529_v0  ;;  %v6289_v0 = vld [vmem:[#allocation12 + $0x8] sm:$0xff]  }
 0x7aa   : > { %v7628_v39 = vadd.f32 %v3485_v15, %v3469_v31  ;;  %v3486_v26 = vmul.f32 %v3478_v49, %v7564_v9  ;;  %3917 = vmatpush1.bf16.msra.mxu0 %v6264_v43  ;;  %v3534_v31 = vpack.c.bf16 %v7620_v55, %v7616_v27  ;;  %v6288_v43 = vld [vmem:[#allocation12] sm:$0xff]   ;;  %v6295_v49 = vld [vmem:[#allocation12 + $0x38] sm:$0xff]  }
 0x7ab   : > { %3918 = vmatprep.subr.bf16.mxu0 %v6269_v17  ;;  %v3515_v5 = vld [vmem:[#allocation2 + $0x47] sm:$0xff]  ;;  %5401 = vmatprep.subr.bf16.mxu1 %v6288_v43  ;;  %v6291_v17 = vld [vmem:[#allocation12 + $0x18] sm:$0xff]  }
 0x7ac   : > { %3501 = vst [vmem:[#allocation2 + $0x58] sm:$0xff] %v7628_v39  ;;  %v7632_v46 = vadd.f32 %v3486_v26, %v3470_v47  ;;  %v3507_v12 = vld [vmem:[#allocation2 + $0x46] sm:$0xff]  ;;  %5402 = vmatpush3.bf16.msra.mxu1 %v6288_v43  ;;  %v6294_v47 = vld [vmem:[#allocation12 + $0x30] sm:$0xff]  }
 0x7ad   : > { %v6477_v62 = vpop.eup %6476  ;;  %v3516_v38 = vld [vmem:[#allocation2 + $0x4f] sm:$0xff]  ;;  %5403 = vmatprep.subr.bf16.mxu1 %v6289_v0  ;;  %v6292_v15 = vld [vmem:[#allocation12 + $0x20] sm:$0xff]  }
 0x7ae   : > { %v3508_v3 = vld [vmem:[#allocation2 + $0x4e] sm:$0xff]  ;;  %3502 = vst [vmem:[#allocation2 + $0x60] sm:$0xff] %v7632_v46  ;;  %v3471_v9 = vmul.f32 %v6477_v62, %v5590_v59  ;;  %v3479_v7 = vsub.f32 1.0, %v6477_v62  ;;  %3919 = vmatpush1.bf16.msra.mxu0 %v6267_v30  ;;  %v3533_v11 = vpack.c.bf16 %v3516_v38, %v3515_v5  ;;  %v3537_v41 = vpack.c.bf16 %v7632_v46, %v7628_v39  ;;  %v6296_v26 = vld [vmem:[#allocation12 + $0x40] sm:$0xff]   ;;  %v6299_v59 = vld [vmem:[#allocation12 + $0x58] sm:$0xff]  }
 0x7af   : > { %v3532_v13 = vpack.c.bf16 %v3508_v3, %v3507_v12  ;;  %v6479_v57 = vpop.eup %6478  ;;  %3920 = vmatprep.subr.bf16.mxu0 %v6272_v34  ;;  %v6297_v30 = vld [vmem:[#allocation12 + $0x48] sm:$0xff]   ;;  %v6298_v34 = vld [vmem:[#allocation12 + $0x50] sm:$0xff]   ;;  %v6300_v5 = vld [vmem:[#allocation12 + $0x60] sm:$0xff]  }
 0x7b0   : > { %v3487_v6 = vmul.f32 %v3479_v7, %v7572_v2  ;;  %v3472_v16 = vmul.f32 %v6479_v57, %v5592_v40  ;;  %v3480_v56 = vsub.f32 1.0, %v6479_v57  ;;  %3885 = vmatprep.mubr.bf16.mxu0 %v3533_v11  ;;  %5404 = vmatpush3.bf16.msra.mxu1 %v6289_v0  ;;  %v6301_v62 = vld [vmem:[#allocation12 + $0x68] sm:$0xff]   ;;  %v3591_v40 = vld [vmem:[#allocation11 + $0xa] sm:$0x3] }
 0x7b1   : > { %3886 = vmatmul.mubr.bf16.gmra.mrb[44].mxu0 %v3532_v13  ;;  %5405 = vmatprep.subr.bf16.mxu1 %v6290_v20  ;;  %v3596_v38 = vrot.slane %v3591_v40, %v7319_v32 }
 0x7b2   : > { %v7640_v44 = vadd.f32 %v3487_v6, %v3471_v9  ;;  %v3488_v58 = vmul.f32 %v3480_v56, %v7576_v24  ;;  %3921 = vmatpush1.bf16.msra.mxu0 %v6270_v45  ;;  %v6281_v24 = vld [vmem:[#allocation9 + $0x8d4] ss:$8 sps:$4 sm:$0xff]  }
 0x7b3   : > { %3922 = vmatprep.subr.bf16.mxu0 %v6275_v14  ;;  %v3517_v4 = vld [vmem:[#allocation2 + $0x57] sm:$0xff] }
 0x7b4   : > { %3503 = vst [vmem:[#allocation2 + $0x68] sm:$0xff] %v7640_v44  ;;  %v7644_v36 = vadd.f32 %v3488_v58, %v3472_v16  ;;  %v3509_v52 = vld [vmem:[#allocation2 + $0x56] sm:$0xff]  ;;  %5406 = vmatpush3.bf16.msra.mxu1 %v6290_v20 }
 0x7b5   : > { %v3518_v25 = vld [vmem:[#allocation2 + $0x5f] sm:$0xff]  ;;  %5407 = vmatprep.subr.bf16.mxu1 %v6291_v17 }
 0x7b6   : > { %v3510_v2 = vld [vmem:[#allocation2 + $0x5e] sm:$0xff]  ;;  %3504 = vst [vmem:[#allocation2 + $0x70] sm:$0xff] %v7644_v36  ;;  %3923 = vmatpush1.bf16.msra.mxu0 %v6273_v19  ;;  %v3536_v10 = vpack.c.bf16 %v3518_v25, %v3517_v4  ;;  %v3540_v42 = vpack.c.bf16 %v7644_v36, %v7640_v44 }
 0x7b7   : > { %v3535_v28 = vpack.c.bf16 %v3510_v2, %v3509_v52  ;;  %3924 = vmatprep.subr.bf16.mxu0 %v6278_v22 }
 0x7b8   : > { %3895 = vmatprep.mubr.bf16.mxu0 %v3536_v10  ;;  %5408 = vmatpush3.bf16.msra.mxu1 %v6291_v17 }
 0x7b9   : > { %3896 = vmatmul.mubr.bf16.gmra.mrb[48].mxu0 %v3535_v28  ;;  %5409 = vmatprep.subr.bf16.mxu1 %v6292_v15 }
 0x7ba   : > { %3925 = vmatpush1.bf16.msra.mxu0 %v6276_v18 }
 0x7bb   : > { %3926 = vmatprep.subr.bf16.mxu0 %v6281_v24  ;;  %v3519_v61 = vld [vmem:[#allocation2 + $0x67] sm:$0xff] }
 0x7bc   : > { %v3511_v60 = vld [vmem:[#allocation2 + $0x66] sm:$0xff]  ;;  %5410 = vmatpush3.bf16.msra.mxu1 %v6292_v15 }
 0x7bd   : > { %v3520_v54 = vld [vmem:[#allocation2 + $0x6f] sm:$0xff] }
 0x7be   : > { %v3512_v51 = vld [vmem:[#allocation2 + $0x6e] sm:$0xff]  ;;  %3927 = vmatpush1.bf16.msra.mxu0 %v6279_v8  ;;  %v3539_v33 = vpack.c.bf16 %v3520_v54, %v3519_v61 }
 0x7bf   : > { %v3538_v53 = vpack.c.bf16 %v3512_v51, %v3511_v60  ;;  %3928 = vmatprep.subr.bf16.mxu0 %v6284_v29  ;;  %v7665_v51 = vrot.slane %v3591_v40, %v7324_v63 }
 0x7c0   : > { %3905 = vmatprep.mubr.bf16.mxu0 %v3539_v33 }
 0x7c1   : > { %3906 = vmatmul.mubr.bf16.gmra.mrb[52].mxu0 %v3538_v53 }
 0x7c2   : > { %3929 = vmatpush1.bf16.msra.mxu0 %v6282_v35  ;;  %3948 = vmatprep.mubr.bf16.mxu0 %v6900_v48 }
 0x7c3   : > { %3930 = vmatprep.subr.bf16.mxu0 %v6287_v50 }
 0x7c6   : > { %3931 = vmatpush1.bf16.msra.mxu0 %v6285_v37 }
 0x7c7   : > { %5425 = vmatprep.subr.bf16.mxu0 %v6296_v26 }
 0x7c9   : > { %3949 = vmatmul.mubr.bf16.vlgmr.msra.gmra.mrb[40].mxu0 %v3531_v21 }
 0x7ca   : > { %3958 = vmatprep.mubr.bf16.mxu0 %v6900_v48  ;;  %5426 = vmatpush3.bf16.msra.mxu0 %v6296_v26 }
 0x7cb   : > { %5427 = vmatprep.subr.bf16.mxu0 %v6297_v30 }
 0x7ce   : > { %5428 = vmatpush3.bf16.msra.mxu0 %v6297_v30 }
 0x7cf   : > { %5429 = vmatprep.subr.bf16.mxu0 %v6298_v34 }
 0x7d1   : > { %3959 = vmatmul.mubr.bf16.gmra.mrb[44].mxu0 %v3534_v31 }
 0x7d2   : > { %3968 = vmatprep.mubr.bf16.mxu0 %v6900_v48  ;;  %5430 = vmatpush3.bf16.msra.mxu0 %v6298_v34 }
 0x7d3   : > { %5431 = vmatprep.subr.bf16.mxu0 %v6299_v59 }
 0x7d6   : > { %5432 = vmatpush3.bf16.msra.mxu0 %v6299_v59 }
 0x7d7   : > { %5433 = vmatprep.subr.bf16.mxu0 %v6300_v5 }
 0x7d9   : > { %3969 = vmatmul.mubr.bf16.gmra.mrb[48].mxu0 %v3537_v41 }
 0x7da   : > { %3978 = vmatprep.mubr.bf16.mxu0 %v6900_v48  ;;  %v6293_v48 = vld [vmem:[#allocation12 + $0x28] sm:$0xff]   ;;  %5434 = vmatpush3.bf16.msra.mxu0 %v6300_v5 }
 0x7db   : > { %5411 = vmatprep.subr.bf16.mxu1 %v6293_v48  ;;  %5435 = vmatprep.subr.bf16.mxu0 %v6301_v62 }
 0x7dc   : > { %5412 = vmatpush3.bf16.msra.mxu1 %v6293_v48 }
 0x7dd   : > { %5413 = vmatprep.subr.bf16.mxu1 %v6294_v47 }
 0x7de   : > { %5436 = vmatpush3.bf16.msra.mxu0 %v6301_v62 }
 0x7e0   : > { %5414 = vmatpush3.bf16.msra.mxu1 %v6294_v47 }
 0x7e1   : > { %3979 = vmatmul.mubr.bf16.gmra.mrb[52].mxu0 %v3540_v42  ;;  %5415 = vmatprep.subr.bf16.mxu1 %v6295_v49 }
 0x7e4   : > { %5416 = vmatpush3.bf16.msra.mxu1 %v6295_v49 }
 0x89c   : > { %v3950_v12 = vpop.f32.mrb[40].mxu0 }
 0x89d   : > { %v5593_v3 = vadd.f32 %v3950_v12, %v3596_v38  ;;  %v3952_v9 = vpop.f32.mrb[41].mxu0 }
 0x89e   : > { %v3954_v7 = vpop.f32.mrb[42].mxu0  ;;  %v5594_v41 = vadd.f32 %v3952_v9, %v7665_v51 }
 0x89f   : > { %v5258_v11 = vmul.f32 -1.442695, %v5593_v3  ;;  %v5595_v45 = vadd.f32 %v3954_v7, %v3596_v38  ;;  %v3956_v13 = vpop.f32.mrb[43].mxu0 }
 0x8a0   : > { %v5596_v63 = vadd.f32 %v3956_v13, %v7665_v51 }
 0x8a1   : > { %6480 = vpow2.f32 %v5258_v11  ;;  %v5259_v57 = vmul.f32 -1.442695, %v5595_v45 }
 0x8a3   : > { %6482 = vpow2.f32 %v5259_v57 }
 0x8a4   : > { %v3960_v14 = vpop.f32.mrb[44].mxu0 }
 0x8a5   : > { %v5597_v6 = vadd.f32 %v3960_v14, %v3596_v38  ;;  %v3962_v16 = vpop.f32.mrb[45].mxu0 }
 0x8a6   : > { %v3964_v56 = vpop.f32.mrb[46].mxu0  ;;  %v5598_v3 = vadd.f32 %v3962_v16, %v7665_v51 }
 0x8a7   : > { %v5260_v58 = vmul.f32 -1.442695, %v5597_v6  ;;  %v5599_v19 = vadd.f32 %v3964_v56, %v3596_v38  ;;  %v3966_v22 = vpop.f32.mrb[47].mxu0 }
 0x8a9   : > { %6484 = vpow2.f32 %v5260_v58  ;;  %v5261_v4 = vmul.f32 -1.442695, %v5599_v19 }
 0x8ab   : > { %v6481_v32 = vpop.eup %6480  ;;  %6486 = vpow2.f32 %v5261_v4 }
 0x8ac   : > { %v4013_v25 = vadd.f32 1.0, %v6481_v32  ;;  %v3970_v52 = vpop.f32.mrb[48].mxu0 }
 0x8ad   : > { %v6483_v2 = vpop.eup %6482  ;;  %v5601_v10 = vadd.f32 %v3970_v52, %v3596_v38  ;;  %v7660_v18 = vpop.f32.mrb[49].mxu0 }
 0x8ae   : > { %6488 = vrcp.f32 %v4013_v25  ;;  %v4014_v28 = vadd.f32 1.0, %v6483_v2  ;;  %v3974_v24 = vpop.f32.mrb[50].mxu0 }
 0x8af   : > { %v5262_v8 = vmul.f32 -1.442695, %v5601_v10  ;;  %v5603_v29 = vadd.f32 %v3974_v24, %v3596_v38  ;;  %v7662_v61 = vpop.f32.mrb[51].mxu0 }
 0x8b0   : > { %6490 = vrcp.f32 %v4014_v28  ;;  %v5604_v2 = vadd.f32 %v7662_v61, %v7665_v51 }
 0x8b1   : > { %6492 = vpow2.f32 %v5262_v8  ;;  %v5263_v54 = vmul.f32 -1.442695, %v5603_v29 }
 0x8b3   : > { %v6485_v60 = vpop.eup %6484  ;;  %6494 = vpow2.f32 %v5263_v54 }
 0x8b4   : > { %v4015_v33 = vadd.f32 1.0, %v6485_v60  ;;  %v3980_v35 = vpop.f32.mrb[52].mxu0 }
 0x8b5   : > { %v6487_v53 = vpop.eup %6486  ;;  %v5605_v50 = vadd.f32 %v3980_v35, %v3596_v38  ;;  %v7667_v37 = vpop.f32.mrb[53].mxu0 }
 0x8b6   : > { %6496 = vrcp.f32 %v4015_v33  ;;  %v4016_v21 = vadd.f32 1.0, %v6487_v53  ;;  %v3984_v31 = vpop.f32.mrb[54].mxu0  ;;  %v5606_v60 = vadd.f32 %v7667_v37, %v7665_v51 }
 0x8b7   : > { %v5264_v42 = vmul.f32 -1.442695, %v5605_v50  ;;  %v5607_v43 = vadd.f32 %v3984_v31, %v3596_v38  ;;  %v7670_v0 = vpop.f32.mrb[55].mxu0 }
 0x8b8   : > { %v6489_v20 = vpop.eup %6488  ;;  %6498 = vrcp.f32 %v4016_v21  ;;  %v5608_v61 = vadd.f32 %v7670_v0, %v7665_v51  ;;  %v6305_v0 = vld [vmem:[#allocation12 + $0x88] sm:$0xff]  }
 0x8b9   : > { %v4037_v17 = vmul.f32 %v6489_v20, %v5594_v41  ;;  %v4045_v15 = vsub.f32 1.0, %v6489_v20  ;;  %6500 = vpow2.f32 %v5264_v42  ;;  %v5265_v48 = vmul.f32 -1.442695, %v5607_v43  ;;  %v6302_v20 = vld [vmem:[#allocation12 + $0x70] sm:$0xff]  }
 0x8ba   : > { %v6491_v47 = vpop.eup %6490  ;;  %5437 = vmatprep.subr.bf16.mxu0 %v6302_v20 }
 0x8bb   : > { %v6493_v49 = vpop.eup %6492  ;;  %v4053_v26 = vmul.f32 %v4045_v15, %v7606_v1  ;;  %v4038_v30 = vmul.f32 %v6491_v47, %v5596_v63  ;;  %v4046_v34 = vsub.f32 1.0, %v6491_v47  ;;  %6502 = vpow2.f32 %v5265_v48  ;;  %5438 = vmatpush3.bf16.msra.mxu0 %v6302_v20  ;;  %v6303_v63 = vld [vmem:[#allocation12 + $0x78] sm:$0xff]   ;;  %v6309_v15 = vld [vmem:[#allocation12 + $0xa8] sm:$0xff]   ;;  %v5266_v48 = vld [vmem:[#allocation14] ss:$0 sm:$0xff] }
 0x8bc   : > { %v4017_v59 = vadd.f32 1.0, %v6493_v49  ;;  %v5600_v1 = vadd.f32 %v3966_v22, %v7665_v51  ;;  %v5602_v22 = vadd.f32 %v7660_v18, %v7665_v51  ;;  %5439 = vmatprep.subr.bf16.mxu0 %v6303_v63  ;;  %v6304_v51 = vld [vmem:[#allocation12 + $0x80] sm:$0xff]  }
 0x8bd   : > { %v6495_v5 = vpop.eup %6494  ;;  %v4061_v62 = vadd.f32 %v4053_v26, %v4037_v17  ;;  %v4054_v40 = vmul.f32 %v4046_v34, %v7610_v23  ;;  %5449 = vmatprep.subr.bf16.mxu1 %v6304_v51  ;;  %v6308_v17 = vld [vmem:[#allocation12 + $0xa0] sm:$0xff]  }
 0x8be   : > { %6504 = vrcp.f32 %v4017_v59  ;;  %v4018_v38 = vadd.f32 1.0, %v6495_v5 }
 0x8bf   : > { %4069 = vst [vmem:[#allocation2 + $0x38] sm:$0xff] %v4061_v62  ;;  %v4062_v12 = vadd.f32 %v4054_v40, %v4038_v30  ;;  %5440 = vmatpush3.bf16.msra.mxu0 %v6303_v63 }
 0x8c0   : > { %v6497_v9 = vpop.eup %6496  ;;  %6506 = vrcp.f32 %v4018_v38 }
 0x8c1   : > { %4070 = vst [vmem:[#allocation2 + $0x40] sm:$0xff] %v4062_v12  ;;  %v4039_v7 = vmul.f32 %v6497_v9, %v5598_v3  ;;  %v4047_v11 = vsub.f32 1.0, %v6497_v9  ;;  %v4085_v45 = vpack.c.bf16 %v4062_v12, %v4061_v62 }
 0x8c2   : > { %v6499_v13 = vpop.eup %6498 }
 0x8c3   : > { %v6501_v57 = vpop.eup %6500  ;;  %v4055_v14 = vmul.f32 %v4047_v11, %v7616_v27  ;;  %v4040_v6 = vmul.f32 %v6499_v13, %v5600_v1  ;;  %v4048_v23 = vsub.f32 1.0, %v6499_v13  ;;  %5417 = vmatprep.mubr.bf16.mxu1 %v4085_v45 }
 0x8c4   : > { %v4019_v56 = vadd.f32 1.0, %v6501_v57 }
 0x8c5   : > { %v6503_v58 = vpop.eup %6502  ;;  %v4063_v19 = vadd.f32 %v4055_v14, %v4039_v7  ;;  %v4056_v16 = vmul.f32 %v4048_v23, %v7620_v55 }
 0x8c6   : > { %6508 = vrcp.f32 %v4019_v56  ;;  %v4020_v4 = vadd.f32 1.0, %v6503_v58 }
 0x8c7   : > { %4071 = vst [vmem:[#allocation2 + $0x48] sm:$0xff] %v4063_v19  ;;  %v4064_v32 = vadd.f32 %v4056_v16, %v4040_v6 }
 0x8c8   : > { %v6505_v25 = vpop.eup %6504  ;;  %6510 = vrcp.f32 %v4020_v4 }
 0x8c9   : > { %4072 = vst [vmem:[#allocation2 + $0x50] sm:$0xff] %v4064_v32  ;;  %v4041_v52 = vmul.f32 %v6505_v25, %v5602_v22  ;;  %v4049_v27 = vsub.f32 1.0, %v6505_v25  ;;  %v4086_v10 = vpack.c.bf16 %v4064_v32, %v4063_v19  ;;  %v6310_v22 = vld [vmem:[#allocation12 + $0xb0] sm:$0xff]   ;;  %v6311_v25 = vld [vmem:[#allocation12 + $0xb8] sm:$0xff]  }
 0x8ca   : > { %v6507_v28 = vpop.eup %6506 }
 0x8cb   : > { %v4057_v24 = vmul.f32 %v4049_v27, %v7628_v39  ;;  %v4042_v55 = vmul.f32 %v6507_v28, %v5604_v2  ;;  %v4050_v8 = vsub.f32 1.0, %v6507_v28  ;;  %5418 = vmatmul.mubr.bf16.vlgmr.msra.gmra.mrb[48].mxu1 %v4086_v10  ;;  %v6313_v27 = vld [vmem:[#allocation15 + $0x8] sm:$0xff]   ;;  %v6314_v2 = vld [vmem:[#allocation15 + $0x10] sm:$0xff]   ;;  %v6315_v10 = vld [vmem:[#allocation15 + $0x18] sm:$0xff]  }
 0x8cc   : > { %5450 = vmatpush3.bf16.msra.mxu1 %v6304_v51  ;;  %v6316_v28 = vld [vmem:[#allocation15 + $0x20] sm:$0xff]  }
 0x8cd   : > { %v4065_v29 = vadd.f32 %v4057_v24, %v4041_v52  ;;  %v4058_v54 = vmul.f32 %v4050_v8, %v7632_v46  ;;  %5451 = vmatprep.subr.bf16.mxu1 %v6305_v0  ;;  %v6312_v52 = vld [vmem:[#allocation15] sm:$0xff]   ;;  %v6317_v24 = vld [vmem:[#allocation15 + $0x28] sm:$0xff]  }
 0x8ce   : > { %5473 = vmatprep.subr.bf16.mxu0 %v6312_v52 }
 0x8cf   : > { %4073 = vst [vmem:[#allocation2 + $0x58] sm:$0xff] %v4065_v29  ;;  %v4066_v18 = vadd.f32 %v4058_v54, %v4042_v55  ;;  %v5275_v55 = vld [vmem:[#allocation14 + $0x1] ss:$0 sm:$0xff] }
 0x8d0   : > { %v6509_v33 = vpop.eup %6508  ;;  %5452 = vmatpush3.bf16.msra.mxu1 %v6305_v0 }
 0x8d1   : > { %4074 = vst [vmem:[#allocation2 + $0x60] sm:$0xff] %v4066_v18  ;;  %v4043_v35 = vmul.f32 %v6509_v33, %v5606_v60  ;;  %v4051_v53 = vsub.f32 1.0, %v6509_v33  ;;  %v4087_v50 = vpack.c.bf16 %v4066_v18, %v4065_v29 }
 0x8d2   : > { %v6511_v39 = vpop.eup %6510 }
 0x8d3   : > { %v4059_v21 = vmul.f32 %v4051_v53, %v7640_v44  ;;  %v4044_v31 = vmul.f32 %v6511_v39, %v5608_v61  ;;  %v4052_v41 = vsub.f32 1.0, %v6511_v39  ;;  %5421 = vmatprep.mubr.bf16.mxu1 %v4087_v50  ;;  %v6306_v44 = vld [vmem:[#allocation12 + $0x90] sm:$0xff]  }
 0x8d4   : > { %5453 = vmatprep.subr.bf16.mxu1 %v6306_v44 }
 0x8d5   : > { %v4067_v46 = vadd.f32 %v4059_v21, %v4043_v35  ;;  %v4060_v42 = vmul.f32 %v4052_v41, %v7644_v36  ;;  %v6307_v36 = vld [vmem:[#allocation12 + $0x98] sm:$0xff]   ;;  %5454 = vmatpush3.bf16.msra.mxu1 %v6306_v44 }
 0x8d6   : > { %5455 = vmatprep.subr.bf16.mxu1 %v6307_v36 }
 0x8d7   : > { %4075 = vst [vmem:[#allocation2 + $0x68] sm:$0xff] %v4067_v46  ;;  %v4068_v43 = vadd.f32 %v4060_v42, %v4044_v31 }
 0x8d9   : > { %4076 = vst [vmem:[#allocation2 + $0x70] sm:$0xff] %v4068_v43  ;;  %v4088_v37 = vpack.c.bf16 %v4068_v43, %v4067_v46  ;;  %5456 = vmatpush3.bf16.msra.mxu1 %v6307_v36 }
 0x8da   : > { %5457 = vmatprep.subr.bf16.mxu1 %v6308_v17 }
 0x8db   : > { %5422 = vmatmul.mubr.bf16.gmra.mrb[52].mxu1 %v4088_v37 }
 0x8dd   : > { %5458 = vmatpush3.bf16.msra.mxu1 %v6308_v17 }
 0x8de   : > { %5459 = vmatprep.subr.bf16.mxu1 %v6309_v15 }
 0x8e1   : > { %5460 = vmatpush3.bf16.msra.mxu1 %v6309_v15 }
 0x8e2   : > { %5461 = vmatprep.subr.bf16.mxu1 %v6310_v22 }
 0x8e5   : > { %5462 = vmatpush3.bf16.msra.mxu1 %v6310_v22 }
 0x8e6   : > { %5463 = vmatprep.subr.bf16.mxu1 %v6311_v25 }
 0x8e9   : > { %5464 = vmatpush3.bf16.msra.mxu1 %v6311_v25 }
 0x8ea   : > { %5497 = vmatprep.subr.bf16.mxu1 %v6312_v52 }
 0x99e   : > { %v5419_v47 = vpop.f32.mrb[48].mxu1 }
 0x99f   : > { %v4203_v49 = vadd.f32 %v5419_v47, %v5266_v48  ;;  %v4194_v26 = vpop.f32.mrb[49].mxu1 }
 0x9a0   : > { %v4195_v30 = vadd.f32 %v5266_v48, %v4194_v26  ;;  %v5420_v34 = vpop.f32.mrb[50].mxu1  ;;  %v6319_v26 = vld [vmem:[#allocation15 + $0x38] sm:$0xff]  }
 0x9a1   : > { %v4206_v59 = vadd.f32 %v5420_v34, %v5266_v48  ;;  %v4197_v5 = vpop.f32.mrb[51].mxu1  ;;  %v4227_v40 = vmax.f32 %v4203_v49, 0.0  ;;  %v6318_v49 = vld [vmem:[#allocation15 + $0x30] sm:$0xff]  }
 0x9a2   : > { %v4198_v62 = vadd.f32 %v5266_v48, %v4197_v5  ;;  %v4225_v12 = vmax.f32 %v4195_v30, 0.0  ;;  %v5284_v30 = vld [vmem:[#allocation14 + $0x2] ss:$0 sm:$0xff] }
 0x9a3   : > { %v4228_v38 = vmax.f32 %v4206_v59, 0.0 }
 0x9a4   : > { %v4226_v3 = vmax.f32 %v4198_v62, 0.0 }
 0x9a5   : > { %v4234_v9 = vpack.c.bf16 %v4228_v38, %v4227_v40 }
 0x9a6   : > { %v4233_v7 = vpack.c.bf16 %v4226_v3, %v4225_v12 }
 0x9a8   : > { %5441 = vmatprep.mubr.bf16.mxu0 %v4233_v7 }
 0x9a9   : > { %5442 = vmatmul.mubr.bf16.vlgmr.msra.gmra.mrb[56].mxu0 %v4234_v9 }
 0x9aa   : > { %5474 = vmatpush3.bf16.msra.mxu0 %v6312_v52 }
 0x9ab   : > { %5475 = vmatprep.subr.bf16.mxu0 %v6313_v27 }
 0x9ae   : > { %v5423_v11 = vpop.f32.mrb[52].mxu1  ;;  %5476 = vmatpush3.bf16.msra.mxu0 %v6313_v27 }
 0x9af   : > { %v4219_v1 = vadd.f32 %v5423_v11, %v5266_v48  ;;  %v4210_v45 = vpop.f32.mrb[53].mxu1  ;;  %5477 = vmatprep.subr.bf16.mxu0 %v6314_v2 }
 0x9b0   : > { %v4211_v13 = vadd.f32 %v5266_v48, %v4210_v45  ;;  %v5424_v57 = vpop.f32.mrb[54].mxu1 }
 0x9b1   : > { %v4222_v14 = vadd.f32 %v5424_v57, %v5266_v48  ;;  %v4213_v6 = vpop.f32.mrb[55].mxu1  ;;  %v4231_v56 = vmax.f32 %v4219_v1, 0.0 }
 0x9b2   : > { %v4214_v23 = vadd.f32 %v5266_v48, %v4213_v6  ;;  %v4229_v19 = vmax.f32 %v4211_v13, 0.0  ;;  %5478 = vmatpush3.bf16.msra.mxu0 %v6314_v2 }
 0x9b3   : > { %v4232_v58 = vmax.f32 %v4222_v14, 0.0  ;;  %5479 = vmatprep.subr.bf16.mxu0 %v6315_v10 }
 0x9b4   : > { %v4230_v16 = vmax.f32 %v4214_v23, 0.0 }
 0x9b5   : > { %v4236_v4 = vpack.c.bf16 %v4232_v58, %v4231_v56 }
 0x9b6   : > { %v4235_v32 = vpack.c.bf16 %v4230_v16, %v4229_v19  ;;  %5480 = vmatpush3.bf16.msra.mxu0 %v6315_v10 }
 0x9b7   : > { %5481 = vmatprep.subr.bf16.mxu0 %v6316_v28 }
 0x9b8   : > { %5445 = vmatprep.mubr.bf16.mxu0 %v4235_v32 }
 0x9b9   : > { %5446 = vmatmul.mubr.bf16.gmra.mrb[60].mxu0 %v4236_v4 }
 0x9ba   : > { %5482 = vmatpush3.bf16.msra.mxu0 %v6316_v28 }
 0x9bb   : > { %5483 = vmatprep.subr.bf16.mxu0 %v6317_v24 }
 0x9be   : > { %5484 = vmatpush3.bf16.msra.mxu0 %v6317_v24 }
 0x9bf   : > { %5485 = vmatprep.subr.bf16.mxu0 %v6318_v49 }
 0x9c2   : > { %5486 = vmatpush3.bf16.msra.mxu0 %v6318_v49 }
 0x9c3   : > { %5487 = vmatprep.subr.bf16.mxu0 %v6319_v26 }
 0x9c6   : > { %5488 = vmatpush3.bf16.msra.mxu0 %v6319_v26 }
 0xa7c   : > { %v5443_v8 = vpop.f32.mrb[56].mxu0 }
 0xa7d   : > { %v4353_v29 = vadd.f32 %v5443_v8, %v5275_v55  ;;  %v4344_v54 = vpop.f32.mrb[57].mxu0 }
 0xa7e   : > { %v4345_v18 = vadd.f32 %v5275_v55, %v4344_v54  ;;  %v5444_v60 = vpop.f32.mrb[58].mxu0 }
 0xa7f   : > { %v4356_v33 = vadd.f32 %v5444_v60, %v5275_v55  ;;  %v4347_v35 = vpop.f32.mrb[59].mxu0  ;;  %v4377_v61 = vmax.f32 %v4353_v29, 0.0 }
 0xa80   : > { %v4348_v53 = vadd.f32 %v5275_v55, %v4347_v35  ;;  %v4375_v39 = vmax.f32 %v4345_v18, 0.0 }
 0xa81   : > { %v4378_v50 = vmax.f32 %v4356_v33, 0.0 }
 0xa82   : > { %v4376_v21 = vmax.f32 %v4348_v53, 0.0 }
 0xa83   : > { %v4384_v31 = vpack.c.bf16 %v4378_v50, %v4377_v61 }
 0xa84   : > { %v4383_v41 = vpack.c.bf16 %v4376_v21, %v4375_v39 }
 0xa86   : > { %5465 = vmatprep.mubr.bf16.mxu1 %v4383_v41 }
 0xa87   : > { %5466 = vmatmul.mubr.bf16.vlgmr.msra.gmra.mrb[56].mxu1 %v4384_v31 }
 0xa88   : > { %5505 = vmatpush3.bf16.msra.mxu1 %v6312_v52 }
 0xa89   : > { %5498 = vmatprep.subr.bf16.mxu1 %v6313_v27 }
 0xa8c   : > { %v5447_v46 = vpop.f32.mrb[60].mxu0  ;;  %5506 = vmatpush3.bf16.msra.mxu1 %v6313_v27 }
 0xa8d   : > { %v4369_v42 = vadd.f32 %v5447_v46, %v5275_v55  ;;  %v4360_v43 = vpop.f32.mrb[61].mxu0  ;;  %5499 = vmatprep.subr.bf16.mxu1 %v6314_v2 }
 0xa8e   : > { %v4361_v37 = vadd.f32 %v5275_v55, %v4360_v43  ;;  %v5448_v20 = vpop.f32.mrb[62].mxu0 }
 0xa8f   : > { %v4372_v63 = vadd.f32 %v5448_v20, %v5275_v55  ;;  %v4363_v51 = vpop.f32.mrb[63].mxu0  ;;  %v4381_v44 = vmax.f32 %v4369_v42, 0.0 }
 0xa90   : > { %v4364_v0 = vadd.f32 %v5275_v55, %v4363_v51  ;;  %5507 = vmatpush3.bf16.msra.mxu1 %v6314_v2  ;;  %v4379_v17 = vmax.f32 %v4361_v37, 0.0  ;;  %v5293_v2 = vld [vmem:[#allocation17] ss:$0 sm:$0xff] }
 0xa91   : > { %v4382_v36 = vmax.f32 %v4372_v63, 0.0  ;;  %5500 = vmatprep.subr.bf16.mxu1 %v6315_v10 }
 0xa92   : > { %v4380_v15 = vmax.f32 %v4364_v0, 0.0 }
 0xa93   : > { %v4386_v48 = vpack.c.bf16 %v4382_v36, %v4381_v44 }
 0xa94   : > { %v4385_v47 = vpack.c.bf16 %v4380_v15, %v4379_v17  ;;  %5508 = vmatpush3.bf16.msra.mxu1 %v6315_v10 }
 0xa95   : > { %5501 = vmatprep.subr.bf16.mxu1 %v6316_v28 }
 0xa96   : > { %5469 = vmatprep.mubr.bf16.mxu1 %v4385_v47 }
 0xa97   : > { %5470 = vmatmul.mubr.bf16.gmra.mrb[60].mxu1 %v4386_v48 }
 0xa98   : > { %5509 = vmatpush3.bf16.msra.mxu1 %v6316_v28 }
 0xa99   : > { %5502 = vmatprep.subr.bf16.mxu1 %v6317_v24 }
 0xa9c   : > { %5510 = vmatpush3.bf16.msra.mxu1 %v6317_v24 }
 0xa9d   : > { %5503 = vmatprep.subr.bf16.mxu1 %v6318_v49 }
 0xaa0   : > { %5511 = vmatpush3.bf16.msra.mxu1 %v6318_v49 }
 0xaa1   : > { %5504 = vmatprep.subr.bf16.mxu1 %v6319_v26 }
 0xaa4   : > { %5512 = vmatpush3.bf16.msra.mxu1 %v6319_v26 }
 0xb5a   : > { %v5467_v34 = vpop.f32.mrb[56].mxu1 }
 0xb5b   : > { %v4503_v59 = vadd.f32 %v5467_v34, %v5284_v30  ;;  %v4494_v5 = vpop.f32.mrb[57].mxu1 }
 0xb5c   : > { %v4495_v62 = vadd.f32 %v5284_v30, %v4494_v5  ;;  %v5468_v40 = vpop.f32.mrb[58].mxu1 }
 0xb5d   : > { %v4506_v38 = vadd.f32 %v5468_v40, %v5284_v30  ;;  %v4497_v12 = vpop.f32.mrb[59].mxu1  ;;  %v4527_v9 = vmax.f32 %v4503_v59, 0.0 }
 0xb5e   : > { %v4498_v3 = vadd.f32 %v5284_v30, %v4497_v12  ;;  %v4525_v11 = vmax.f32 %v4495_v62, 0.0 }
 0xb5f   : > { %v4528_v7 = vmax.f32 %v4506_v38, 0.0 }
 0xb60   : > { %v4526_v1 = vmax.f32 %v4498_v3, 0.0 }
 0xb61   : > { %v4534_v45 = vpack.c.bf16 %v4528_v7, %v4527_v9 }
 0xb62   : > { %v4533_v13 = vpack.c.bf16 %v4526_v1, %v4525_v11 }
 0xb64   : > { %5489 = vmatprep.mubr.bf16.mxu0 %v4533_v13 }
 0xb65   : > { %5490 = vmatmul.mubr.bf16.vlgmr.msra.gmra.mrb[64].mxu0 %v4534_v45 }
 0xb6a   : > { %v5471_v57 = vpop.f32.mrb[60].mxu1 }
 0xb6b   : > { %v4519_v14 = vadd.f32 %v5471_v57, %v5284_v30  ;;  %v4510_v6 = vpop.f32.mrb[61].mxu1 }
 0xb6c   : > { %v4511_v23 = vadd.f32 %v5284_v30, %v4510_v6  ;;  %v5472_v56 = vpop.f32.mrb[62].mxu1 }
 0xb6d   : > { %v4522_v58 = vadd.f32 %v5472_v56, %v5284_v30  ;;  %v4513_v19 = vpop.f32.mrb[63].mxu1  ;;  %v4531_v4 = vmax.f32 %v4519_v14, 0.0 }
 0xb6e   : > { %v4514_v16 = vadd.f32 %v5284_v30, %v4513_v19  ;;  %v4529_v22 = vmax.f32 %v4511_v23, 0.0 }
 0xb6f   : > { %v4532_v32 = vmax.f32 %v4522_v58, 0.0 }
 0xb70   : > { %v4530_v25 = vmax.f32 %v4514_v16, 0.0 }
 0xb71   : > { %v4536_v52 = vpack.c.bf16 %v4532_v32, %v4531_v4 }
 0xb72   : > { %v4535_v27 = vpack.c.bf16 %v4530_v25, %v4529_v22 }
 0xb74   : > { %5493 = vmatprep.mubr.bf16.mxu1 %v4535_v27 }
 0xb75   : > { %5494 = vmatmul.mubr.bf16.vlgmr.msra.gmra.mrb[64].mxu1 %v4536_v52 }
 0xc38   : > { %v5491_v10 = vpop.f32.mrb[64].mxu0 }
 0xc39   : > { %v4651_v28 = vadd.f32 %v5491_v10, %v5293_v2  ;;  %v4642_v24 = vpop.f32.mrb[65].mxu0 }
 0xc3a   : > { %v4643_v55 = vadd.f32 %v5293_v2, %v4642_v24  ;;  %v5492_v8 = vpop.f32.mrb[66].mxu0 }
 0xc3b   : > { %v5304_v29 = vmul.f32 -1.442695, %v4651_v28  ;;  %v4654_v54 = vadd.f32 %v5492_v8, %v5293_v2  ;;  %v4645_v18 = vpop.f32.mrb[67].mxu0 }
 0xc3c   : > { %v5302_v60 = vmul.f32 -1.442695, %v4643_v55  ;;  %v4646_v33 = vadd.f32 %v5293_v2, %v4645_v18 }
 0xc3d   : > { %6512 = vpow2.f32 %v5304_v29  ;;  %v5305_v35 = vmul.f32 -1.442695, %v4654_v54 }
 0xc3e   : > { %6514 = vpow2.f32 %v5302_v60  ;;  %v5303_v53 = vmul.f32 -1.442695, %v4646_v33 }
 0xc3f   : > { %6516 = vpow2.f32 %v5305_v35 }
 0xc40   : > { %6518 = vpow2.f32 %v5303_v53 }
 0xc47   : > { %v6513_v61 = vpop.eup %6512 }
 0xc48   : > { %v6515_v50 = vpop.eup %6514  ;;  %v4699_v39 = vadd.f32 1.0, %v6513_v61  ;;  %v5495_v21 = vpop.f32.mrb[64].mxu1 }
 0xc49   : > { %v6517_v31 = vpop.eup %6516  ;;  %v4697_v41 = vadd.f32 1.0, %v6515_v50  ;;  %v4667_v46 = vadd.f32 %v5495_v21, %v5293_v2  ;;  %v4658_v42 = vpop.f32.mrb[65].mxu1 }
 0xc4a   : > { %v6519_v43 = vpop.eup %6518  ;;  %6520 = vrcp.f32 %v4699_v39  ;;  %v4700_v37 = vadd.f32 1.0, %v6517_v31  ;;  %v4659_v20 = vadd.f32 %v5293_v2, %v4658_v42  ;;  %v5496_v63 = vpop.f32.mrb[66].mxu1 }
 0xc4b   : > { %6522 = vrcp.f32 %v4697_v41  ;;  %v4698_v51 = vadd.f32 1.0, %v6519_v43  ;;  %v5308_v0 = vmul.f32 -1.442695, %v4667_v46  ;;  %v4670_v44 = vadd.f32 %v5496_v63, %v5293_v2  ;;  %v4661_v36 = vpop.f32.mrb[67].mxu1 }
 0xc4c   : > { %6524 = vrcp.f32 %v4700_v37  ;;  %v5306_v17 = vmul.f32 -1.442695, %v4659_v20  ;;  %v4662_v15 = vadd.f32 %v5293_v2, %v4661_v36 }
 0xc4d   : > { %6526 = vrcp.f32 %v4698_v51  ;;  %v5309_v48 = vmul.f32 -1.442695, %v4670_v44 }
 0xc4e   : > { %6528 = vpow2.f32 %v5308_v0  ;;  %v5307_v47 = vmul.f32 -1.442695, %v4662_v15 }
 0xc4f   : > { %6530 = vpow2.f32 %v5306_v17 }
 0xc50   : > { %6532 = vpow2.f32 %v5309_v48 }
 0xc51   : > { %6534 = vpow2.f32 %v5307_v47 }
 0xc54   : > { %v6521_v49 = vpop.eup %6520 }
 0xc55   : > { %v6523_v26 = vpop.eup %6522  ;;  %4723 = vst [vmem:[%s462_s18 + $0x10] sm:$0xff] %v6521_v49 }
 0xc56   : > { %v6525_v30 = vpop.eup %6524  ;;  %4721 = vst [vmem:[%s462_s18] sm:$0xff] %v6523_v26 }
 0xc57   : > { %v6527_v34 = vpop.eup %6526  ;;  %4724 = vst [vmem:[%s462_s18 + $0x18] sm:$0xff] %v6525_v30 }
 0xc58   : > { %v6529_v59 = vpop.eup %6528  ;;  %4722 = vst [vmem:[%s462_s18 + $0x8] sm:$0xff] %v6527_v34 }
 0xc59   : > { %v6531_v5 = vpop.eup %6530  ;;  %v4703_v62 = vadd.f32 1.0, %v6529_v59 }
 0xc5a   : > { %v6533_v40 = vpop.eup %6532  ;;  %v4701_v38 = vadd.f32 1.0, %v6531_v5 }
 0xc5b   : > { %v6535_v12 = vpop.eup %6534  ;;  %6536 = vrcp.f32 %v4703_v62  ;;  %v4704_v3 = vadd.f32 1.0, %v6533_v40 }
 0xc5c   : > { %6538 = vrcp.f32 %v4701_v38  ;;  %v4702_v9 = vadd.f32 1.0, %v6535_v12 }
 0xc5d   : > { %6540 = vrcp.f32 %v4704_v3 }
 0xc5e   : > { %6542 = vrcp.f32 %v4702_v9 }
 0xc65   : > { %v6537_v7 = vpop.eup %6536 }
 0xc66   : > { %v6539_v11 = vpop.eup %6538  ;;  %4727 = vst [vmem:[%s462_s18 + $0x30] sm:$0xff] %v6537_v7 }
 0xc67   : > { %v6541_v1 = vpop.eup %6540  ;;  %4725 = vst [vmem:[%s462_s18 + $0x20] sm:$0xff] %v6539_v11 }
 0xc68   : > { %v6543_v45 = vpop.eup %6542  ;;  %4728 = vst [vmem:[%s462_s18 + $0x38] sm:$0xff] %v6541_v1 }
 0xc69   : > { %4726 = vst [vmem:[%s462_s18 + $0x28] sm:$0xff] %v6543_v45 }
 0xc6a   : > { %6811 = shalt.err (!%p6808_p9)
}
 0xc6b   : > { %s6812_s9 = scalar_lea.hbm %s7696_s24, 1024  ;;  %s6816_s29 = scalar_lea.hbm %s7782_s25, 2048 }
 0xc6c   : > { %p6813_p4 = scmp.ne.s32.totalorder %s7696_s24, %s6812_s9  ;;  %p6817_p2 = scmp.lt.u32.totalorder %s7696_s24, %s7782_s25 }
 0xc6d   : > { %p6818_p6 = scmp.lt.u32.totalorder %s6816_s29, %s6812_s9  ;;  %p6820_p10 = scmp.lt.u32.totalorder %s6812_s9, %s7696_s24 }
 0xc6e   : > { %p6814_p3 = pnand %p6813_p4, %p7783_p1 }
 0xc6f   : > { %p6819_p5 = por %p6818_p6, %p6817_p2 }
 0xc70   : > { %p6815_p0 = pneg %p6814_p3 }
 0xc71   : > { %p6821_p11 = por %p6820_p10, %p6819_p5 }
 0xc73   : > { %p6822_p12 = pnand %p6821_p11, %p6815_p0 }
 0xc75   : > { %6825 = shalt.err (!%p6822_p12)
}
 0xc76   : > { %s6902_s21 = smov 128   ;;  %s6903_s28 = smov 8  }
 0xc77   : > { %5739 = dma.vmem_to_hbm [thread:$0]  (%p7783_p1), %s7698_s1, 1024, %s7696_s24, %s4730_s15, %s6902_s21, %s6902_s21, %s6903_s28  }
 0xc78 PF: > { %s4758_s20 = sand.u32 1, %s6868_s30   ;;  %p7784_p13 = scmp.ne.s32.totalorder %s7770_s26, 0 }
 0xc79   : > { %p7785_p8 = scmp.ge.s32.totalorder %s6880_s12, 2  ;;  %s4759_s23 = scalar_lea.sflag [#allocation5], %s4758_s20 }
 0xc7b   : > { %p5771_p7 = pnand %p7785_p8, %p7784_p13 }
 0xc7d   : > { %6863 = dma.done.wait (!%p5771_p7), %s4759_s23, 1024  }
 0xc7e   : > { %6865 = vsyncadd (!%p5771_p7), %s4759_s23, 4294966272  ;;  %p26_p9 = scmp.ge.s32.totalorder %s7171_s19, 4   ;;  %s7786_s30 = smov %s6872_s10 }
 0xc7f   : > { %s7787_s10 = smov %s6876_s11  ;;  %s7788_s11 = smov %s7182_s13 }
 0xc80   : > { %s7789_s12 = smov %s7171_s19  ;;  %28 = sbr.rel (!%p26_p9) target bundleno = 12 (0xc), region = 147 }
 0xc87   :  { %4764 = vsyncpa [#allocation4], 1 }
 0xc88   :  { %4766 = vsyncpa [#allocation4 + $0x1], 1 }
 0xc89   :  { %4767 = vsyncpa [#allocation7], 1 }
 0xc8a   :  { %4768 = vsyncpa [#allocation10], 1 }
 0xc8b   :  { %4769 = vsyncpa [#allocation13], 1 }
 0xc8c   :  { %4770 = vsyncpa [#allocation16], 1 }
 0xc8d   :  { %4771 = vsyncpa [#allocation5], 1 }
 0xc8e   :  { %4773 = vsyncpa [#allocation5 + $0x1], 1 }

</bundles_post_ra>
